<compile_context>
chip_gen: v7x
topology: tpu7x:2x2x1
jax: 0.10.0
libtpu: 0.0.40
codegen_flags: <defaults>
</compile_context>

<pallas_src>
import functools

import jax
import jax.numpy as jnp
from jax.experimental import pallas as pl
from jax.experimental.pallas import tpu as pltpu

H = 256        # rnn_hidden_size
E = 256        # char_embedding_size
NLAYER = 2
NEG_INF = -1e30


def _round_up(x, m):
    return -(-x // m) * m


def decoder_kernel(tok_ref, table_ref, prectx_ref, enc_ref, h_prev_ref, c_prev_ref,
                   w0_ref, b0_ref, w1_ref, b1_ref, wcl_ref, bcl_ref,
                   attn_h_ref, h_t_ref, c_t_ref,
                   rnn_sc, m_sc, l_sc, acc_sc,
                   *, s_true, tile_s, n_blk, n_real, need_mask):
    b_pad = prectx_ref.shape[0]

    def gather_embedding():
        # Vocab table is VMEM-resident (tiny); gather only the B real rows with
        # dynamic sublane slices indexed by the scalar-prefetched token ids.
        rows = [table_ref[pl.ds(tok_ref[b], 1), :] for b in range(n_real)]
        if n_real < b_pad:
            rows.append(jnp.zeros((b_pad - n_real, E), jnp.float32))
        return jnp.concatenate(rows, axis=0)                 # (b_pad, E) f32

    def lstm_cell(x_cat, c_prev, w_ref, b_ref):
        # fused [x, h_prev] @ [W_ih ; W_hh]^T -- single bf16 MXU matmul, f32 acc
        gates = jnp.dot(x_cat.astype(jnp.bfloat16), w_ref[...],
                        preferred_element_type=jnp.float32) + b_ref[...]
        i = jax.nn.sigmoid(gates[:, 0 * H:1 * H])
        f = jax.nn.sigmoid(gates[:, 1 * H:2 * H])
        g = jnp.tanh(gates[:, 2 * H:3 * H])
        o = jax.nn.sigmoid(gates[:, 3 * H:4 * H])
        c_new = f * c_prev + i * g
        return o * jnp.tanh(c_new), c_new

    def run_lstm():
        # embedding_dropout / inter-layer LSTM dropout are identity in eval mode.
        emb = gather_embedding()
        x0 = jnp.concatenate([emb, prectx_ref[...], h_prev_ref[0]], axis=1)
        h0, c0 = lstm_cell(x0, c_prev_ref[0], w0_ref, b0_ref)
        x1 = jnp.concatenate([h0, h_prev_ref[1]], axis=1)
        h1, c1 = lstm_cell(x1, c_prev_ref[1], w1_ref, b1_ref)
        h_t_ref[0] = h0
        h_t_ref[1] = h1
        c_t_ref[0] = c0
        c_t_ref[1] = c1
        return h1

    def dot_scores(enc_f32, rnn, s_base):
        # scores[b, s] = <enc[b, s, :], rnn[b, :]>  -> lane-dense (b_pad, tile)
        scores = jnp.sum(enc_f32 * rnn[:, None, :], axis=-1)
        if need_mask:  # compile-time: only emitted when S padding exists
            pos = s_base + jax.lax.broadcasted_iota(jnp.int32, scores.shape, 1)
            scores = jnp.where(pos < s_true, scores, NEG_INF)
        return scores

    def concat_linear(context, rnn):
        cc = jnp.concatenate([context, rnn], axis=1)
        out = jnp.tanh(jnp.dot(cc.astype(jnp.bfloat16), wcl_ref[...],
                               preferred_element_type=jnp.float32) + bcl_ref[...])
        # attention_h_dropout (p=0.1) is identity in eval mode.
        return out

    if n_blk == 1:
        # ---- single-shot path: whole (padded) enc in one block, plain softmax
        h1 = run_lstm()
        enc = enc_ref[...].astype(jnp.float32)               # (b_pad, S_pad, H)
        scores = dot_scores(enc, h1, 0)
        m = jnp.max(scores, axis=-1, keepdims=True)          # (b_pad, 1)
        p = jnp.exp(scores - m)
        l = jnp.sum(p, axis=-1, keepdims=True)
        context = jnp.sum(p[:, :, None] * enc, axis=1) / l   # (b_pad, H)
        attn_h_ref[...] = concat_linear(context, h1)
    else:
        # ---- streamed path: enc tiled over S, online softmax in VMEM scratch
        s_blk = pl.program_id(0)

        @pl.when(s_blk == 0)
        def _init():
            rnn_sc[...] = run_lstm()
            m_sc[...] = jnp.full(m_sc.shape, NEG_INF, m_sc.dtype)
            l_sc[...] = jnp.zeros(l_sc.shape, l_sc.dtype)
            acc_sc[...] = jnp.zeros(acc_sc.shape, acc_sc.dtype)

        enc = enc_ref[...].astype(jnp.float32)               # (b_pad, tile, H)
        rnn = rnn_sc[...]
        scores = dot_scores(enc, rnn, s_blk * tile_s)

        m_prev = m_sc[...]                                   # (b_pad, 1)
        m_new = jnp.maximum(m_prev, jnp.max(scores, axis=-1, keepdims=True))
        alpha = jnp.exp(m_prev - m_new)
        p = jnp.exp(scores - m_new)                          # (b_pad, tile)
        l_sc[...] = alpha * l_sc[...] + jnp.sum(p, axis=-1, keepdims=True)
        acc_sc[...] = alpha * acc_sc[...] + jnp.sum(p[:, :, None] * enc, axis=1)
        m_sc[...] = m_new

        @pl.when(s_blk == n_blk - 1)
        def _finalize():
            context = acc_sc[...] / l_sc[...]                # (b_pad, H)
            attn_h_ref[...] = concat_linear(context, rnn_sc[...])


def decoder_forward(tok, emb_table, pre_ctx, encoder_outputs_sbh, h_prev, c_prev,
                    params, *, max_tile_s=512):
    """Single decode timestep.

    tok: (B,) int32; encoder_outputs_sbh: (S, B, H) f32 (PyTorch layout);
    pre_ctx: (B, H); h_prev/c_prev: (NLAYER, B, H).
    """
    assert max_tile_s % 8 == 0
    B = int(tok.shape[0])
    S = int(encoder_outputs_sbh.shape[0])
    V = int(emb_table.shape[0])
    assert S >= 1, "attention over an empty encoder sequence is undefined"

    b_pad = max(8, _round_up(B, 8))          # pad batch to full f32 sublanes
    v_pad = _round_up(V, 8)

    s_pad8 = _round_up(S, 8)
    if s_pad8 <= max_tile_s:
        ts, n_blk = s_pad8, 1                # single grid step, no online softmax
    else:
        ts = max_tile_s
        n_blk = -(-S // ts)
    s_pad = ts * n_blk
    need_mask = (s_pad != S)

    # (S, B, H) -> (B, S, H): softmax axis lands on the 128-wide lane axis inside
    # the kernel (lane-dense scores).  Matches the module's own permute(1,0,2).
    enc = jnp.transpose(encoder_outputs_sbh.astype(jnp.bfloat16), (1, 0, 2))
    enc = jnp.pad(enc, ((0, b_pad - B), (0, s_pad - S), (0, 0)))

    table_p = jnp.pad(emb_table, ((0, v_pad - V), (0, 0)))
    tok_p = jnp.pad(tok.astype(jnp.int32), (0, b_pad - B))
    pre_p = jnp.pad(pre_ctx, ((0, b_pad - B), (0, 0)))
    h_p = jnp.pad(h_prev, ((0, 0), (0, b_pad - B), (0, 0)))
    c_p = jnp.pad(c_prev, ((0, 0), (0, b_pad - B), (0, 0)))

    grid_spec = pltpu.PrefetchScalarGridSpec(
        num_scalar_prefetch=1,                # token ids -> SMEM
        grid=(n_blk,),
        in_specs=[
            pl.BlockSpec((v_pad, E), lambda s, tok: (0, 0)),             # emb table (VMEM)
            pl.BlockSpec((b_pad, H), lambda s, tok: (0, 0)),             # pre_context
            pl.BlockSpec((b_pad, ts, H), lambda s, tok: (0, s, 0)),      # enc (B,S,H), streamed over S
            pl.BlockSpec((NLAYER, b_pad, H), lambda s, tok: (0, 0, 0)),  # h_prev
            pl.BlockSpec((NLAYER, b_pad, H), lambda s, tok: (0, 0, 0)),  # c_prev
            pl.BlockSpec((E + 2 * H, 4 * H), lambda s, tok: (0, 0)),     # W0 (fused, bf16)
            pl.BlockSpec((1, 4 * H), lambda s, tok: (0, 0)),             # b0
            pl.BlockSpec((2 * H, 4 * H), lambda s, tok: (0, 0)),         # W1 (fused, bf16)
            pl.BlockSpec((1, 4 * H), lambda s, tok: (0, 0)),             # b1
            pl.BlockSpec((2 * H, H), lambda s, tok: (0, 0)),             # Wcl (bf16)
            pl.BlockSpec((1, H), lambda s, tok: (0, 0)),                 # bcl
        ],
        out_specs=(
            pl.BlockSpec((b_pad, H), lambda s, tok: (0, 0)),             # attn_h
            pl.BlockSpec((NLAYER, b_pad, H), lambda s, tok: (0, 0, 0)),  # h_t
            pl.BlockSpec((NLAYER, b_pad, H), lambda s, tok: (0, 0, 0)),  # c_t
        ),
        scratch_shapes=[
            pltpu.VMEM((b_pad, H), jnp.float32),   # rnn_out (resident across S blocks)
            pltpu.VMEM((b_pad, 1), jnp.float32),   # running softmax max
            pltpu.VMEM((b_pad, 1), jnp.float32),   # running softmax denom
            pltpu.VMEM((b_pad, H), jnp.float32),   # context accumulator
        ],
    )

    out_shape = (
        jax.ShapeDtypeStruct((b_pad, H), jnp.float32),
        jax.ShapeDtypeStruct((NLAYER, b_pad, H), jnp.float32),
        jax.ShapeDtypeStruct((NLAYER, b_pad, H), jnp.float32),
    )

    attn_h, h_t, c_t = pl.pallas_call(
        functools.partial(decoder_kernel, s_true=S, tile_s=ts, n_blk=n_blk,
                          n_real=B, need_mask=need_mask),
        grid_spec=grid_spec,
        out_shape=out_shape,
        compiler_params=pltpu.CompilerParams(
            dimension_semantics=("arbitrary",),
            vmem_limit_bytes=28 * 1024 * 1024),
    )(tok_p, table_p, pre_p, enc, h_p, c_p,
      params['W0'], params['b0'], params['W1'], params['b1'],
      params['Wcl'], params['bcl'])

    return attn_h[:B], (h_t[:, :B], c_t[:, :B])


def init_params(key, vocab_size):
    """PyTorch-shaped weights, then fused/transposed/bf16-cast for the kernel."""
    ks = jax.random.split(key, 11)
    s = 0.05
    emb_table = jax.random.normal(ks[0], (vocab_size, E), jnp.float32) * s
    w_ih0 = jax.random.normal(ks[1], (4 * H, E + H), jnp.float32) * s
    w_hh0 = jax.random.normal(ks[2], (4 * H, H), jnp.float32) * s
    b_ih0 = jax.random.normal(ks[3], (4 * H,), jnp.float32) * s
    b_hh0 = jax.random.normal(ks[4], (4 * H,), jnp.float32) * s
    w_ih1 = jax.random.normal(ks[5], (4 * H, H), jnp.float32) * s
    w_hh1 = jax.random.normal(ks[6], (4 * H, H), jnp.float32) * s
    b_ih1 = jax.random.normal(ks[7], (4 * H,), jnp.float32) * s
    b_hh1 = jax.random.normal(ks[8], (4 * H,), jnp.float32) * s
    w_cl = jax.random.normal(ks[9], (H, 2 * H), jnp.float32) * s
    b_cl = jax.random.normal(ks[10], (H,), jnp.float32) * s
    params = dict(
        W0=jnp.concatenate([w_ih0.T, w_hh0.T], axis=0).astype(jnp.bfloat16),  # (E+2H, 4H)
        b0=(b_ih0 + b_hh0).reshape(1, 4 * H),
        W1=jnp.concatenate([w_ih1.T, w_hh1.T], axis=0).astype(jnp.bfloat16),  # (2H, 4H)
        b1=(b_ih1 + b_hh1).reshape(1, 4 * H),
        Wcl=w_cl.T.astype(jnp.bfloat16),                                      # (2H, H)
        bcl=b_cl.reshape(1, H),
    )
    return emb_table, params


def reference_forward(tok, emb_table, pre_ctx, enc_sbh, h_prev, c_prev, params):
    """Pure-JAX reference of the same math (same bf16 quantization choices)."""
    enc = jnp.transpose(enc_sbh.astype(jnp.bfloat16).astype(jnp.float32), (1, 0, 2))  # (B,S,H)
    emb = emb_table[tok]

    def cell(x_cat, c, W, b):
        g = jnp.dot(x_cat.astype(jnp.bfloat16), W,
                    preferred_element_type=jnp.float32) + b
        i = jax.nn.sigmoid(g[:, :H])
        f = jax.nn.sigmoid(g[:, H:2 * H])
        gg = jnp.tanh(g[:, 2 * H:3 * H])
        o = jax.nn.sigmoid(g[:, 3 * H:])
        c_new = f * c + i * gg
        return o * jnp.tanh(c_new), c_new

    x0 = jnp.concatenate([emb, pre_ctx, h_prev[0]], axis=1)
    h0, c0 = cell(x0, c_prev[0], params['W0'], params['b0'])
    x1 = jnp.concatenate([h0, h_prev[1]], axis=1)
    h1, c1 = cell(x1, c_prev[1], params['W1'], params['b1'])

    scores = jnp.sum(enc * h1[:, None, :], axis=-1)          # (B, S)
    w = jax.nn.softmax(scores, axis=-1)
    ctx = jnp.sum(w[:, :, None] * enc, axis=1)               # (B, H)
    attn_h = jnp.tanh(jnp.dot(jnp.concatenate([ctx, h1], axis=1).astype(jnp.bfloat16),
                              params['Wcl'], preferred_element_type=jnp.float32)
                      + params['bcl'])
    return attn_h, (jnp.stack([h0, h1]), jnp.stack([c0, c1]))


if __name__ == "__main__":
    B, S, V = 4, 20, 37
    key = jax.random.PRNGKey(0)
    k_par, k_tok, k_enc, k_ctx, k_h, k_c = jax.random.split(key, 6)

    emb_table, params = init_params(k_par, V)
    tok = jax.random.randint(k_tok, (B,), 0, V, dtype=jnp.int32)
    encoder_outputs = jax.random.normal(k_enc, (S, B, H), jnp.float32)   # (seq, batch, H)
    pre_ctx = jax.random.normal(k_ctx, (B, H), jnp.float32)
    h_prev = jax.random.normal(k_h, (NLAYER, B, H), jnp.float32) * 0.1
    c_prev = jax.random.normal(k_c, (NLAYER, B, H), jnp.float32) * 0.1

    ref_attn, (ref_h, ref_c) = reference_forward(tok, emb_table, pre_ctx,
                                                 encoder_outputs, h_prev, c_prev, params)

    # Path 1: default config -> whole enc in one grid step (plain softmax path).
    attn_h, (h_t, c_t) = decoder_forward(tok, emb_table, pre_ctx, encoder_outputs,
                                         h_prev, c_prev, params)
    jax.block_until_ready((attn_h, h_t, c_t))
    assert attn_h.shape == (B, H) and h_t.shape == (NLAYER, B, H) and c_t.shape == (NLAYER, B, H)
    assert jnp.allclose(attn_h, ref_attn, atol=2e-3, rtol=2e-3), "attn_h mismatch (single-step)"
    assert jnp.allclose(h_t, ref_h, atol=2e-3, rtol=2e-3), "h_t mismatch (single-step)"
    assert jnp.allclose(c_t, ref_c, atol=2e-3, rtol=2e-3), "c_t mismatch (single-step)"

    # Path 2: force the streamed online-softmax path (several S tiles + ragged mask).
    attn_h2, (h_t2, c_t2) = decoder_forward(tok, emb_table, pre_ctx, encoder_outputs,
                                            h_prev, c_prev, params, max_tile_s=8)
    jax.block_until_ready((attn_h2, h_t2, c_t2))
    assert jnp.allclose(attn_h2, ref_attn, atol=2e-3, rtol=2e-3), "attn_h mismatch (streamed)"
    assert jnp.allclose(h_t2, ref_h, atol=2e-3, rtol=2e-3), "h_t mismatch (streamed)"
    assert jnp.allclose(c_t2, ref_c, atol=2e-3, rtol=2e-3), "c_t mismatch (streamed)"

    print("KERNEL_OK")
</pallas_src>

<mosaic_0001>
module attributes {stable_mosaic.version = 11 : i64} {
  func.func @decoder_kernel(%arg0: i32, %arg1: memref<8xi32, #tpu.memory_space<smem>>, %arg2: memref<40x256xf32, #tpu.memory_space<vmem>>, %arg3: memref<8x256xf32, #tpu.memory_space<vmem>>, %arg4: memref<8x24x256xbf16, #tpu.memory_space<vmem>>, %arg5: memref<2x8x256xf32, #tpu.memory_space<vmem>>, %arg6: memref<2x8x256xf32, #tpu.memory_space<vmem>>, %arg7: memref<768x1024xbf16, #tpu.memory_space<vmem>>, %arg8: memref<1x1024xf32, #tpu.memory_space<vmem>>, %arg9: memref<512x1024xbf16, #tpu.memory_space<vmem>>, %arg10: memref<1x1024xf32, #tpu.memory_space<vmem>>, %arg11: memref<512x256xbf16, #tpu.memory_space<vmem>>, %arg12: memref<1x256xf32, #tpu.memory_space<vmem>>, %arg13: memref<8x256xf32, #tpu.memory_space<vmem>>, %arg14: memref<2x8x256xf32, #tpu.memory_space<vmem>>, %arg15: memref<2x8x256xf32, #tpu.memory_space<vmem>>, %arg16: memref<8x256xf32, #tpu.memory_space<vmem>>, %arg17: memref<8x1xf32, #tpu.memory_space<vmem>>, %arg18: memref<8x1xf32, #tpu.memory_space<vmem>>, %arg19: memref<8x256xf32, #tpu.memory_space<vmem>>) attributes {dimension_semantics = [#tpu.dimension_semantics<arbitrary>], iteration_bounds = array<i64: 1>, scalar_prefetch = 1 : i64, scratch_operands = 4 : i64, tpu.core_type = #tpu.core_type<tc>, window_params = [{pipeline_mode = #tpu.pipeline_mode<synchronous>, transform_indices = @transform_0, window_bounds = array<i64: 40, 256>}, {pipeline_mode = #tpu.pipeline_mode<synchronous>, transform_indices = @transform_1, window_bounds = array<i64: 8, 256>}, {transform_indices = @transform_2, window_bounds = array<i64: 8, 24, 256>}, {pipeline_mode = #tpu.pipeline_mode<synchronous>, transform_indices = @transform_3, window_bounds = array<i64: 2, 8, 256>}, {pipeline_mode = #tpu.pipeline_mode<synchronous>, transform_indices = @transform_4, window_bounds = array<i64: 2, 8, 256>}, {pipeline_mode = #tpu.pipeline_mode<synchronous>, transform_indices = @transform_5, window_bounds = array<i64: 768, 1024>}, {pipeline_mode = #tpu.pipeline_mode<synchronous>, transform_indices = @transform_6, window_bounds = array<i64: 1, 1024>}, {pipeline_mode = #tpu.pipeline_mode<synchronous>, transform_indices = @transform_7, window_bounds = array<i64: 512, 1024>}, {pipeline_mode = #tpu.pipeline_mode<synchronous>, transform_indices = @transform_8, window_bounds = array<i64: 1, 1024>}, {pipeline_mode = #tpu.pipeline_mode<synchronous>, transform_indices = @transform_9, window_bounds = array<i64: 512, 256>}, {pipeline_mode = #tpu.pipeline_mode<synchronous>, transform_indices = @transform_10, window_bounds = array<i64: 1, 256>}, {pipeline_mode = #tpu.pipeline_mode<synchronous>, transform_indices = @transform_11, window_bounds = array<i64: 8, 256>}, {pipeline_mode = #tpu.pipeline_mode<synchronous>, transform_indices = @transform_12, window_bounds = array<i64: 2, 8, 256>}, {pipeline_mode = #tpu.pipeline_mode<synchronous>, transform_indices = @transform_13, window_bounds = array<i64: 2, 8, 256>}]} {
    %c0 = arith.constant 0 : index
    %0 = memref.load %arg1[%c0] : memref<8xi32, #tpu.memory_space<smem>>
    %1 = arith.index_cast %0 : i32 to index
    %c0_0 = arith.constant 0 : index
    %2 = vector.load %arg2[%1, %c0_0] : memref<40x256xf32, #tpu.memory_space<vmem>>, vector<1x256xf32>
    %c1 = arith.constant 1 : index
    %3 = memref.load %arg1[%c1] : memref<8xi32, #tpu.memory_space<smem>>
    %4 = arith.index_cast %3 : i32 to index
    %c0_1 = arith.constant 0 : index
    %5 = vector.load %arg2[%4, %c0_1] : memref<40x256xf32, #tpu.memory_space<vmem>>, vector<1x256xf32>
    %c2 = arith.constant 2 : index
    %6 = memref.load %arg1[%c2] : memref<8xi32, #tpu.memory_space<smem>>
    %7 = arith.index_cast %6 : i32 to index
    %c0_2 = arith.constant 0 : index
    %8 = vector.load %arg2[%7, %c0_2] : memref<40x256xf32, #tpu.memory_space<vmem>>, vector<1x256xf32>
    %c3 = arith.constant 3 : index
    %9 = memref.load %arg1[%c3] : memref<8xi32, #tpu.memory_space<smem>>
    %10 = arith.index_cast %9 : i32 to index
    %c0_3 = arith.constant 0 : index
    %11 = vector.load %arg2[%10, %c0_3] : memref<40x256xf32, #tpu.memory_space<vmem>>, vector<1x256xf32>
    %cst = arith.constant 0.000000e+00 : f32
    %12 = vector.broadcast %cst : f32 to vector<4x256xf32>
    %13 = tpu.concatenate %2, %5, %8, %11, %12 in 0 : vector<1x256xf32>, vector<1x256xf32>, vector<1x256xf32>, vector<1x256xf32>, vector<4x256xf32> -> vector<8x256xf32>
    %c0_4 = arith.constant 0 : index
    %c0_5 = arith.constant 0 : index
    %14 = vector.load %arg3[%c0_4, %c0_5] : memref<8x256xf32, #tpu.memory_space<vmem>>, vector<8x256xf32>
    %c0_6 = arith.constant 0 : index
    %c0_7 = arith.constant 0 : index
    %c0_8 = arith.constant 0 : index
    %15 = vector.load %arg5[%c0_6, %c0_7, %c0_8] : memref<2x8x256xf32, #tpu.memory_space<vmem>>, vector<1x8x256xf32>
    %16 = vector.shape_cast %15 : vector<1x8x256xf32> to vector<8x256xf32>
    %17 = tpu.concatenate %13, %14, %16 in 1 : vector<8x256xf32>, vector<8x256xf32>, vector<8x256xf32> -> vector<8x768xf32>
    %c0_9 = arith.constant 0 : index
    %c0_10 = arith.constant 0 : index
    %c0_11 = arith.constant 0 : index
    %18 = vector.load %arg6[%c0_9, %c0_10, %c0_11] : memref<2x8x256xf32, #tpu.memory_space<vmem>>, vector<1x8x256xf32>
    %19 = vector.shape_cast %18 : vector<1x8x256xf32> to vector<8x256xf32>
    %20 = arith.truncf %17 : vector<8x768xf32> to vector<8x768xbf16>
    %c0_12 = arith.constant 0 : index
    %c0_13 = arith.constant 0 : index
    %21 = vector.load %arg7[%c0_12, %c0_13] : memref<768x1024xbf16, #tpu.memory_space<vmem>>, vector<768x1024xbf16>
    %cst_14 = arith.constant dense<0.000000e+00> : vector<8x1024xf32>
    %22 = tpu.matmul %20, %21, %cst_14 {dimension_numbers = #tpu.dot_dimension_numbers<[1], [0], [0], [1], [0, 0, 1, 1], [], []>} : vector<8x768xbf16>, vector<768x1024xbf16>, vector<8x1024xf32> -> vector<8x1024xf32>
    %c0_15 = arith.constant 0 : index
    %c0_16 = arith.constant 0 : index
    %23 = vector.load %arg8[%c0_15, %c0_16] : memref<1x1024xf32, #tpu.memory_space<vmem>>, vector<1x1024xf32>
    %24 = vector.broadcast %23 : vector<1x1024xf32> to vector<8x1024xf32>
    %25 = arith.addf %22, %24 : vector<8x1024xf32>
    %26 = vector.extract_strided_slice %25 {offsets = [0, 0], sizes = [8, 256], strides = [1, 1]} : vector<8x1024xf32> to vector<8x256xf32>
    %27 = arith.negf %26 : vector<8x256xf32>
    %28 = math.exp %27 : vector<8x256xf32>
    %cst_17 = arith.constant 1.000000e+00 : f32
    %29 = vector.broadcast %cst_17 : f32 to vector<8x256xf32>
    %30 = arith.addf %29, %28 : vector<8x256xf32>
    %31 = arith.divf %29, %30 : vector<8x256xf32>
    %32 = vector.extract_strided_slice %25 {offsets = [0, 256], sizes = [8, 256], strides = [1, 1]} : vector<8x1024xf32> to vector<8x256xf32>
    %33 = arith.negf %32 : vector<8x256xf32>
    %34 = math.exp %33 : vector<8x256xf32>
    %cst_18 = arith.constant 1.000000e+00 : f32
    %35 = vector.broadcast %cst_18 : f32 to vector<8x256xf32>
    %36 = arith.addf %35, %34 : vector<8x256xf32>
    %37 = arith.divf %35, %36 : vector<8x256xf32>
    %38 = vector.extract_strided_slice %25 {offsets = [0, 512], sizes = [8, 256], strides = [1, 1]} : vector<8x1024xf32> to vector<8x256xf32>
    %39 = math.tanh %38 : vector<8x256xf32>
    %40 = vector.extract_strided_slice %25 {offsets = [0, 768], sizes = [8, 256], strides = [1, 1]} : vector<8x1024xf32> to vector<8x256xf32>
    %41 = arith.negf %40 : vector<8x256xf32>
    %42 = math.exp %41 : vector<8x256xf32>
    %cst_19 = arith.constant 1.000000e+00 : f32
    %43 = vector.broadcast %cst_19 : f32 to vector<8x256xf32>
    %44 = arith.addf %43, %42 : vector<8x256xf32>
    %45 = arith.divf %43, %44 : vector<8x256xf32>
    %46 = arith.mulf %37, %19 : vector<8x256xf32>
    %47 = arith.mulf %31, %39 : vector<8x256xf32>
    %48 = arith.addf %46, %47 : vector<8x256xf32>
    %49 = math.tanh %48 : vector<8x256xf32>
    %50 = arith.mulf %45, %49 : vector<8x256xf32>
    %c1_20 = arith.constant 1 : index
    %c0_21 = arith.constant 0 : index
    %c0_22 = arith.constant 0 : index
    %51 = vector.load %arg5[%c1_20, %c0_21, %c0_22] : memref<2x8x256xf32, #tpu.memory_space<vmem>>, vector<1x8x256xf32>
    %52 = vector.shape_cast %51 : vector<1x8x256xf32> to vector<8x256xf32>
    %53 = tpu.concatenate %50, %52 in 1 : vector<8x256xf32>, vector<8x256xf32> -> vector<8x512xf32>
    %c1_23 = arith.constant 1 : index
    %c0_24 = arith.constant 0 : index
    %c0_25 = arith.constant 0 : index
    %54 = vector.load %arg6[%c1_23, %c0_24, %c0_25] : memref<2x8x256xf32, #tpu.memory_space<vmem>>, vector<1x8x256xf32>
    %55 = vector.shape_cast %54 : vector<1x8x256xf32> to vector<8x256xf32>
    %56 = arith.truncf %53 : vector<8x512xf32> to vector<8x512xbf16>
    %c0_26 = arith.constant 0 : index
    %c0_27 = arith.constant 0 : index
    %57 = vector.load %arg9[%c0_26, %c0_27] : memref<512x1024xbf16, #tpu.memory_space<vmem>>, vector<512x1024xbf16>
    %cst_28 = arith.constant dense<0.000000e+00> : vector<8x1024xf32>
    %58 = tpu.matmul %56, %57, %cst_28 {dimension_numbers = #tpu.dot_dimension_numbers<[1], [0], [0], [1], [0, 0, 1, 1], [], []>} : vector<8x512xbf16>, vector<512x1024xbf16>, vector<8x1024xf32> -> vector<8x1024xf32>
    %c0_29 = arith.constant 0 : index
    %c0_30 = arith.constant 0 : index
    %59 = vector.load %arg10[%c0_29, %c0_30] : memref<1x1024xf32, #tpu.memory_space<vmem>>, vector<1x1024xf32>
    %60 = vector.broadcast %59 : vector<1x1024xf32> to vector<8x1024xf32>
    %61 = arith.addf %58, %60 : vector<8x1024xf32>
    %62 = vector.extract_strided_slice %61 {offsets = [0, 0], sizes = [8, 256], strides = [1, 1]} : vector<8x1024xf32> to vector<8x256xf32>
    %63 = arith.negf %62 : vector<8x256xf32>
    %64 = math.exp %63 : vector<8x256xf32>
    %cst_31 = arith.constant 1.000000e+00 : f32
    %65 = vector.broadcast %cst_31 : f32 to vector<8x256xf32>
    %66 = arith.addf %65, %64 : vector<8x256xf32>
    %67 = arith.divf %65, %66 : vector<8x256xf32>
    %68 = vector.extract_strided_slice %61 {offsets = [0, 256], sizes = [8, 256], strides = [1, 1]} : vector<8x1024xf32> to vector<8x256xf32>
    %69 = arith.negf %68 : vector<8x256xf32>
    %70 = math.exp %69 : vector<8x256xf32>
    %cst_32 = arith.constant 1.000000e+00 : f32
    %71 = vector.broadcast %cst_32 : f32 to vector<8x256xf32>
    %72 = arith.addf %71, %70 : vector<8x256xf32>
    %73 = arith.divf %71, %72 : vector<8x256xf32>
    %74 = vector.extract_strided_slice %61 {offsets = [0, 512], sizes = [8, 256], strides = [1, 1]} : vector<8x1024xf32> to vector<8x256xf32>
    %75 = math.tanh %74 : vector<8x256xf32>
    %76 = vector.extract_strided_slice %61 {offsets = [0, 768], sizes = [8, 256], strides = [1, 1]} : vector<8x1024xf32> to vector<8x256xf32>
    %77 = arith.negf %76 : vector<8x256xf32>
    %78 = math.exp %77 : vector<8x256xf32>
    %cst_33 = arith.constant 1.000000e+00 : f32
    %79 = vector.broadcast %cst_33 : f32 to vector<8x256xf32>
    %80 = arith.addf %79, %78 : vector<8x256xf32>
    %81 = arith.divf %79, %80 : vector<8x256xf32>
    %82 = arith.mulf %73, %55 : vector<8x256xf32>
    %83 = arith.mulf %67, %75 : vector<8x256xf32>
    %84 = arith.addf %82, %83 : vector<8x256xf32>
    %85 = math.tanh %84 : vector<8x256xf32>
    %86 = arith.mulf %81, %85 : vector<8x256xf32>
    %c0_34 = arith.constant 0 : index
    %c0_35 = arith.constant 0 : index
    %c0_36 = arith.constant 0 : index
    %87 = vector.load %arg14[%c0_34, %c0_35, %c0_36] : memref<2x8x256xf32, #tpu.memory_space<vmem>>, vector<1x8x256xf32>
    %88 = vector.shape_cast %87 : vector<1x8x256xf32> to vector<8x256xf32>
    %89 = vector.shape_cast %50 : vector<8x256xf32> to vector<1x8x256xf32>
    tpu.vector_store %arg14[%c0_34, %c0_35, %c0_36], %89 {strides = array<i32>} : memref<2x8x256xf32, #tpu.memory_space<vmem>>, vector<1x8x256xf32>,
    %c1_37 = arith.constant 1 : index
    %c0_38 = arith.constant 0 : index
    %c0_39 = arith.constant 0 : index
    %90 = vector.load %arg14[%c1_37, %c0_38, %c0_39] : memref<2x8x256xf32, #tpu.memory_space<vmem>>, vector<1x8x256xf32>
    %91 = vector.shape_cast %90 : vector<1x8x256xf32> to vector<8x256xf32>
    %92 = vector.shape_cast %86 : vector<8x256xf32> to vector<1x8x256xf32>
    tpu.vector_store %arg14[%c1_37, %c0_38, %c0_39], %92 {strides = array<i32>} : memref<2x8x256xf32, #tpu.memory_space<vmem>>, vector<1x8x256xf32>,
    %c0_40 = arith.constant 0 : index
    %c0_41 = arith.constant 0 : index
    %c0_42 = arith.constant 0 : index
    %93 = vector.load %arg15[%c0_40, %c0_41, %c0_42] : memref<2x8x256xf32, #tpu.memory_space<vmem>>, vector<1x8x256xf32>
    %94 = vector.shape_cast %93 : vector<1x8x256xf32> to vector<8x256xf32>
    %95 = vector.shape_cast %48 : vector<8x256xf32> to vector<1x8x256xf32>
    tpu.vector_store %arg15[%c0_40, %c0_41, %c0_42], %95 {strides = array<i32>} : memref<2x8x256xf32, #tpu.memory_space<vmem>>, vector<1x8x256xf32>,
    %c1_43 = arith.constant 1 : index
    %c0_44 = arith.constant 0 : index
    %c0_45 = arith.constant 0 : index
    %96 = vector.load %arg15[%c1_43, %c0_44, %c0_45] : memref<2x8x256xf32, #tpu.memory_space<vmem>>, vector<1x8x256xf32>
    %97 = vector.shape_cast %96 : vector<1x8x256xf32> to vector<8x256xf32>
    %98 = vector.shape_cast %84 : vector<8x256xf32> to vector<1x8x256xf32>
    tpu.vector_store %arg15[%c1_43, %c0_44, %c0_45], %98 {strides = array<i32>} : memref<2x8x256xf32, #tpu.memory_space<vmem>>, vector<1x8x256xf32>,
    %c0_46 = arith.constant 0 : index
    %c0_47 = arith.constant 0 : index
    %c0_48 = arith.constant 0 : index
    %99 = vector.load %arg4[%c0_46, %c0_47, %c0_48] : memref<8x24x256xbf16, #tpu.memory_space<vmem>>, vector<8x24x256xbf16>
    %100 = arith.extf %99 : vector<8x24x256xbf16> to vector<8x24x256xf32>
    %101 = vector.shape_cast %86 : vector<8x256xf32> to vector<8x1x256xf32>
    %102 = vector.broadcast %101 : vector<8x1x256xf32> to vector<8x24x256xf32>
    %103 = arith.mulf %100, %102 : vector<8x24x256xf32>
    %cst_49 = arith.constant dense<0.000000e+00> : vector<8x24xf32>
    %104 = vector.multi_reduction <add>, %103, %cst_49 [2] : vector<8x24x256xf32> to vector<8x24xf32>
    %105 = tpu.iota {dimensions = array<i32: 1>} : vector<8x24xi32>
    %c0_i32 = arith.constant 0 : i32
    %106 = vector.broadcast %c0_i32 : i32 to vector<8x24xi32>
    %107 = arith.addi %106, %105 : vector<8x24xi32>
    %c20_i32 = arith.constant 20 : i32
    %108 = vector.broadcast %c20_i32 : i32 to vector<8x24xi32>
    %109 = arith.cmpi slt, %107, %108 : vector<8x24xi32>
    %cst_50 = arith.constant -1.000000e+30 : f32
    %110 = vector.broadcast %cst_50 : f32 to vector<8x24xf32>
    %111 = arith.select %109, %104, %110 : vector<8x24xi1>, vector<8x24xf32>
    %cst_51 = arith.constant dense<0xFF800000> : vector<8xf32>
    %112 = vector.multi_reduction <maximumf>, %111, %cst_51 [1] : vector<8x24xf32> to vector<8xf32>
    %113 = vector.shape_cast %112 : vector<8xf32> to vector<8x1xf32>
    %114 = vector.broadcast %113 : vector<8x1xf32> to vector<8x24xf32>
    %115 = arith.subf %111, %114 : vector<8x24xf32>
    %116 = math.exp %115 : vector<8x24xf32>
    %cst_52 = arith.constant dense<0.000000e+00> : vector<8xf32>
    %117 = vector.multi_reduction <add>, %116, %cst_52 [1] : vector<8x24xf32> to vector<8xf32>
    %118 = vector.shape_cast %117 : vector<8xf32> to vector<8x1xf32>
    %119 = vector.shape_cast %116 : vector<8x24xf32> to vector<8x24x1xf32>
    %120 = vector.broadcast %119 : vector<8x24x1xf32> to vector<8x24x256xf32>
    %121 = arith.mulf %120, %100 : vector<8x24x256xf32>
    %cst_53 = arith.constant dense<0.000000e+00> : vector<8x256xf32>
    %122 = vector.multi_reduction <add>, %121, %cst_53 [1] : vector<8x24x256xf32> to vector<8x256xf32>
    %123 = vector.broadcast %118 : vector<8x1xf32> to vector<8x256xf32>
    %124 = arith.divf %122, %123 : vector<8x256xf32>
    %125 = tpu.concatenate %124, %86 in 1 : vector<8x256xf32>, vector<8x256xf32> -> vector<8x512xf32>
    %126 = arith.truncf %125 : vector<8x512xf32> to vector<8x512xbf16>
    %c0_54 = arith.constant 0 : index
    %c0_55 = arith.constant 0 : index
    %127 = vector.load %arg11[%c0_54, %c0_55] : memref<512x256xbf16, #tpu.memory_space<vmem>>, vector<512x256xbf16>
    %cst_56 = arith.constant dense<0.000000e+00> : vector<8x256xf32>
    %128 = tpu.matmul %126, %127, %cst_56 {dimension_numbers = #tpu.dot_dimension_numbers<[1], [0], [0], [1], [0, 0, 1, 1], [], []>} : vector<8x512xbf16>, vector<512x256xbf16>, vector<8x256xf32> -> vector<8x256xf32>
    %c0_57 = arith.constant 0 : index
    %c0_58 = arith.constant 0 : index
    %129 = vector.load %arg12[%c0_57, %c0_58] : memref<1x256xf32, #tpu.memory_space<vmem>>, vector<1x256xf32>
    %130 = vector.broadcast %129 : vector<1x256xf32> to vector<8x256xf32>
    %131 = arith.addf %128, %130 : vector<8x256xf32>
    %132 = math.tanh %131 : vector<8x256xf32>
    %c0_59 = arith.constant 0 : index
    %c0_60 = arith.constant 0 : index
    %133 = vector.load %arg13[%c0_59, %c0_60] : memref<8x256xf32, #tpu.memory_space<vmem>>, vector<8x256xf32>
    tpu.vector_store %arg13[%c0_59, %c0_60], %132 {strides = array<i32>} : memref<8x256xf32, #tpu.memory_space<vmem>>, vector<8x256xf32>,
    return
  }
  func.func @transform_0(%arg0: i32, %arg1: memref<8xi32, #tpu.memory_space<smem>>) -> (i32, i32) {
    %c0_i32 = arith.constant 0 : i32
    %c0_i32_0 = arith.constant 0 : i32
    %c0_i32_1 = arith.constant 0 : i32
    return %c0_i32, %c0_i32_0 : i32, i32
  }
  func.func @transform_1(%arg0: i32, %arg1: memref<8xi32, #tpu.memory_space<smem>>) -> (i32, i32) {
    %c0_i32 = arith.constant 0 : i32
    %c0_i32_0 = arith.constant 0 : i32
    %c0_i32_1 = arith.constant 0 : i32
    return %c0_i32, %c0_i32_0 : i32, i32
  }
  func.func @transform_2(%arg0: i32, %arg1: memref<8xi32, #tpu.memory_space<smem>>) -> (i32, i32, i32) {
    %c0_i32 = arith.constant 0 : i32
    %c0_i32_0 = arith.constant 0 : i32
    %c0_i32_1 = arith.constant 0 : i32
    return %c0_i32, %arg0, %c0_i32_0 : i32, i32, i32
  }
  func.func @transform_3(%arg0: i32, %arg1: memref<8xi32, #tpu.memory_space<smem>>) -> (i32, i32, i32) {
    %c0_i32 = arith.constant 0 : i32
    %c0_i32_0 = arith.constant 0 : i32
    %c0_i32_1 = arith.constant 0 : i32
    %c0_i32_2 = arith.constant 0 : i32
    return %c0_i32, %c0_i32_0, %c0_i32_1 : i32, i32, i32
  }
  func.func @transform_4(%arg0: i32, %arg1: memref<8xi32, #tpu.memory_space<smem>>) -> (i32, i32, i32) {
    %c0_i32 = arith.constant 0 : i32
    %c0_i32_0 = arith.constant 0 : i32
    %c0_i32_1 = arith.constant 0 : i32
    %c0_i32_2 = arith.constant 0 : i32
    return %c0_i32, %c0_i32_0, %c0_i32_1 : i32, i32, i32
  }
  func.func @transform_5(%arg0: i32, %arg1: memref<8xi32, #tpu.memory_space<smem>>) -> (i32, i32) {
    %c0_i32 = arith.constant 0 : i32
    %c0_i32_0 = arith.constant 0 : i32
    %c0_i32_1 = arith.constant 0 : i32
    return %c0_i32, %c0_i32_0 : i32, i32
  }
  func.func @transform_6(%arg0: i32, %arg1: memref<8xi32, #tpu.memory_space<smem>>) -> (i32, i32) {
    %c0_i32 = arith.constant 0 : i32
    %c0_i32_0 = arith.constant 0 : i32
    %c0_i32_1 = arith.constant 0 : i32
    return %c0_i32, %c0_i32_0 : i32, i32
  }
  func.func @transform_7(%arg0: i32, %arg1: memref<8xi32, #tpu.memory_space<smem>>) -> (i32, i32) {
    %c0_i32 = arith.constant 0 : i32
    %c0_i32_0 = arith.constant 0 : i32
    %c0_i32_1 = arith.constant 0 : i32
    return %c0_i32, %c0_i32_0 : i32, i32
  }
  func.func @transform_8(%arg0: i32, %arg1: memref<8xi32, #tpu.memory_space<smem>>) -> (i32, i32) {
    %c0_i32 = arith.constant 0 : i32
    %c0_i32_0 = arith.constant 0 : i32
    %c0_i32_1 = arith.constant 0 : i32
    return %c0_i32, %c0_i32_0 : i32, i32
  }
  func.func @transform_9(%arg0: i32, %arg1: memref<8xi32, #tpu.memory_space<smem>>) -> (i32, i32) {
    %c0_i32 = arith.constant 0 : i32
    %c0_i32_0 = arith.constant 0 : i32
    %c0_i32_1 = arith.constant 0 : i32
    return %c0_i32, %c0_i32_0 : i32, i32
  }
  func.func @transform_10(%arg0: i32, %arg1: memref<8xi32, #tpu.memory_space<smem>>) -> (i32, i32) {
    %c0_i32 = arith.constant 0 : i32
    %c0_i32_0 = arith.constant 0 : i32
    %c0_i32_1 = arith.constant 0 : i32
    return %c0_i32, %c0_i32_0 : i32, i32
  }
  func.func @transform_11(%arg0: i32, %arg1: memref<8xi32, #tpu.memory_space<smem>>) -> (i32, i32) {
    %c0_i32 = arith.constant 0 : i32
    %c0_i32_0 = arith.constant 0 : i32
    %c0_i32_1 = arith.constant 0 : i32
    return %c0_i32, %c0_i32_0 : i32, i32
  }
  func.func @transform_12(%arg0: i32, %arg1: memref<8xi32, #tpu.memory_space<smem>>) -> (i32, i32, i32) {
    %c0_i32 = arith.constant 0 : i32
    %c0_i32_0 = arith.constant 0 : i32
    %c0_i32_1 = arith.constant 0 : i32
    %c0_i32_2 = arith.constant 0 : i32
    return %c0_i32, %c0_i32_0, %c0_i32_1 : i32, i32, i32
  }
  func.func @transform_13(%arg0: i32, %arg1: memref<8xi32, #tpu.memory_space<smem>>) -> (i32, i32, i32) {
    %c0_i32 = arith.constant 0 : i32
    %c0_i32_0 = arith.constant 0 : i32
    %c0_i32_1 = arith.constant 0 : i32
    %c0_i32_2 = arith.constant 0 : i32
    return %c0_i32, %c0_i32_0, %c0_i32_1 : i32, i32, i32
  }
}

</mosaic_0001>

<bundles_post_ra>
// kernel: tpu_custom_call.1
= control target key start
LH: loop header
LB: loop body
LE: loop exit
PB: predicated region body
PF: predicated region fallthrough
CT: control target
= control target key end

     0   :  { %s8963_s0 = inlined_call_operand.hbm [shape: s32[8], index: 0, kind: input, shape index: {}]   ;;  %s8964_s1 = inlined_call_operand.hbm [shape: f32[40,256], index: 1, kind: input, shape index: {}]   ;;  %s8965_s2 = inlined_call_operand.hbm [shape: f32[8,256], index: 2, kind: input, shape index: {}]   ;;  %s8966_s3 = inlined_call_operand.hbm [shape: bf16[8,24,256], index: 3, kind: input, shape index: {}]   ;;  %s8967_s4 = inlined_call_operand.hbm [shape: f32[2,8,256], index: 4, kind: input, shape index: {}]   ;;  %s8968_s5 = inlined_call_operand.hbm [shape: f32[2,8,256], index: 5, kind: input, shape index: {}]   ;;  %s8969_s6 = inlined_call_operand.hbm [shape: bf16[768,1024], index: 6, kind: input, shape index: {}]   ;;  %s8970_s7 = inlined_call_operand.hbm [shape: f32[1,1024], index: 7, kind: input, shape index: {}]   ;;  %s8971_s8 = inlined_call_operand.hbm [shape: bf16[512,1024], index: 8, kind: input, shape index: {}]   ;;  %s8972_s9 = inlined_call_operand.hbm [shape: f32[1,1024], index: 9, kind: input, shape index: {}]   ;;  %s8973_s10 = inlined_call_operand.hbm [shape: bf16[512,256], index: 10, kind: input, shape index: {}]   ;;  %s8974_s11 = inlined_call_operand.hbm [shape: f32[1,256], index: 11, kind: input, shape index: {}]   ;;  %s8975_s12 = inlined_call_operand.hbm [shape: f32[8,256], index: 12, kind: output, shape index: {0}]   ;;  %s8976_s13 = inlined_call_operand.hbm [shape: f32[2,8,256], index: 13, kind: output, shape index: {1}]   ;;  %s8977_s14 = inlined_call_operand.hbm [shape: f32[2,8,256], index: 14, kind: output, shape index: {2}]  }
   0x1   :  { %s7610_s15 = scalar_lea.hbm %s8963_s0, 16 }
   0x2   :  { %p7611_p0 = scmp.ne.s32.totalorder %s8963_s0, %s7610_s15  ;;  %p7614_p1 = scmp.lt.u32.totalorder %s7610_s15, %s8963_s0 }
   0x4   :  { %p7616_p2 = pnand %p7614_p1, %p7611_p0 }
   0x6   :  { %7619 = shalt.err (!%p7616_p2)  }
   0x7   :  { %s7946_s20 = smov [#allocation7]  }
   0x8   :  { %21 = dma.hbm_to_smem %s8963_s0, 16, %s7946_s20, [#allocation6] }
   0x9   :  { %7928 = dma.done.wait [#allocation6], 16 }
   0xa   :  { %7929 = vsyncadd [#allocation6], 4294967280 }
   0xb   :  { %23 = sfence }
   0xc   :  { %24 = vsyncpa [#allocation9], 0 }
   0xd   :  { %25 = vsyncpa [#allocation12], 0 }
   0xe   :  { %26 = vsyncpa [#allocation15], 0 }
   0xf   :  { %27 = vsyncpa [#allocation18], 0 }
  0x10   :  { %28 = vsyncpa [#allocation21], 0 }
  0x11   :  { %29 = vsyncpa [#allocation24], 0 }
  0x12   :  { %30 = vsyncpa [#allocation10], 0 }
  0x13   :  { %31 = vsyncpa [#allocation28], 0  ;;  %s7947_s23 = smov [#allocation11]   ;;  %s7620_s27 = scalar_lea.hbm %s8965_s2, 256 }
  0x14   :  { %s50_s24 = sshll.u32 %s7947_s23, 4  ;;  %p7621_p3 = scmp.ne.s32.totalorder %s8965_s2, %s7620_s27  ;;  %s51_s24 = int_to_ptr.vmem [resolvable:$true] %s50_s24 }
  0x15   :  { %p7624_p4 = scmp.lt.u32.totalorder %s7620_s27, %s8965_s2 }
  0x17   :  { %p7626_p5 = pnand %p7624_p4, %p7621_p3 }
  0x19   :  { %7629 = shalt.err (!%p7626_p5)
}
  0x1a   :  { %s7630_s15 = scalar_lea.vmem %s51_s24, 256  ;;  %p7635_p7 = scmp.lt.s32.totalorder %s51_s24, %s51_s24 }
  0x1b   :  { %p7631_p6 = scmp.ne.s32.totalorder %s51_s24, %s7630_s15  ;;  %p7636_p8 = scmp.lt.s32.totalorder %s7630_s15, %s7630_s15 }
  0x1d   :  { %p7637_p9 = por %p7636_p8, %p7635_p7 }
  0x1f   :  { %p7638_p10 = pnand %p7637_p9, %p7631_p6 }
  0x21   :  { %7641 = shalt.err (!%p7638_p10)
}
  0x22   :  { %53 = dma.hbm_to_vmem [thread:$0]  %s8965_s2, 256, %s51_s24, [#allocation12]  }
  0x23   :  { %s7948_s18 = smov [#allocation14]   ;;  %s7949_s20 = smov [#allocation17]  }
  0x24   :  { %s71_s19 = sshll.u32 %s7948_s18, 4  ;;  %s95_s21 = sshll.u32 %s7949_s20, 4  ;;  %s72_s19 = int_to_ptr.vmem [resolvable:$true] %s71_s19  ;;  %s96_s21 = int_to_ptr.vmem [resolvable:$true] %s95_s21 }
  0x25   :  { %s7642_s25 = scalar_lea.hbm %s8967_s4, 512 }
  0x26   :  { %p7643_p11 = scmp.ne.s32.totalorder %s8967_s4, %s7642_s25  ;;  %p7646_p12 = scmp.lt.u32.totalorder %s7642_s25, %s8967_s4 }
  0x28   :  { %p7648_p13 = pnand %p7646_p12, %p7643_p11 }
  0x2a   :  { %7651 = shalt.err (!%p7648_p13)
}
  0x2b   :  { %s7652_s2 = scalar_lea.vmem %s72_s19, 512  ;;  %p7657_p1 = scmp.lt.s32.totalorder %s72_s19, %s72_s19 }
  0x2c   :  { %p7653_p0 = scmp.ne.s32.totalorder %s72_s19, %s7652_s2  ;;  %p7658_p2 = scmp.lt.s32.totalorder %s7652_s2, %s7652_s2 }
  0x2e   :  { %p7659_p3 = por %p7658_p2, %p7657_p1 }
  0x30   :  { %p7660_p4 = pnand %p7659_p3, %p7653_p0 }
  0x32   :  { %7663 = shalt.err (!%p7660_p4)
}
  0x33   :  { %s7950_s24 = smov 256   ;;  %s7951_s29 = smov 16  }
  0x34   :  { %77 = dma.hbm_to_vmem [thread:$0]  %s8967_s4, 512, %s72_s19, [#allocation15], %s7950_s24, %s7950_s24, %s7951_s29  }
  0x35   :  { %s7664_s18 = scalar_lea.hbm %s8969_s6, 49152 }
  0x36   :  { %p7665_p5 = scmp.ne.s32.totalorder %s8969_s6, %s7664_s18  ;;  %p7668_p6 = scmp.lt.u32.totalorder %s7664_s18, %s8969_s6 }
  0x38   :  { %p7670_p7 = pnand %p7668_p6, %p7665_p5 }
  0x3a   :  { %7673 = shalt.err (!%p7670_p7)
}
  0x3b   :  { %s7674_s26 = scalar_lea.vmem %s96_s21, 49152  ;;  %p7679_p9 = scmp.lt.s32.totalorder %s96_s21, %s96_s21 }
  0x3c   :  { %p7675_p8 = scmp.ne.s32.totalorder %s96_s21, %s7674_s26  ;;  %p7680_p10 = scmp.lt.s32.totalorder %s7674_s26, %s7674_s26 }
  0x3e   :  { %p7681_p11 = por %p7680_p10, %p7679_p9 }
  0x40   :  { %p7682_p12 = pnand %p7681_p11, %p7675_p8 }
  0x42   :  { %7685 = shalt.err (!%p7682_p12)
}
  0x43   :  { %s7952_s4 = smov 512   ;;  %s7953_s19 = smov 32  }
  0x44   :  { %101 = dma.hbm_to_vmem [thread:$0]  %s8969_s6, 49152, %s96_s21, [#allocation18], %s7952_s4, %s7952_s4, %s7953_s19  }
  0x45   :  { %s7954_s0 = smov [#allocation20]   ;;  %s7686_s16 = scalar_lea.hbm %s8971_s8, 32768 }
  0x46   :  { %s117_s2 = sshll.u32 %s7954_s0, 4  ;;  %p7687_p13 = scmp.ne.s32.totalorder %s8971_s8, %s7686_s16  ;;  %s118_s2 = int_to_ptr.vmem [resolvable:$true] %s117_s2 }
  0x47   :  { %p7690_p0 = scmp.lt.u32.totalorder %s7686_s16, %s8971_s8 }
  0x49   :  { %p7692_p1 = pnand %p7690_p0, %p7687_p13 }
  0x4b   :  { %7695 = shalt.err (!%p7692_p1)
}
  0x4c   :  { %s7696_s23 = scalar_lea.vmem %s118_s2, 32768  ;;  %p7701_p3 = scmp.lt.s32.totalorder %s118_s2, %s118_s2 }
  0x4d   :  { %p7697_p2 = scmp.ne.s32.totalorder %s118_s2, %s7696_s23  ;;  %p7702_p4 = scmp.lt.s32.totalorder %s7696_s23, %s7696_s23 }
  0x4f   :  { %p7703_p5 = por %p7702_p4, %p7701_p3 }
  0x51   :  { %p7704_p6 = pnand %p7703_p5, %p7697_p2 }
  0x53   :  { %7707 = shalt.err (!%p7704_p6)
}
  0x54   :  { %123 = dma.hbm_to_vmem [thread:$0]  %s8971_s8, 32768, %s118_s2, [#allocation21], %s7952_s4, %s7952_s4, %s7953_s19  }
  0x55   :  { %s7955_s25 = smov [#allocation23]   ;;  %s7956_s27 = smov [#allocation8]  }
  0x56   :  { %s139_s26 = sshll.u32 %s7955_s25, 4  ;;  %s37_s28 = sshll.u32 %s7956_s27, 4  ;;  %s140_s26 = int_to_ptr.vmem [resolvable:$true] %s139_s26  ;;  %s8106_s28 = int_to_ptr.vmem [resolvable:$true] %s37_s28 }
  0x57   :  { %s7708_s15 = scalar_lea.hbm %s8973_s10, 8192 }
  0x58   :  { %p7709_p7 = scmp.ne.s32.totalorder %s8973_s10, %s7708_s15  ;;  %p7712_p8 = scmp.lt.u32.totalorder %s7708_s15, %s8973_s10 }
  0x5a   :  { %p7714_p9 = pnand %p7712_p8, %p7709_p7 }
  0x5c   :  { %7717 = shalt.err (!%p7714_p9)
}
  0x5d   :  { %s7718_s8 = scalar_lea.vmem %s140_s26, 8192  ;;  %p7723_p11 = scmp.lt.s32.totalorder %s140_s26, %s140_s26 }
  0x5e   :  { %p7719_p10 = scmp.ne.s32.totalorder %s140_s26, %s7718_s8  ;;  %p7724_p12 = scmp.lt.s32.totalorder %s7718_s8, %s7718_s8 }
  0x60   :  { %p7725_p13 = por %p7724_p12, %p7723_p11 }
  0x62   :  { %p7726_p0 = pnand %p7725_p13, %p7719_p10 }
  0x64   :  { %7729 = shalt.err (!%p7726_p0)
}
  0x65   :  { %s7957_s4 = smov 128   ;;  %s7958_s19 = smov 8  }
  0x66   :  { %145 = dma.hbm_to_vmem [thread:$0]  %s8973_s10, 8192, %s140_s26, [#allocation24], %s7957_s4, %s7957_s4, %s7958_s19  }
  0x67   :  { %s7730_s21 = scalar_lea.hbm %s8964_s1, 1280 }
  0x68   :  { %p7731_p1 = scmp.ne.s32.totalorder %s8964_s1, %s7730_s21  ;;  %p7734_p2 = scmp.lt.u32.totalorder %s7730_s21, %s8964_s1 }
  0x6a   :  { %p7736_p3 = pnand %p7734_p2, %p7731_p1 }
  0x6c   :  { %7739 = shalt.err (!%p7736_p3)
}
  0x6d   :  { %s7740_s15 = scalar_lea.vmem %s8106_s28, 1280  ;;  %p7745_p5 = scmp.lt.s32.totalorder %s8106_s28, %s8106_s28 }
  0x6e   :  { %p7741_p4 = scmp.ne.s32.totalorder %s8106_s28, %s7740_s15  ;;  %p7746_p6 = scmp.lt.s32.totalorder %s7740_s15, %s7740_s15 }
  0x70   :  { %p7747_p7 = por %p7746_p6, %p7745_p5 }
  0x72   :  { %p7748_p8 = pnand %p7747_p7, %p7741_p4 }
  0x74   :  { %7751 = shalt.err (!%p7748_p8)
}
  0x75   :  { %43 = dma.hbm_to_vmem [thread:$0]  %s8964_s1, 1280, %s8106_s28, [#allocation9], %s7950_s24, %s7950_s24, %s7951_s29  }
  0x76   :  { %s7959_s16 = smov [#allocation13]   ;;  %s7960_s18 = smov [#allocation16]  }
  0x77   :  { %s59_s17 = sshll.u32 %s7959_s16, 4  ;;  %s83_s20 = sshll.u32 %s7960_s18, 4  ;;  %s60_s17 = int_to_ptr.vmem [resolvable:$true] %s59_s17  ;;  %s8143_s20 = int_to_ptr.vmem [resolvable:$true] %s83_s20 }
  0x78   :  { %s7752_s22 = scalar_lea.hbm %s8966_s3, 3072 }
  0x79   :  { %p7753_p9 = scmp.ne.s32.totalorder %s8966_s3, %s7752_s22  ;;  %p7756_p10 = scmp.lt.u32.totalorder %s7752_s22, %s8966_s3 }
  0x7b   :  { %p7758_p11 = pnand %p7756_p10, %p7753_p9 }
  0x7d   :  { %7761 = shalt.err (!%p7758_p11)
}
  0x7e   :  { %s7762_s1 = scalar_lea.vmem %s60_s17, 3072  ;;  %p7767_p13 = scmp.lt.s32.totalorder %s60_s17, %s60_s17 }
  0x7f   :  { %p7763_p12 = scmp.ne.s32.totalorder %s60_s17, %s7762_s1  ;;  %p7768_p0 = scmp.lt.s32.totalorder %s7762_s1, %s7762_s1 }
  0x81   :  { %p7769_p1 = por %p7768_p0, %p7767_p13 }
  0x83   :  { %p7770_p2 = pnand %p7769_p1, %p7763_p12 }
  0x85   :  { %7773 = shalt.err (!%p7770_p2)
}
  0x86   :  { %65 = dma.hbm_to_vmem [thread:$0]  %s8966_s3, 3072, %s60_s17, [#allocation12], %s7957_s4, %s7957_s4, %s7958_s19  }
  0x87   :  { %s7774_s15 = scalar_lea.hbm %s8968_s5, 512 }
  0x88   :  { %p7775_p3 = scmp.ne.s32.totalorder %s8968_s5, %s7774_s15  ;;  %p7778_p4 = scmp.lt.u32.totalorder %s7774_s15, %s8968_s5 }
  0x8a   :  { %p7780_p5 = pnand %p7778_p4, %p7775_p3 }
  0x8c   :  { %7783 = shalt.err (!%p7780_p5)
}
  0x8d   :  { %s7784_s8 = scalar_lea.vmem %s8143_s20, 512  ;;  %p7789_p7 = scmp.lt.s32.totalorder %s8143_s20, %s8143_s20 }
  0x8e   :  { %p7785_p6 = scmp.ne.s32.totalorder %s8143_s20, %s7784_s8  ;;  %p7790_p8 = scmp.lt.s32.totalorder %s7784_s8, %s7784_s8 }
  0x90   :  { %p7791_p9 = por %p7790_p8, %p7789_p7 }
  0x92   :  { %p7792_p10 = pnand %p7791_p9, %p7785_p6 }
  0x94   :  { %7795 = shalt.err (!%p7792_p10)
}
  0x95   :  { %89 = dma.hbm_to_vmem [thread:$0]  %s8968_s5, 512, %s8143_s20, [#allocation15], %s7950_s24, %s7950_s24, %s7951_s29  }
  0x96   :  { %s7961_s19 = smov [#allocation19]   ;;  %s7962_s2 = smov [#allocation22]  }
  0x97   :  { %s108_s17 = sshll.u32 %s7961_s19, 4  ;;  %s130_s22 = sshll.u32 %s7962_s2, 4  ;;  %s109_s17 = int_to_ptr.vmem [resolvable:$true] %s108_s17  ;;  %s131_s22 = int_to_ptr.vmem [resolvable:$true] %s130_s22 }
  0x98   :  { %s7796_s21 = scalar_lea.hbm %s8970_s7, 128 }
  0x99   :  { %p7797_p11 = scmp.ne.s32.totalorder %s8970_s7, %s7796_s21  ;;  %p7800_p12 = scmp.lt.u32.totalorder %s7796_s21, %s8970_s7 }
  0x9b   :  { %p7802_p13 = pnand %p7800_p12, %p7797_p11 }
  0x9d   :  { %7805 = shalt.err (!%p7802_p13)
}
  0x9e   :  { %s7806_s5 = scalar_lea.vmem %s109_s17, 128  ;;  %p7811_p1 = scmp.lt.s32.totalorder %s109_s17, %s109_s17 }
  0x9f   :  { %p7807_p0 = scmp.ne.s32.totalorder %s109_s17, %s7806_s5  ;;  %p7812_p2 = scmp.lt.s32.totalorder %s7806_s5, %s7806_s5 }
  0xa1   :  { %p7813_p3 = por %p7812_p2, %p7811_p1 }
  0xa3   :  { %p7814_p4 = pnand %p7813_p3, %p7807_p0 }
  0xa5   :  { %7817 = shalt.err (!%p7814_p4)
}
  0xa6   :  { %111 = dma.hbm_to_vmem [thread:$0]  %s8970_s7, 128, %s109_s17, [#allocation18]  }
  0xa7   :  { %s7818_s10 = scalar_lea.hbm %s8972_s9, 128 }
  0xa8   :  { %p7819_p5 = scmp.ne.s32.totalorder %s8972_s9, %s7818_s10  ;;  %p7822_p6 = scmp.lt.u32.totalorder %s7818_s10, %s8972_s9 }
  0xaa   :  { %p7824_p7 = pnand %p7822_p6, %p7819_p5 }
  0xac   :  { %7827 = shalt.err (!%p7824_p7)
}
  0xad   :  { %s7828_s3 = scalar_lea.vmem %s131_s22, 128  ;;  %p7833_p9 = scmp.lt.s32.totalorder %s131_s22, %s131_s22 }
  0xae   :  { %p7829_p8 = scmp.ne.s32.totalorder %s131_s22, %s7828_s3  ;;  %p7834_p10 = scmp.lt.s32.totalorder %s7828_s3, %s7828_s3 }
  0xb0   :  { %p7835_p11 = por %p7834_p10, %p7833_p9 }
  0xb2   :  { %p7836_p12 = pnand %p7835_p11, %p7829_p8 }
  0xb4   :  { %7839 = shalt.err (!%p7836_p12)
}
  0xb5   :  { %133 = dma.hbm_to_vmem [thread:$0]  %s8972_s9, 128, %s131_s22, [#allocation21]  }
  0xb6   :  { %s7963_s19 = smov [#allocation25]   ;;  %s7840_s6 = scalar_lea.hbm %s8974_s11, 32 }
  0xb7   :  { %s152_s17 = sshll.u32 %s7963_s19, 4  ;;  %p7841_p13 = scmp.ne.s32.totalorder %s8974_s11, %s7840_s6  ;;  %s153_s17 = int_to_ptr.vmem [resolvable:$true] %s152_s17 }
  0xb8   :  { %p7844_p0 = scmp.lt.u32.totalorder %s7840_s6, %s8974_s11 }
  0xba   :  { %p7846_p1 = pnand %p7844_p0, %p7841_p13 }
  0xbc   :  { %7849 = shalt.err (!%p7846_p1)
}
  0xbd   :  { %s7850_s27 = scalar_lea.vmem %s153_s17, 32  ;;  %p7855_p3 = scmp.lt.s32.totalorder %s153_s17, %s153_s17 }
  0xbe   :  { %p7851_p2 = scmp.ne.s32.totalorder %s153_s17, %s7850_s27  ;;  %p7856_p4 = scmp.lt.s32.totalorder %s7850_s27, %s7850_s27 }
  0xc0   :  { %p7857_p5 = por %p7856_p4, %p7855_p3 }
  0xc2   :  { %p7858_p6 = pnand %p7857_p5, %p7851_p2 }
  0xc4   :  { %7861 = shalt.err (!%p7858_p6)
}
  0xc5   :  { %155 = dma.hbm_to_vmem [thread:$0]  %s8974_s11, 32, %s153_s17, [#allocation24]  }
  0xc6   :  { %7930 = dma.done.wait [#allocation9], 1280  }
  0xc7   :  { %7931 = vsyncadd [#allocation9], 4294966016 }
  0xc8   :  { %7932 = dma.done.wait [#allocation12], 3328  }
  0xc9   :  { %7933 = vsyncadd [#allocation12], 4294963968 }
  0xca   :  { %7934 = dma.done.wait [#allocation15], 1024  }
  0xcb   :  { %7935 = vsyncadd [#allocation15], 4294966272 }
  0xcc   :  { %7936 = dma.done.wait [#allocation18], 49280  }
  0xcd   :  { %7937 = vsyncadd [#allocation18], 4294918016 }
  0xce   :  { %7938 = dma.done.wait [#allocation21], 32896  }
  0xcf   :  { %7939 = vsyncadd [#allocation21], 4294934400 }
  0xd0   :  { %7940 = dma.done.wait [#allocation24], 8224  }
  0xd1   :  { %7941 = vsyncadd [#allocation24], 4294959072  ;;  %v297_v0 = vld [vmem:[#allocation17] sm:$0xff]  ;;  %s8216_s5 = sld [smem:[#allocation7]]  ;;  %s8218_s11 = sld [smem:[#allocation7 + $0x1]]  ;;  %v230_v32 = vlaneseq  ;;  %vm273_vm0 = vcmask 1040384  }
  0xd2   :  { %v301_v1 = vld [vmem:[#allocation17 + $0x20] sm:$0xff]  ;;  %s8220_s20 = sld [smem:[#allocation7 + $0x2]]  ;;  %s8222_s0 = sld [smem:[#allocation7 + $0x3]]  ;;  %vm276_vm1 = vcmask 1041408   ;;  %v286_v59 = vld [vmem:[#allocation11 + $0x8] sm:$0xff]  ;;  %vm279_vm2 = vcmask 1042432  }
  0xd3   :  { %v425_v2 = vld [vmem:[#allocation17 + $0x400] sm:$0xff]  ;;  %v6593_v3 = vcombine.high %v297_v0, %v301_v1  ;;  %v6592_v5 = vcombine.low %v297_v0, %v301_v1  ;;  %v8233_v41 = vshrl.u32 %v230_v32, 7  ;;  %vm282_vm3 = vcmask 1043456   ;;  %s7965_s9 = smov [#allocation27]  }
  0xd4   :  { %v429_v4 = vld [vmem:[#allocation17 + $0x420] sm:$0xff]  ;;  %vm8271_vm4 = vmpackc.low %vm282_vm3, %vm282_vm3  ;;  %vm5517_vm5 = vcmask 130112   ;;  %vm5524_vm6 = vcmask 195712   ;;  %vm5624_vm7 = vcmask 1041409   ;;  %vm5626_vm8 = vcmask 1042434   ;;  %s6533_s22 = sshll.u32 %s7965_s9, 4  ;;  %s6534_s22 = int_to_ptr.vmem [resolvable:$true] %s6533_s22 }
  0xd5   :  { %v305_v6 = vld [vmem:[#allocation17 + $0x40] sm:$0xff]  ;;  %v6721_v8 = vcombine.high %v425_v2, %v429_v4  ;;  %v6720_v9 = vcombine.low %v425_v2, %v429_v4  ;;  %2643 = vmatprep.subr.bf16.mxu1 %v6593_v3  ;;  %v8242_v50 = vsub.s32 1, %v8233_v41  ;;  %vm5628_vm9 = vcmask 1043459   ;;  %p7867_p8 = scmp.lt.s32.totalorder %s6534_s22, %s6534_s22 }
  0xd6   :  { %v309_v7 = vld [vmem:[#allocation17 + $0x60] sm:$0xff]  ;;  %2644 = vmatpush1.bf16.msra.mxu1 %v6592_v5  ;;  %vm5630_vm10 = vcmask 1044484   ;;  %vm5632_vm11 = vcmask 1045509   ;;  %vm5634_vm12 = vcmask 1046534   ;;  %vm5636_vm13 = vcmask 1047559  }
  0xd7   :  { %v6601_v10 = vcombine.high %v305_v6, %v309_v7  ;;  %v433_v11 = vld [vmem:[#allocation17 + $0x440] sm:$0xff]  ;;  %2684 = vmatprep.subr.bf16.mxu0 %v6721_v8  ;;  %v6600_v18 = vcombine.low %v305_v6, %v309_v7  ;;  %s190_s30 = sshra.s32 %s8216_s5, 3  ;;  %s200_s15 = sshra.s32 %s8218_s11, 3  ;;  %v8263_v7 = vpack.c.bf16 %v286_v59, %v286_v59  ;;  %vm5640_vm15 = vcmask 195584  }
  0xd8   :  { %v437_v12 = vld [vmem:[#allocation17 + $0x460] sm:$0xff]  ;;  %2685 = vmatpush1.bf16.msra.mxu0 %v6720_v9  ;;  %s193_s10 = sand.u32 7, %s8216_s5  ;;  %s210_s26 = sshra.s32 %s8220_s20, 3 }
  0xd9   :  { %v313_v13 = vld [vmem:[#allocation17 + $0x80] sm:$0xff]  ;;  %v6729_v14 = vcombine.high %v433_v11, %v437_v12  ;;  %2645 = vmatprep.subr.bf16.mxu1 %v6601_v10  ;;  %v6728_v19 = vcombine.low %v433_v11, %v437_v12  ;;  %s7332_s16 = sshll.u32 %s190_s30, 4  ;;  %s220_s18 = sshra.s32 %s8222_s0, 3  ;;  %2716 = vmatprep.mubr.bf16.mxu0 %v8263_v7 }
  0xda   :  { %v317_v15 = vld [vmem:[#allocation17 + $0xa0] sm:$0xff]  ;;  %2646 = vmatpush1.bf16.msra.mxu1 %v6600_v18  ;;  %s203_s8 = sand.u32 7, %s8218_s11  ;;  %s7333_s3 = sshll.u32 %s200_s15, 4 }
  0xdb   :  { %v441_v16 = vld [vmem:[#allocation17 + $0x480] sm:$0xff]  ;;  %v6609_v20 = vcombine.high %v313_v13, %v317_v15  ;;  %2686 = vmatprep.subr.bf16.mxu0 %v6729_v14  ;;  %v6608_v26 = vcombine.low %v313_v13, %v317_v15  ;;  %s213_s7 = sand.u32 7, %s8220_s20  ;;  %s7334_s4 = sshll.u32 %s210_s26, 4 }
  0xdc   :  { %v445_v17 = vld [vmem:[#allocation17 + $0x4a0] sm:$0xff]  ;;  %2687 = vmatpush1.bf16.msra.mxu0 %v6728_v19  ;;  %s223_s19 = sand.u32 7, %s8222_s0  ;;  %s7335_s17 = sshll.u32 %s220_s18, 4 }
  0xdd   :  { %v6737_v21 = vcombine.high %v441_v16, %v445_v17  ;;  %v321_v22 = vld [vmem:[#allocation17 + $0xc0] sm:$0xff]  ;;  %2647 = vmatprep.subr.bf16.mxu1 %v6609_v20  ;;  %v6736_v27 = vcombine.low %v441_v16, %v445_v17  ;;  %s196_s2 = sadd.s32 %s7332_s16, %s193_s10  ;;  %s8235_s23 = sadd.s32 %s7333_s3, %s203_s8 }
  0xde   :  { %v325_v23 = vld [vmem:[#allocation17 + $0xe0] sm:$0xff]  ;;  %2648 = vmatpush1.bf16.msra.mxu1 %v6608_v26  ;;  %s8237_s6 = sadd.s32 %s7334_s4, %s213_s7  ;;  %s8239_s21 = sadd.s32 %s7335_s17, %s223_s19 }
  0xdf   :  { %v449_v24 = vld [vmem:[#allocation17 + $0x4c0] sm:$0xff]  ;;  %v6617_v28 = vcombine.high %v321_v22, %v325_v23  ;;  %2688 = vmatprep.subr.bf16.mxu0 %v6737_v21  ;;  %v6616_v35 = vcombine.low %v321_v22, %v325_v23  ;;  %s197_s25 = scalar_lea.vmem [#allocation8], %s196_s2  ;;  %s207_s1 = scalar_lea.vmem [#allocation8], %s8235_s23 }
  0xe0   :  { %v453_v25 = vld [vmem:[#allocation17 + $0x4e0] sm:$0xff]  ;;  %2689 = vmatpush1.bf16.msra.mxu0 %v6736_v27  ;;  %s217_s28 = scalar_lea.vmem [#allocation8], %s8237_s6  ;;  %s227_s27 = scalar_lea.vmem [#allocation8], %s8239_s21 }
  0xe1   :  { %v6745_v29 = vcombine.high %v449_v24, %v453_v25  ;;  %v329_v30 = vld [vmem:[#allocation17 + $0x100] sm:$0xff]  ;;  %2649 = vmatprep.subr.bf16.mxu1 %v6617_v28  ;;  %v6744_v36 = vcombine.low %v449_v24, %v453_v25  ;;  %s7862_s5 = scalar_lea.vmem %s6534_s22, 512 }
  0xe2   :  { %v333_v31 = vld [vmem:[#allocation17 + $0x120] sm:$0xff]  ;;  %2650 = vmatpush1.bf16.msra.mxu1 %v6616_v35  ;;  %p7863_p7 = scmp.ne.s32.totalorder %s6534_s22, %s7862_s5  ;;  %p7868_p9 = scmp.lt.s32.totalorder %s7862_s5, %s7862_s5 }
  0xe3   :  { %v457_v33 = vld [vmem:[#allocation17 + $0x500] sm:$0xff]  ;;  %v6625_v37 = vcombine.high %v329_v30, %v333_v31  ;;  %2690 = vmatprep.subr.bf16.mxu0 %v6745_v29  ;;  %v6624_v44 = vcombine.low %v329_v30, %v333_v31 }
  0xe4   :  { %v461_v34 = vld [vmem:[#allocation17 + $0x520] sm:$0xff]  ;;  %2691 = vmatpush1.bf16.msra.mxu0 %v6744_v36  ;;  %p7869_p10 = por %p7868_p9, %p7867_p8 }
  0xe5   :  { %v6753_v38 = vcombine.high %v457_v33, %v461_v34  ;;  %v337_v39 = vld [vmem:[#allocation17 + $0x140] sm:$0xff]  ;;  %2651 = vmatprep.subr.bf16.mxu1 %v6625_v37  ;;  %v6752_v45 = vcombine.low %v457_v33, %v461_v34 }
  0xe6   :  { %v341_v40 = vld [vmem:[#allocation17 + $0x160] sm:$0xff]  ;;  %2652 = vmatpush1.bf16.msra.mxu1 %v6624_v44  ;;  %p7870_p11 = pnand %p7869_p10, %p7863_p7 }
  0xe7   :  { %v465_v42 = vld [vmem:[#allocation17 + $0x540] sm:$0xff]  ;;  %v6633_v46 = vcombine.high %v337_v39, %v341_v40  ;;  %2692 = vmatprep.subr.bf16.mxu0 %v6753_v38  ;;  %v6632_v53 = vcombine.low %v337_v39, %v341_v40 }
  0xe8   :  { %v469_v43 = vld [vmem:[#allocation17 + $0x560] sm:$0xff]  ;;  %2693 = vmatpush1.bf16.msra.mxu0 %v6752_v45 }
  0xe9   :  { %v6761_v47 = vcombine.high %v465_v42, %v469_v43  ;;  %v345_v48 = vld [vmem:[#allocation17 + $0x180] sm:$0xff]  ;;  %2653 = vmatprep.subr.bf16.mxu1 %v6633_v46  ;;  %v6760_v55 = vcombine.low %v465_v42, %v469_v43 }
  0xea   :  { %v349_v49 = vld [vmem:[#allocation17 + $0x1a0] sm:$0xff]  ;;  %2654 = vmatpush1.bf16.msra.mxu1 %v6632_v53 }
  0xeb   :  { %v473_v51 = vld [vmem:[#allocation17 + $0x580] sm:$0xff]  ;;  %v6641_v56 = vcombine.high %v345_v48, %v349_v49  ;;  %2694 = vmatprep.subr.bf16.mxu0 %v6761_v47  ;;  %v6640_v5 = vcombine.low %v345_v48, %v349_v49 }
  0xec   :  { %v477_v52 = vld [vmem:[#allocation17 + $0x5a0] sm:$0xff]  ;;  %2695 = vmatpush1.bf16.msra.mxu0 %v6760_v55 }
  0xed   :  { %v353_v54 = vld [vmem:[#allocation17 + $0x1c0] sm:$0xff]  ;;  %v6769_v60 = vcombine.high %v473_v51, %v477_v52  ;;  %2655 = vmatprep.subr.bf16.mxu1 %v6641_v56  ;;  %v6768_v8 = vcombine.low %v473_v51, %v477_v52 }
  0xee   :  { %v357_v57 = vld [vmem:[#allocation17 + $0x1e0] sm:$0xff]  ;;  %2656 = vmatpush1.bf16.msra.mxu1 %v6640_v5 }
  0xef   :  { %v8244_v58 = vld [vmem:[%s197_s25] ss:$8 sm:$0x3]  ;;  %v6649_v9 = vcombine.high %v353_v54, %v357_v57  ;;  %2696 = vmatprep.subr.bf16.mxu0 %v6769_v60  ;;  %v6648_v19 = vcombine.low %v353_v54, %v357_v57 }
  0xf0   :  { %v8247_v61 = vld [vmem:[%s207_s1] ss:$8 sm:$0x3]  ;;  %v237_v63 = vrot.slane %v8244_v58, %v8242_v50  ;;  %2697 = vmatpush1.bf16.msra.mxu0 %v6768_v8 }
  0xf1   :  { %v8250_v62 = vld [vmem:[%s217_s28] ss:$8 sm:$0x3]  ;;  %v248_v3 = vrot.slane %v8247_v61, %v8242_v50  ;;  %2657 = vmatprep.subr.bf16.mxu1 %v6649_v9 }
  0xf2   :  { %v481_v0 = vld [vmem:[#allocation17 + $0x5c0] sm:$0xff]  ;;  %v259_v4 = vrot.slane %v8250_v62, %v8242_v50  ;;  %2658 = vmatpush1.bf16.msra.mxu1 %v6648_v19 }
  0xf3   :  { %v485_v1 = vld [vmem:[#allocation17 + $0x5e0] sm:$0xff]  ;;  %v275_v10 = vsel %vm273_vm0, %v237_v63, %v248_v3 }
  0xf4   :  { %v8255_v2 = vld [vmem:[%s227_s27] ss:$8 sm:$0x3]  ;;  %v6777_v11 = vcombine.high %v481_v0, %v485_v1  ;;  %v278_v14 = vsel %vm276_vm1, %v275_v10, %v259_v4  ;;  %v6776_v21 = vcombine.low %v481_v0, %v485_v1  ;;  %v8281_v0 = vsub.s32 0, %v8233_v41 }
  0xf5   :  { %v270_v6 = vrot.slane %v8255_v2, %v8242_v50  ;;  %v361_v12 = vld [vmem:[#allocation17 + $0x200] sm:$0xff] }
  0xf6   :  { %v365_v13 = vld [vmem:[#allocation17 + $0x220] sm:$0xff]  ;;  %2698 = vmatprep.subr.bf16.mxu0 %v6777_v11  ;;  %v233_v11 = vrot.slane %v8244_v58, %v8281_v0  ;;  %v255_v19 = vrot.slane %v8250_v62, %v8281_v0 }
  0xf7   :  { %v489_v15 = vld [vmem:[#allocation17 + $0x600] sm:$0xff]  ;;  %v281_v17 = vsel %vm279_vm2, %v278_v14, %v270_v6  ;;  %v6657_v22 = vcombine.high %v361_v12, %v365_v13  ;;  %v6656_v28 = vcombine.low %v361_v12, %v365_v13  ;;  %2699 = vmatpush1.bf16.msra.mxu0 %v6776_v21  ;;  %v244_v12 = vrot.slane %v8247_v61, %v8281_v0 }
  0xf8   :  { %v493_v16 = vld [vmem:[#allocation17 + $0x620] sm:$0xff]  ;;  %v8275_v20 = vpack.c.bf16 %v281_v17, %v281_v17 }
  0xf9   :  { %v6785_v23 = vcombine.high %v489_v15, %v493_v16  ;;  %v369_v24 = vld [vmem:[#allocation17 + $0x240] sm:$0xff]  ;;  %2659 = vmatprep.subr.bf16.mxu1 %v6657_v22  ;;  %v6784_v29 = vcombine.low %v489_v15, %v493_v16  ;;  %v274_v58 = vsel %vm273_vm0, %v233_v11, %v244_v12 }
  0xfa   :  { %v373_v25 = vld [vmem:[#allocation17 + $0x260] sm:$0xff]  ;;  %6978 = vmatprep.mubr.msk.bf16.mxu1 %vm8271_vm4, %v8275_v20  ;;  %2660 = vmatpush1.bf16.msra.mxu1 %v6656_v28 }
  0xfb   :  { %v497_v26 = vld [vmem:[#allocation17 + $0x640] sm:$0xff]  ;;  %v6665_v30 = vcombine.high %v369_v24, %v373_v25  ;;  %2700 = vmatprep.subr.bf16.mxu0 %v6785_v23  ;;  %v6664_v37 = vcombine.low %v369_v24, %v373_v25 }
  0xfc   :  { %v501_v27 = vld [vmem:[#allocation17 + $0x660] sm:$0xff]  ;;  %2701 = vmatpush1.bf16.msra.mxu0 %v6784_v29  ;;  %v277_v29 = vsel %vm276_vm1, %v274_v58, %v255_v19 }
  0xfd   :  { %v6793_v31 = vcombine.high %v497_v26, %v501_v27  ;;  %v377_v33 = vld [vmem:[#allocation17 + $0x280] sm:$0xff]  ;;  %2661 = vmatprep.subr.bf16.mxu1 %v6665_v30  ;;  %v6792_v38 = vcombine.low %v497_v26, %v501_v27  ;;  %v266_v26 = vrot.slane %v8255_v2, %v8281_v0  ;;  %v298_v30 = vld [vmem:[#allocation17 + $0x8] sm:$0xff] }
  0xfe   :  { %v381_v34 = vld [vmem:[#allocation17 + $0x2a0] sm:$0xff]  ;;  %2662 = vmatpush1.bf16.msra.mxu1 %v6664_v37 }
  0xff   :  { %v505_v35 = vld [vmem:[#allocation17 + $0x680] sm:$0xff]  ;;  %v6673_v39 = vcombine.high %v377_v33, %v381_v34  ;;  %2702 = vmatprep.subr.bf16.mxu0 %v6793_v31  ;;  %v6672_v46 = vcombine.low %v377_v33, %v381_v34  ;;  %v302_v31 = vld [vmem:[#allocation17 + $0x28] sm:$0xff] }
 0x100   :  { %v509_v36 = vld [vmem:[#allocation17 + $0x6a0] sm:$0xff]  ;;  %2703 = vmatpush1.bf16.msra.mxu0 %v6792_v38  ;;  %v6595_v2 = vcombine.high %v298_v30, %v302_v31  ;;  %v285_v38 = vld [vmem:[#allocation11] sm:$0xff] }
 0x101   :  { %v6801_v40 = vcombine.high %v505_v35, %v509_v36  ;;  %v385_v42 = vld [vmem:[#allocation17 + $0x2c0] sm:$0xff]  ;;  %2663 = vmatprep.subr.bf16.mxu1 %v6673_v39  ;;  %v6800_v47 = vcombine.low %v505_v35, %v509_v36  ;;  %v280_v36 = vsel %vm279_vm2, %v277_v29, %v266_v26  ;;  %v346_v29 = vld [vmem:[#allocation17 + $0x188] sm:$0xff] }
 0x102   :  { %v389_v43 = vld [vmem:[#allocation17 + $0x2e0] sm:$0xff]  ;;  %2664 = vmatpush1.bf16.msra.mxu1 %v6672_v46  ;;  %v288_v46 = vld [vmem:[#allocation14 + $0x8] sm:$0xff] }
 0x103   :  { %v513_v44 = vld [vmem:[#allocation17 + $0x6c0] sm:$0xff]  ;;  %v6681_v48 = vcombine.high %v385_v42, %v389_v43  ;;  %2704 = vmatprep.subr.bf16.mxu0 %v6801_v40  ;;  %v6680_v55 = vcombine.low %v385_v42, %v389_v43  ;;  %v306_v40 = vld [vmem:[#allocation17 + $0x48] sm:$0xff]  ;;  %v8294_v43 = vpack.c.bf16 %v280_v36, %v280_v36 }
 0x104   :  { %v517_v45 = vld [vmem:[#allocation17 + $0x6e0] sm:$0xff]  ;;  %2705 = vmatpush1.bf16.msra.mxu0 %v6800_v47  ;;  %v310_v42 = vld [vmem:[#allocation17 + $0x68] sm:$0xff]  ;;  %v6594_v47 = vcombine.low %v298_v30, %v302_v31 }
 0x105   :  { %v6809_v49 = vcombine.high %v513_v44, %v517_v45  ;;  %v393_v51 = vld [vmem:[#allocation17 + $0x300] sm:$0xff]  ;;  %2665 = vmatprep.subr.bf16.mxu1 %v6681_v48  ;;  %v6808_v56 = vcombine.low %v513_v44, %v517_v45  ;;  %v8296_v48 = vpack.c.bf16 %v285_v38, %v285_v38  ;;  %v350_v30 = vld [vmem:[#allocation17 + $0x1a8] sm:$0xff] }
 0x106   :  { %v397_v52 = vld [vmem:[#allocation17 + $0x320] sm:$0xff]  ;;  %2666 = vmatpush1.bf16.msra.mxu1 %v6680_v55  ;;  %v8298_v55 = vpack.c.bf16 %v288_v46, %v288_v46  ;;  %v358_v38 = vld [vmem:[#allocation17 + $0x1e8] sm:$0xff] }
 0x107   :  { %v521_v53 = vld [vmem:[#allocation17 + $0x700] sm:$0xff]  ;;  %v6689_v57 = vcombine.high %v393_v51, %v397_v52  ;;  %2706 = vmatprep.subr.bf16.mxu0 %v6809_v49  ;;  %v6688_v4 = vcombine.low %v393_v51, %v397_v52  ;;  %v6603_v51 = vcombine.high %v306_v40, %v310_v42  ;;  %v362_v46 = vld [vmem:[#allocation17 + $0x208] sm:$0xff] }
 0x108   :  { %v525_v54 = vld [vmem:[#allocation17 + $0x720] sm:$0xff]  ;;  %2707 = vmatpush1.bf16.msra.mxu0 %v6808_v56 }
 0x109   :  { %v6817_v59 = vcombine.high %v521_v53, %v525_v54  ;;  %v401_v60 = vld [vmem:[#allocation17 + $0x340] sm:$0xff]  ;;  %2667 = vmatprep.subr.bf16.mxu1 %v6689_v57  ;;  %v6816_v5 = vcombine.low %v521_v53, %v525_v54  ;;  %v314_v53 = vld [vmem:[#allocation17 + $0x88] sm:$0xff] }
 0x10a   :  { %v405_v63 = vld [vmem:[#allocation17 + $0x360] sm:$0xff]  ;;  %2668 = vmatpush1.bf16.msra.mxu1 %v6688_v4  ;;  %v318_v54 = vld [vmem:[#allocation17 + $0xa8] sm:$0xff] }
 0x10b   :  { %v529_v1 = vld [vmem:[#allocation17 + $0x740] sm:$0xff]  ;;  %v6697_v6 = vcombine.high %v401_v60, %v405_v63  ;;  %2708 = vmatprep.subr.bf16.mxu0 %v6817_v59  ;;  %v6696_v15 = vcombine.low %v401_v60, %v405_v63  ;;  %v6602_v59 = vcombine.low %v306_v40, %v310_v42  ;;  %v6611_v63 = vcombine.high %v314_v53, %v318_v54  ;;  %v322_v4 = vld [vmem:[#allocation17 + $0xc8] sm:$0xff] }
 0x10c   :  { %v533_v3 = vld [vmem:[#allocation17 + $0x760] sm:$0xff]  ;;  %2709 = vmatpush1.bf16.msra.mxu0 %v6816_v5 }
 0x10d   :  { %v6825_v8 = vcombine.high %v529_v1, %v533_v3  ;;  %v409_v9 = vld [vmem:[#allocation17 + $0x380] sm:$0xff]  ;;  %2669 = vmatprep.subr.bf16.mxu1 %v6697_v6  ;;  %v6824_v16 = vcombine.low %v529_v1, %v533_v3  ;;  %v326_v6 = vld [vmem:[#allocation17 + $0xe8] sm:$0xff] }
 0x10e   :  { %v413_v10 = vld [vmem:[#allocation17 + $0x3a0] sm:$0xff]  ;;  %2670 = vmatpush1.bf16.msra.mxu1 %v6696_v15  ;;  %v334_v15 = vld [vmem:[#allocation17 + $0x128] sm:$0xff] }
 0x10f   :  { %v537_v13 = vld [vmem:[#allocation17 + $0x780] sm:$0xff]  ;;  %v6705_v17 = vcombine.high %v409_v9, %v413_v10  ;;  %2710 = vmatprep.subr.bf16.mxu0 %v6825_v8  ;;  %v6704_v61 = vcombine.low %v409_v9, %v413_v10  ;;  %v6610_v8 = vcombine.low %v314_v53, %v318_v54  ;;  %v6619_v10 = vcombine.high %v322_v4, %v326_v6 }
 0x110   :  { %v541_v14 = vld [vmem:[#allocation17 + $0x7a0] sm:$0xff]  ;;  %2711 = vmatpush1.bf16.msra.mxu0 %v6824_v16  ;;  %v6618_v16 = vcombine.low %v322_v4, %v326_v6  ;;  %v378_v6 = vld [vmem:[#allocation17 + $0x288] sm:$0xff] }
 0x111   :  { %v6833_v21 = vcombine.high %v537_v13, %v541_v14  ;;  %v417_v22 = vld [vmem:[#allocation17 + $0x3c0] sm:$0xff]  ;;  %2671 = vmatprep.subr.bf16.mxu1 %v6705_v17  ;;  %v6832_v27 = vcombine.low %v537_v13, %v541_v14  ;;  %v330_v13 = vld [vmem:[#allocation17 + $0x108] sm:$0xff] }
 0x112   :  { %v421_v23 = vld [vmem:[#allocation17 + $0x3e0] sm:$0xff]  ;;  %2672 = vmatpush1.bf16.msra.mxu1 %v6704_v61  ;;  %v6627_v19 = vcombine.high %v330_v13, %v334_v15 }
 0x113   :  { %v545_v24 = vld [vmem:[#allocation17 + $0x7c0] sm:$0xff]  ;;  %v6713_v28 = vcombine.high %v417_v22, %v421_v23  ;;  %2712 = vmatprep.subr.bf16.mxu0 %v6833_v21  ;;  %v6712_v35 = vcombine.low %v417_v22, %v421_v23  ;;  %v338_v23 = vld [vmem:[#allocation17 + $0x148] sm:$0xff] }
 0x114   :  { %v549_v25 = vld [vmem:[#allocation17 + $0x7e0] sm:$0xff]  ;;  %2713 = vmatpush1.bf16.msra.mxu0 %v6832_v27 }
 0x115   :  { %v6841_v62 = vcombine.high %v545_v24, %v549_v25  ;;  %v553_v33 = vld [vmem:[#allocation17 + $0x800] sm:$0xff]  ;;  %2673 = vmatprep.subr.bf16.mxu1 %v6713_v28  ;;  %v6840_v37 = vcombine.low %v545_v24, %v549_v25  ;;  %v342_v24 = vld [vmem:[#allocation17 + $0x168] sm:$0xff]  ;;  %v6626_v25 = vcombine.low %v330_v13, %v334_v15 }
 0x116   :  { %v557_v34 = vld [vmem:[#allocation17 + $0x820] sm:$0xff]  ;;  %2674 = vmatpush1.bf16.msra.mxu1 %v6712_v35  ;;  %v6635_v26 = vcombine.high %v338_v23, %v342_v24  ;;  %v6634_v31 = vcombine.low %v338_v23, %v342_v24  ;;  %v390_v15 = vld [vmem:[#allocation17 + $0x2e8] sm:$0xff] }
 0x117   :  { %2714 = vmatprep.subr.bf16.mxu0 %v6841_v62  ;;  %v6849_v39 = vcombine.high %v553_v33, %v557_v34  ;;  %v561_v44 = vld [vmem:[#allocation17 + $0x840] sm:$0xff]  ;;  %v6848_v49 = vcombine.low %v553_v33, %v557_v34  ;;  %2766 = vmatprep.subr.bf16.mxu1 %v6595_v2  ;;  %v6643_v34 = vcombine.high %v346_v29, %v350_v30  ;;  %v398_v24 = vld [vmem:[#allocation17 + $0x328] sm:$0xff] }
 0x118   :  { %v565_v45 = vld [vmem:[#allocation17 + $0x860] sm:$0xff]  ;;  %2715 = vmatpush1.bf16.msra.mxu0 %v6840_v37  ;;  %v354_v37 = vld [vmem:[#allocation17 + $0x1c8] sm:$0xff] }
 0x119   :  { %2725 = vmatprep.subr.bf16.mxu0 %v6849_v39  ;;  %v6857_v52 = vcombine.high %v561_v44, %v565_v45  ;;  %6981 = vmatmul.mubr.msk.bf16.vlgmr.msra.gmra.mrb[0].mxu1 %vm8271_vm4, %v8294_v43  ;;  %v569_v56 = vld [vmem:[#allocation17 + $0x880] sm:$0xff]  ;;  %v6856_v60 = vcombine.low %v561_v44, %v565_v45  ;;  %v6642_v39 = vcombine.low %v346_v29, %v350_v30  ;;  %v406_v30 = vld [vmem:[#allocation17 + $0x368] sm:$0xff] }
 0x11a   :  { %v573_v57 = vld [vmem:[#allocation17 + $0x8a0] sm:$0xff]  ;;  %2767 = vmatpush1.bf16.msra.mxu1 %v6594_v47  ;;  %6984 = vmatprep.mubr.msk.bf16.mxu1 %vm8271_vm4, %v8275_v20  ;;  %v6651_v42 = vcombine.high %v354_v37, %v358_v38 }
 0x11b   :  { %2717 = vmatmul.mubr.bf16.vlgmr.msra.gmra.mrb[0].mxu0 %v8296_v48  ;;  %2768 = vmatprep.subr.bf16.mxu1 %v6603_v51  ;;  %v577_v1 = vld [vmem:[#allocation17 + $0x8c0] sm:$0xff]  ;;  %v6865_v5 = vcombine.high %v569_v56, %v573_v57  ;;  %v6864_v9 = vcombine.low %v569_v56, %v573_v57  ;;  %v6650_v51 = vcombine.low %v354_v37, %v358_v38  ;;  %v370_v57 = vld [vmem:[#allocation17 + $0x248] sm:$0xff] }
 0x11c   :  { %2726 = vmatpush1.bf16.msra.mxu0 %v6848_v49  ;;  %v581_v3 = vld [vmem:[#allocation17 + $0x8e0] sm:$0xff]  ;;  %2757 = vmatprep.mubr.bf16.mxu0 %v8298_v55  ;;  %v366_v49 = vld [vmem:[#allocation17 + $0x228] sm:$0xff] }
 0x11d   :  { %2727 = vmatprep.subr.bf16.mxu0 %v6857_v52  ;;  %v585_v11 = vld [vmem:[#allocation17 + $0x900] sm:$0xff]  ;;  %v6873_v14 = vcombine.high %v577_v1, %v581_v3  ;;  %v6872_v17 = vcombine.low %v577_v1, %v581_v3  ;;  %v6659_v53 = vcombine.high %v362_v46, %v366_v49  ;;  %v414_v38 = vld [vmem:[#allocation17 + $0x3a8] sm:$0xff] }
 0x11e   :  { %2769 = vmatpush1.bf16.msra.mxu1 %v6602_v59  ;;  %v589_v12 = vld [vmem:[#allocation17 + $0x920] sm:$0xff] }
 0x11f   :  { %2770 = vmatprep.subr.bf16.mxu1 %v6611_v63  ;;  %v593_v21 = vld [vmem:[#allocation17 + $0x940] sm:$0xff]  ;;  %v6881_v58 = vcombine.high %v585_v11, %v589_v12  ;;  %v6880_v61 = vcombine.low %v585_v11, %v589_v12  ;;  %v6658_v63 = vcombine.low %v362_v46, %v366_v49  ;;  %v422_v49 = vld [vmem:[#allocation17 + $0x3e8] sm:$0xff] }
 0x120   :  { %2728 = vmatpush1.bf16.msra.mxu0 %v6856_v60  ;;  %v597_v22 = vld [vmem:[#allocation17 + $0x960] sm:$0xff]  ;;  %v374_v60 = vld [vmem:[#allocation17 + $0x268] sm:$0xff] }
 0x121   :  { %2729 = vmatprep.subr.bf16.mxu0 %v6865_v5  ;;  %v601_v27 = vld [vmem:[#allocation17 + $0x980] sm:$0xff]  ;;  %v6889_v62 = vcombine.high %v593_v21, %v597_v22  ;;  %v6888_v33 = vcombine.low %v593_v21, %v597_v22  ;;  %v6667_v3 = vcombine.high %v370_v57, %v374_v60 }
 0x122   :  { %2771 = vmatpush1.bf16.msra.mxu1 %v6610_v8  ;;  %v605_v28 = vld [vmem:[#allocation17 + $0x9a0] sm:$0xff] }
 0x123   :  { %2772 = vmatprep.subr.bf16.mxu1 %v6619_v10  ;;  %v609_v35 = vld [vmem:[#allocation17 + $0x9c0] sm:$0xff]  ;;  %v6897_v2 = vcombine.high %v601_v27, %v605_v28  ;;  %v6896_v40 = vcombine.low %v601_v27, %v605_v28  ;;  %v6666_v10 = vcombine.low %v370_v57, %v374_v60  ;;  %v430_v60 = vld [vmem:[#allocation17 + $0x428] sm:$0xff] }
 0x124   :  { %2730 = vmatpush1.bf16.msra.mxu0 %v6864_v9  ;;  %v613_v36 = vld [vmem:[#allocation17 + $0x9e0] sm:$0xff]  ;;  %v382_v9 = vld [vmem:[#allocation17 + $0x2a8] sm:$0xff] }
 0x125   :  { %2731 = vmatprep.subr.bf16.mxu0 %v6873_v14  ;;  %v617_v44 = vld [vmem:[#allocation17 + $0xa00] sm:$0xff]  ;;  %v6905_v47 = vcombine.high %v609_v35, %v613_v36  ;;  %v6904_v52 = vcombine.low %v609_v35, %v613_v36  ;;  %v6675_v12 = vcombine.high %v378_v6, %v382_v9  ;;  %v386_v14 = vld [vmem:[#allocation17 + $0x2c8] sm:$0xff] }
 0x126   :  { %2773 = vmatpush1.bf16.msra.mxu1 %v6618_v16  ;;  %v621_v45 = vld [vmem:[#allocation17 + $0xa20] sm:$0xff]  ;;  %v6683_v22 = vcombine.high %v386_v14, %v390_v15 }
 0x127   :  { %2774 = vmatprep.subr.bf16.mxu1 %v6627_v19  ;;  %v625_v54 = vld [vmem:[#allocation17 + $0xa40] sm:$0xff]  ;;  %v6913_v59 = vcombine.high %v617_v44, %v621_v45  ;;  %v6912_v1 = vcombine.low %v617_v44, %v621_v45  ;;  %v6674_v19 = vcombine.low %v378_v6, %v382_v9  ;;  %v434_v9 = vld [vmem:[#allocation17 + $0x448] sm:$0xff] }
 0x128   :  { %2732 = vmatpush1.bf16.msra.mxu0 %v6872_v17  ;;  %v629_v56 = vld [vmem:[#allocation17 + $0xa60] sm:$0xff] }
 0x129   :  { %2733 = vmatprep.subr.bf16.mxu0 %v6881_v58  ;;  %v633_v4 = vld [vmem:[#allocation17 + $0xa80] sm:$0xff]  ;;  %v6921_v8 = vcombine.high %v625_v54, %v629_v56  ;;  %v6920_v11 = vcombine.low %v625_v54, %v629_v56  ;;  %v394_v58 = vld [vmem:[#allocation17 + $0x308] sm:$0xff] }
 0x12a   :  { %2775 = vmatpush1.bf16.msra.mxu1 %v6626_v25  ;;  %v637_v5 = vld [vmem:[#allocation17 + $0xaa0] sm:$0xff]  ;;  %v6691_v28 = vcombine.high %v394_v58, %v398_v24 }
 0x12b   :  { %2776 = vmatprep.subr.bf16.mxu1 %v6635_v26  ;;  %v6929_v13 = vcombine.high %v633_v4, %v637_v5  ;;  %v641_v16 = vld [vmem:[#allocation17 + $0xac0] sm:$0xff]  ;;  %v6928_v21 = vcombine.low %v633_v4, %v637_v5  ;;  %v6682_v26 = vcombine.low %v386_v14, %v390_v15 }
 0x12c   :  { %2734 = vmatpush1.bf16.msra.mxu0 %v6880_v61  ;;  %v645_v17 = vld [vmem:[#allocation17 + $0xae0] sm:$0xff] }
 0x12d   :  { %2735 = vmatprep.subr.bf16.mxu0 %v6889_v62  ;;  %v6937_v23 = vcombine.high %v641_v16, %v645_v17  ;;  %v649_v25 = vld [vmem:[#allocation17 + $0xb00] sm:$0xff]  ;;  %v6936_v27 = vcombine.low %v641_v16, %v645_v17  ;;  %v402_v62 = vld [vmem:[#allocation17 + $0x348] sm:$0xff] }
 0x12e   :  { %2777 = vmatpush1.bf16.msra.mxu1 %v6634_v31  ;;  %v653_v61 = vld [vmem:[#allocation17 + $0xb20] sm:$0xff]  ;;  %v6699_v36 = vcombine.high %v402_v62, %v406_v30 }
 0x12f   :  { %2778 = vmatprep.subr.bf16.mxu1 %v6643_v34  ;;  %v6945_v29 = vcombine.high %v649_v25, %v653_v61  ;;  %v657_v31 = vld [vmem:[#allocation17 + $0xb40] sm:$0xff]  ;;  %v6690_v34 = vcombine.low %v394_v58, %v398_v24  ;;  %v6944_v35 = vcombine.low %v649_v25, %v653_v61 }
 0x130   :  { %2736 = vmatpush1.bf16.msra.mxu0 %v6888_v33  ;;  %v661_v33 = vld [vmem:[#allocation17 + $0xb60] sm:$0xff] }
 0x131   :  { %2737 = vmatprep.subr.bf16.mxu0 %v6897_v2  ;;  %v6953_v37 = vcombine.high %v657_v31, %v661_v33  ;;  %v410_v2 = vld [vmem:[#allocation17 + $0x388] sm:$0xff]  ;;  %v6952_v44 = vcombine.low %v657_v31, %v661_v33  ;;  %v287_v5 = vld [vmem:[#allocation14] sm:$0xff] }
 0x132   :  { %2779 = vmatpush1.bf16.msra.mxu1 %v6642_v39  ;;  %v665_v39 = vld [vmem:[#allocation17 + $0xb80] sm:$0xff]  ;;  %v6707_v45 = vcombine.high %v410_v2, %v414_v38 }
 0x133   :  { %2780 = vmatprep.subr.bf16.mxu1 %v6651_v42  ;;  %v6698_v42 = vcombine.low %v402_v62, %v406_v30 }
 0x134   :  { %2738 = vmatpush1.bf16.msra.mxu0 %v6896_v40  ;;  %v669_v40 = vld [vmem:[#allocation17 + $0xba0] sm:$0xff] }
 0x135   :  { %2739 = vmatprep.subr.bf16.mxu0 %v6905_v47  ;;  %v6961_v46 = vcombine.high %v665_v39, %v669_v40  ;;  %v418_v47 = vld [vmem:[#allocation17 + $0x3c8] sm:$0xff]  ;;  %v6960_v54 = vcombine.low %v665_v39, %v669_v40 }
 0x136   :  { %2781 = vmatpush1.bf16.msra.mxu1 %v6650_v51  ;;  %v673_v51 = vld [vmem:[#allocation17 + $0xbc0] sm:$0xff]  ;;  %v6715_v56 = vcombine.high %v418_v47, %v422_v49 }
 0x137   :  { %2782 = vmatprep.subr.bf16.mxu1 %v6659_v53  ;;  %v6706_v53 = vcombine.low %v410_v2, %v414_v38 }
 0x138   :  { %2740 = vmatpush1.bf16.msra.mxu0 %v6904_v52  ;;  %v677_v52 = vld [vmem:[#allocation17 + $0xbe0] sm:$0xff] }
 0x139   :  { %2741 = vmatprep.subr.bf16.mxu0 %v6913_v59  ;;  %v6969_v57 = vcombine.high %v673_v51, %v677_v52  ;;  %v426_v59 = vld [vmem:[#allocation17 + $0x408] sm:$0xff]  ;;  %v6968_v4 = vcombine.low %v673_v51, %v677_v52 }
 0x13a   :  { %2783 = vmatpush1.bf16.msra.mxu1 %v6658_v63  ;;  %v299_v63 = vld [vmem:[#allocation17 + $0x10] sm:$0xff]  ;;  %v6723_v6 = vcombine.high %v426_v59, %v430_v60  ;;  %v6722_v14 = vcombine.low %v426_v59, %v430_v60 }
 0x13b   :  { %2784 = vmatprep.subr.bf16.mxu1 %v6667_v3  ;;  %v6714_v3 = vcombine.low %v418_v47, %v422_v49 }
 0x13c   :  { %2742 = vmatpush1.bf16.msra.mxu0 %v6912_v1  ;;  %v303_v1 = vld [vmem:[#allocation17 + $0x30] sm:$0xff] }
 0x13d   :  { %2743 = vmatprep.subr.bf16.mxu0 %v6921_v8  ;;  %v6597_v8 = vcombine.high %v299_v63, %v303_v1  ;;  %v6596_v15 = vcombine.low %v299_v63, %v303_v1 }
 0x13e   :  { %2785 = vmatpush1.bf16.msra.mxu1 %v6666_v10  ;;  %v438_v10 = vld [vmem:[#allocation17 + $0x468] sm:$0xff] }
 0x13f   :  { %2786 = vmatprep.subr.bf16.mxu1 %v6675_v12  ;;  %v311_v12 = vld [vmem:[#allocation17 + $0x70] sm:$0xff]  ;;  %v6731_v16 = vcombine.high %v434_v9, %v438_v10  ;;  %v6730_v58 = vcombine.low %v434_v9, %v438_v10 }
 0x140   :  { %2744 = vmatpush1.bf16.msra.mxu0 %v6920_v11  ;;  %v307_v11 = vld [vmem:[#allocation17 + $0x50] sm:$0xff] }
 0x141   :  { %2745 = vmatprep.subr.bf16.mxu0 %v6929_v13  ;;  %v8308_v13 = vpack.c.bf16 %v287_v5, %v287_v5  ;;  %v6605_v17 = vcombine.high %v307_v11, %v311_v12  ;;  %v6604_v24 = vcombine.low %v307_v11, %v311_v12  ;;  %v355_v5 = vld [vmem:[#allocation17 + $0x1d0] sm:$0xff]  ;;  %v490_v12 = vld [vmem:[#allocation17 + $0x608] sm:$0xff] }
 0x142   :  { %2787 = vmatpush1.bf16.msra.mxu1 %v6674_v19  ;;  %v442_v19 = vld [vmem:[#allocation17 + $0x488] sm:$0xff] }
 0x143   :  { %2788 = vmatprep.subr.bf16.mxu1 %v6683_v22  ;;  %v315_v22 = vld [vmem:[#allocation17 + $0x90] sm:$0xff] }
 0x144   :  { %2746 = vmatpush1.bf16.msra.mxu0 %v6928_v21  ;;  %v446_v21 = vld [vmem:[#allocation17 + $0x4a8] sm:$0xff] }
 0x145   :  { %2747 = vmatprep.subr.bf16.mxu0 %v6937_v23  ;;  %v319_v23 = vld [vmem:[#allocation17 + $0xb0] sm:$0xff]  ;;  %v6739_v25 = vcombine.high %v442_v19, %v446_v21  ;;  %v6738_v62 = vcombine.low %v442_v19, %v446_v21 }
 0x146   :  { %2789 = vmatpush1.bf16.msra.mxu1 %v6682_v26  ;;  %v6613_v61 = vcombine.high %v315_v22, %v319_v23  ;;  %v450_v26 = vld [vmem:[#allocation17 + $0x4c8] sm:$0xff]  ;;  %v6612_v30 = vcombine.low %v315_v22, %v319_v23 }
 0x147   :  { %2790 = vmatprep.subr.bf16.mxu1 %v6691_v28  ;;  %v323_v28 = vld [vmem:[#allocation17 + $0xd0] sm:$0xff]  ;;  %v498_v23 = vld [vmem:[#allocation17 + $0x648] sm:$0xff] }
 0x148   :  { %2748 = vmatpush1.bf16.msra.mxu0 %v6936_v27  ;;  %v454_v27 = vld [vmem:[#allocation17 + $0x4e8] sm:$0xff] }
 0x149   :  { %2749 = vmatprep.subr.bf16.mxu0 %v6945_v29  ;;  %v327_v29 = vld [vmem:[#allocation17 + $0xf0] sm:$0xff]  ;;  %v6747_v31 = vcombine.high %v450_v26, %v454_v27  ;;  %v6746_v2 = vcombine.low %v450_v26, %v454_v27 }
 0x14a   :  { %2791 = vmatpush1.bf16.msra.mxu1 %v6690_v34  ;;  %v6621_v33 = vcombine.high %v323_v28, %v327_v29  ;;  %v458_v34 = vld [vmem:[#allocation17 + $0x508] sm:$0xff]  ;;  %v6620_v38 = vcombine.low %v323_v28, %v327_v29 }
 0x14b   :  { %2792 = vmatprep.subr.bf16.mxu1 %v6699_v36  ;;  %v331_v36 = vld [vmem:[#allocation17 + $0x110] sm:$0xff]  ;;  %v506_v29 = vld [vmem:[#allocation17 + $0x688] sm:$0xff] }
 0x14c   :  { %2750 = vmatpush1.bf16.msra.mxu0 %v6944_v35  ;;  %v462_v35 = vld [vmem:[#allocation17 + $0x528] sm:$0xff] }
 0x14d   :  { %2751 = vmatprep.subr.bf16.mxu0 %v6953_v37  ;;  %v335_v37 = vld [vmem:[#allocation17 + $0x130] sm:$0xff]  ;;  %v6755_v39 = vcombine.high %v458_v34, %v462_v35  ;;  %v6754_v47 = vcombine.low %v458_v34, %v462_v35 }
 0x14e   :  { %2793 = vmatpush1.bf16.msra.mxu1 %v6698_v42  ;;  %v6629_v40 = vcombine.high %v331_v36, %v335_v37  ;;  %v466_v42 = vld [vmem:[#allocation17 + $0x548] sm:$0xff]  ;;  %v6628_v49 = vcombine.low %v331_v36, %v335_v37 }
 0x14f   :  { %2794 = vmatprep.subr.bf16.mxu1 %v6707_v45  ;;  %v339_v45 = vld [vmem:[#allocation17 + $0x150] sm:$0xff]  ;;  %v514_v37 = vld [vmem:[#allocation17 + $0x6c8] sm:$0xff] }
 0x150   :  { %2752 = vmatpush1.bf16.msra.mxu0 %v6952_v44  ;;  %v470_v44 = vld [vmem:[#allocation17 + $0x568] sm:$0xff] }
 0x151   :  { %2753 = vmatprep.subr.bf16.mxu0 %v6961_v46  ;;  %v343_v46 = vld [vmem:[#allocation17 + $0x170] sm:$0xff]  ;;  %v6763_v51 = vcombine.high %v466_v42, %v470_v44  ;;  %v6762_v59 = vcombine.low %v466_v42, %v470_v44 }
 0x152   :  { %2795 = vmatpush1.bf16.msra.mxu1 %v6706_v53  ;;  %v6637_v52 = vcombine.high %v339_v45, %v343_v46  ;;  %v474_v53 = vld [vmem:[#allocation17 + $0x588] sm:$0xff]  ;;  %v6636_v60 = vcombine.low %v339_v45, %v343_v46 }
 0x153   :  { %2796 = vmatprep.subr.bf16.mxu1 %v6715_v56  ;;  %v347_v56 = vld [vmem:[#allocation17 + $0x190] sm:$0xff]  ;;  %v522_v46 = vld [vmem:[#allocation17 + $0x708] sm:$0xff] }
 0x154   :  { %2754 = vmatpush1.bf16.msra.mxu0 %v6960_v54  ;;  %v478_v54 = vld [vmem:[#allocation17 + $0x5a8] sm:$0xff] }
 0x155   :  { %2755 = vmatprep.subr.bf16.mxu0 %v6969_v57  ;;  %v351_v57 = vld [vmem:[#allocation17 + $0x1b0] sm:$0xff]  ;;  %v6771_v63 = vcombine.high %v474_v53, %v478_v54 }
 0x156   :  { %2797 = vmatpush1.bf16.msra.mxu1 %v6714_v3  ;;  %v6645_v1 = vcombine.high %v347_v56, %v351_v57  ;;  %v482_v3 = vld [vmem:[#allocation17 + $0x5c8] sm:$0xff]  ;;  %v6644_v9 = vcombine.low %v347_v56, %v351_v57 }
 0x157   :  { %2807 = vmatprep.subr.bf16.mxu1 %v6723_v6  ;;  %v359_v6 = vld [vmem:[#allocation17 + $0x1f0] sm:$0xff]  ;;  %v530_v57 = vld [vmem:[#allocation17 + $0x748] sm:$0xff] }
 0x158   :  { %2756 = vmatpush1.bf16.msra.mxu0 %v6968_v4  ;;  %v486_v4 = vld [vmem:[#allocation17 + $0x5e8] sm:$0xff]  ;;  %v6653_v11 = vcombine.high %v355_v5, %v359_v6  ;;  %v6652_v19 = vcombine.low %v355_v5, %v359_v6 }
 0x159   :  { %2889 = vmatprep.subr.bf16.mxu0 %v6597_v8  ;;  %6987 = vmatmul.mubr.msk.bf16.vlgmr.msra.gmra.mrb[4].mxu1 %vm8271_vm4, %v8294_v43  ;;  %v6770_v8 = vcombine.low %v474_v53, %v478_v54  ;;  %v6779_v10 = vcombine.high %v482_v3, %v486_v4  ;;  %v538_v6 = vld [vmem:[#allocation17 + $0x788] sm:$0xff] }
 0x15a   :  { %2808 = vmatpush1.bf16.msra.mxu1 %v6722_v14  ;;  %2839 = vmatprep.mubr.bf16.mxu1 %v8263_v7  ;;  %v494_v14 = vld [vmem:[#allocation17 + $0x628] sm:$0xff] }
 0x15b   :  { %2758 = vmatmul.mubr.bf16.vlgmr.msra.gmra.mrb[0].mxu0 %v8308_v13  ;;  %2809 = vmatprep.subr.bf16.mxu1 %v6731_v16  ;;  %v367_v16 = vld [vmem:[#allocation17 + $0x230] sm:$0xff]  ;;  %v6787_v21 = vcombine.high %v490_v12, %v494_v14 }
 0x15c   :  { %2890 = vmatpush1.bf16.msra.mxu0 %v6596_v15  ;;  %6990 = vmatprep.mubr.msk.bf16.mxu0 %vm8271_vm4, %v8275_v20  ;;  %v363_v15 = vld [vmem:[#allocation17 + $0x210] sm:$0xff] }
 0x15d   :  { %2891 = vmatprep.subr.bf16.mxu0 %v6605_v17  ;;  %v6778_v17 = vcombine.low %v482_v3, %v486_v4  ;;  %v6661_v22 = vcombine.high %v363_v15, %v367_v16  ;;  %v6660_v26 = vcombine.low %v363_v15, %v367_v16  ;;  %v546_v16 = vld [vmem:[#allocation17 + $0x7c8] sm:$0xff] }
 0x15e   :  { %2810 = vmatpush1.bf16.msra.mxu1 %v6730_v58  ;;  %v502_v58 = vld [vmem:[#allocation17 + $0x668] sm:$0xff] }
 0x15f   :  { %2811 = vmatprep.subr.bf16.mxu1 %v6739_v25  ;;  %v375_v25 = vld [vmem:[#allocation17 + $0x270] sm:$0xff]  ;;  %v6795_v27 = vcombine.high %v498_v23, %v502_v58 }
 0x160   :  { %2892 = vmatpush1.bf16.msra.mxu0 %v6604_v24  ;;  %v371_v24 = vld [vmem:[#allocation17 + $0x250] sm:$0xff] }
 0x161   :  { %2893 = vmatprep.subr.bf16.mxu0 %v6613_v61  ;;  %v6786_v61 = vcombine.low %v490_v12, %v494_v14  ;;  %v6669_v28 = vcombine.high %v371_v24, %v375_v25  ;;  %v6668_v34 = vcombine.low %v371_v24, %v375_v25  ;;  %v554_v25 = vld [vmem:[#allocation17 + $0x808] sm:$0xff] }
 0x162   :  { %2812 = vmatpush1.bf16.msra.mxu1 %v6738_v62  ;;  %v510_v62 = vld [vmem:[#allocation17 + $0x6a8] sm:$0xff] }
 0x163   :  { %2813 = vmatprep.subr.bf16.mxu1 %v6747_v31  ;;  %v383_v31 = vld [vmem:[#allocation17 + $0x2b0] sm:$0xff]  ;;  %v6803_v35 = vcombine.high %v506_v29, %v510_v62 }
 0x164   :  { %2894 = vmatpush1.bf16.msra.mxu0 %v6612_v30  ;;  %v379_v30 = vld [vmem:[#allocation17 + $0x290] sm:$0xff] }
 0x165   :  { %2895 = vmatprep.subr.bf16.mxu0 %v6621_v33  ;;  %v6794_v33 = vcombine.low %v498_v23, %v502_v58  ;;  %v6677_v36 = vcombine.high %v379_v30, %v383_v31  ;;  %v6676_v42 = vcombine.low %v379_v30, %v383_v31  ;;  %v562_v31 = vld [vmem:[#allocation17 + $0x848] sm:$0xff] }
 0x166   :  { %2814 = vmatpush1.bf16.msra.mxu1 %v6746_v2  ;;  %v518_v2 = vld [vmem:[#allocation17 + $0x6e8] sm:$0xff] }
 0x167   :  { %2815 = vmatprep.subr.bf16.mxu1 %v6755_v39  ;;  %v391_v39 = vld [vmem:[#allocation17 + $0x2f0] sm:$0xff]  ;;  %v6811_v44 = vcombine.high %v514_v37, %v518_v2 }
 0x168   :  { %2896 = vmatpush1.bf16.msra.mxu0 %v6620_v38  ;;  %v387_v38 = vld [vmem:[#allocation17 + $0x2d0] sm:$0xff] }
 0x169   :  { %2897 = vmatprep.subr.bf16.mxu0 %v6629_v40  ;;  %v6802_v40 = vcombine.low %v506_v29, %v510_v62  ;;  %v6685_v45 = vcombine.high %v387_v38, %v391_v39  ;;  %v6684_v53 = vcombine.low %v387_v38, %v391_v39  ;;  %v570_v39 = vld [vmem:[#allocation17 + $0x888] sm:$0xff] }
 0x16a   :  { %2816 = vmatpush1.bf16.msra.mxu1 %v6754_v47  ;;  %v526_v47 = vld [vmem:[#allocation17 + $0x728] sm:$0xff] }
 0x16b   :  { %2817 = vmatprep.subr.bf16.mxu1 %v6763_v51  ;;  %v399_v51 = vld [vmem:[#allocation17 + $0x330] sm:$0xff]  ;;  %v6819_v54 = vcombine.high %v522_v46, %v526_v47 }
 0x16c   :  { %2898 = vmatpush1.bf16.msra.mxu0 %v6628_v49  ;;  %v395_v49 = vld [vmem:[#allocation17 + $0x310] sm:$0xff] }
 0x16d   :  { %2899 = vmatprep.subr.bf16.mxu0 %v6637_v52  ;;  %v6810_v52 = vcombine.low %v514_v37, %v518_v2  ;;  %v6693_v56 = vcombine.high %v395_v49, %v399_v51  ;;  %v6692_v3 = vcombine.low %v395_v49, %v399_v51  ;;  %v578_v51 = vld [vmem:[#allocation17 + $0x8c8] sm:$0xff] }
 0x16e   :  { %2818 = vmatpush1.bf16.msra.mxu1 %v6762_v59  ;;  %v534_v59 = vld [vmem:[#allocation17 + $0x768] sm:$0xff] }
 0x16f   :  { %2819 = vmatprep.subr.bf16.mxu1 %v6771_v63  ;;  %v407_v63 = vld [vmem:[#allocation17 + $0x370] sm:$0xff]  ;;  %v6827_v4 = vcombine.high %v530_v57, %v534_v59 }
 0x170   :  { %2900 = vmatpush1.bf16.msra.mxu0 %v6636_v60  ;;  %v403_v60 = vld [vmem:[#allocation17 + $0x350] sm:$0xff] }
 0x171   :  { %2901 = vmatprep.subr.bf16.mxu0 %v6645_v1  ;;  %v6818_v1 = vcombine.low %v522_v46, %v526_v47  ;;  %v6701_v5 = vcombine.high %v403_v60, %v407_v63  ;;  %v6700_v12 = vcombine.low %v403_v60, %v407_v63  ;;  %v586_v63 = vld [vmem:[#allocation17 + $0x908] sm:$0xff] }
 0x172   :  { %2820 = vmatpush1.bf16.msra.mxu1 %v6770_v8  ;;  %v542_v8 = vld [vmem:[#allocation17 + $0x7a8] sm:$0xff] }
 0x173   :  { %2821 = vmatprep.subr.bf16.mxu1 %v6779_v10  ;;  %v415_v10 = vld [vmem:[#allocation17 + $0x3b0] sm:$0xff]  ;;  %v6835_v14 = vcombine.high %v538_v6, %v542_v8 }
 0x174   :  { %2902 = vmatpush1.bf16.msra.mxu0 %v6644_v9  ;;  %v411_v9 = vld [vmem:[#allocation17 + $0x390] sm:$0xff] }
 0x175   :  { %2903 = vmatprep.subr.bf16.mxu0 %v6653_v11  ;;  %v6826_v11 = vcombine.low %v530_v57, %v534_v59  ;;  %v6709_v15 = vcombine.high %v411_v9, %v415_v10  ;;  %v6708_v23 = vcombine.low %v411_v9, %v415_v10  ;;  %v594_v10 = vld [vmem:[#allocation17 + $0x948] sm:$0xff] }
 0x176   :  { %2822 = vmatpush1.bf16.msra.mxu1 %v6778_v17  ;;  %v550_v17 = vld [vmem:[#allocation17 + $0x7e8] sm:$0xff] }
 0x177   :  { %2823 = vmatprep.subr.bf16.mxu1 %v6787_v21  ;;  %v423_v21 = vld [vmem:[#allocation17 + $0x3f0] sm:$0xff]  ;;  %v6843_v58 = vcombine.high %v546_v16, %v550_v17 }
 0x178   :  { %2904 = vmatpush1.bf16.msra.mxu0 %v6652_v19  ;;  %v419_v19 = vld [vmem:[#allocation17 + $0x3d0] sm:$0xff] }
 0x179   :  { %2905 = vmatprep.subr.bf16.mxu0 %v6661_v22  ;;  %v6834_v22 = vcombine.low %v538_v6, %v542_v8  ;;  %v6717_v24 = vcombine.high %v419_v19, %v423_v21  ;;  %v6716_v29 = vcombine.low %v419_v19, %v423_v21  ;;  %v602_v21 = vld [vmem:[#allocation17 + $0x988] sm:$0xff] }
 0x17a   :  { %2824 = vmatpush1.bf16.msra.mxu1 %v6786_v61  ;;  %v558_v61 = vld [vmem:[#allocation17 + $0x828] sm:$0xff] }
 0x17b   :  { %2825 = vmatprep.subr.bf16.mxu1 %v6795_v27  ;;  %v431_v27 = vld [vmem:[#allocation17 + $0x430] sm:$0xff]  ;;  %v6851_v62 = vcombine.high %v554_v25, %v558_v61 }
 0x17c   :  { %2906 = vmatpush1.bf16.msra.mxu0 %v6660_v26  ;;  %v427_v26 = vld [vmem:[#allocation17 + $0x410] sm:$0xff] }
 0x17d   :  { %2907 = vmatprep.subr.bf16.mxu0 %v6669_v28  ;;  %v6842_v28 = vcombine.low %v546_v16, %v550_v17  ;;  %v6725_v30 = vcombine.high %v427_v26, %v431_v27  ;;  %v6724_v37 = vcombine.low %v427_v26, %v431_v27  ;;  %v610_v27 = vld [vmem:[#allocation17 + $0x9c8] sm:$0xff] }
 0x17e   :  { %2826 = vmatpush1.bf16.msra.mxu1 %v6794_v33  ;;  %v566_v33 = vld [vmem:[#allocation17 + $0x868] sm:$0xff] }
 0x17f   :  { %2827 = vmatprep.subr.bf16.mxu1 %v6803_v35  ;;  %v439_v35 = vld [vmem:[#allocation17 + $0x470] sm:$0xff]  ;;  %v6859_v2 = vcombine.high %v562_v31, %v566_v33 }
 0x180   :  { %2908 = vmatpush1.bf16.msra.mxu0 %v6668_v34  ;;  %v435_v34 = vld [vmem:[#allocation17 + $0x450] sm:$0xff] }
 0x181   :  { %2909 = vmatprep.subr.bf16.mxu0 %v6677_v36  ;;  %v6850_v36 = vcombine.low %v554_v25, %v558_v61  ;;  %v6733_v38 = vcombine.high %v435_v34, %v439_v35  ;;  %v6732_v46 = vcombine.low %v435_v34, %v439_v35  ;;  %v618_v35 = vld [vmem:[#allocation17 + $0xa08] sm:$0xff] }
 0x182   :  { %2828 = vmatpush1.bf16.msra.mxu1 %v6802_v40  ;;  %v574_v40 = vld [vmem:[#allocation17 + $0x8a8] sm:$0xff] }
 0x183   :  { %2829 = vmatprep.subr.bf16.mxu1 %v6811_v44  ;;  %v447_v44 = vld [vmem:[#allocation17 + $0x4b0] sm:$0xff]  ;;  %v6867_v47 = vcombine.high %v570_v39, %v574_v40 }
 0x184   :  { %2910 = vmatpush1.bf16.msra.mxu0 %v6676_v42  ;;  %v443_v42 = vld [vmem:[#allocation17 + $0x490] sm:$0xff] }
 0x185   :  { %2911 = vmatprep.subr.bf16.mxu0 %v6685_v45  ;;  %v6858_v45 = vcombine.low %v562_v31, %v566_v33  ;;  %v6741_v49 = vcombine.high %v443_v42, %v447_v44  ;;  %v6740_v57 = vcombine.low %v443_v42, %v447_v44  ;;  %v626_v44 = vld [vmem:[#allocation17 + $0xa48] sm:$0xff] }
 0x186   :  { %2830 = vmatpush1.bf16.msra.mxu1 %v6810_v52  ;;  %v582_v52 = vld [vmem:[#allocation17 + $0x8e8] sm:$0xff] }
 0x187   :  { %2831 = vmatprep.subr.bf16.mxu1 %v6819_v54  ;;  %v455_v54 = vld [vmem:[#allocation17 + $0x4f0] sm:$0xff]  ;;  %v6875_v59 = vcombine.high %v578_v51, %v582_v52 }
 0x188   :  { %2912 = vmatpush1.bf16.msra.mxu0 %v6684_v53  ;;  %v451_v53 = vld [vmem:[#allocation17 + $0x4d0] sm:$0xff] }
 0x189   :  { %2913 = vmatprep.subr.bf16.mxu0 %v6693_v56  ;;  %v6866_v56 = vcombine.low %v570_v39, %v574_v40  ;;  %v6749_v60 = vcombine.high %v451_v53, %v455_v54  ;;  %v6748_v6 = vcombine.low %v451_v53, %v455_v54  ;;  %v634_v54 = vld [vmem:[#allocation17 + $0xa88] sm:$0xff] }
 0x18a   :  { %2832 = vmatpush1.bf16.msra.mxu1 %v6818_v1  ;;  %v590_v1 = vld [vmem:[#allocation17 + $0x928] sm:$0xff] }
 0x18b   :  { %2833 = vmatprep.subr.bf16.mxu1 %v6827_v4  ;;  %v463_v4 = vld [vmem:[#allocation17 + $0x530] sm:$0xff]  ;;  %v6883_v8 = vcombine.high %v586_v63, %v590_v1 }
 0x18c   :  { %2914 = vmatpush1.bf16.msra.mxu0 %v6692_v3  ;;  %v459_v3 = vld [vmem:[#allocation17 + $0x510] sm:$0xff] }
 0x18d   :  { %2915 = vmatprep.subr.bf16.mxu0 %v6701_v5  ;;  %v6874_v5 = vcombine.low %v578_v51, %v582_v52  ;;  %v6757_v9 = vcombine.high %v459_v3, %v463_v4  ;;  %v6756_v16 = vcombine.low %v459_v3, %v463_v4  ;;  %v642_v4 = vld [vmem:[#allocation17 + $0xac8] sm:$0xff] }
 0x18e   :  { %2834 = vmatpush1.bf16.msra.mxu1 %v6826_v11  ;;  %v598_v11 = vld [vmem:[#allocation17 + $0x968] sm:$0xff] }
 0x18f   :  { %2835 = vmatprep.subr.bf16.mxu1 %v6835_v14  ;;  %v471_v14 = vld [vmem:[#allocation17 + $0x570] sm:$0xff]  ;;  %v6891_v17 = vcombine.high %v594_v10, %v598_v11 }
 0x190   :  { %2916 = vmatpush1.bf16.msra.mxu0 %v6700_v12  ;;  %v467_v12 = vld [vmem:[#allocation17 + $0x550] sm:$0xff] }
 0x191   :  { %2917 = vmatprep.subr.bf16.mxu0 %v6709_v15  ;;  %v6882_v15 = vcombine.low %v586_v63, %v590_v1  ;;  %v6765_v19 = vcombine.high %v467_v12, %v471_v14  ;;  %v6764_v25 = vcombine.low %v467_v12, %v471_v14  ;;  %v650_v14 = vld [vmem:[#allocation17 + $0xb08] sm:$0xff] }
 0x192   :  { %2836 = vmatpush1.bf16.msra.mxu1 %v6834_v22  ;;  %v606_v22 = vld [vmem:[#allocation17 + $0x9a8] sm:$0xff] }
 0x193   :  { %2837 = vmatprep.subr.bf16.mxu1 %v6843_v58  ;;  %v479_v58 = vld [vmem:[#allocation17 + $0x5b0] sm:$0xff]  ;;  %v6899_v61 = vcombine.high %v602_v21, %v606_v22 }
 0x194   :  { %2918 = vmatpush1.bf16.msra.mxu0 %v6708_v23  ;;  %v475_v23 = vld [vmem:[#allocation17 + $0x590] sm:$0xff] }
 0x195   :  { %2919 = vmatprep.subr.bf16.mxu0 %v6717_v24  ;;  %v6890_v24 = vcombine.low %v594_v10, %v598_v11  ;;  %v6773_v26 = vcombine.high %v475_v23, %v479_v58  ;;  %v6772_v31 = vcombine.low %v475_v23, %v479_v58  ;;  %v658_v58 = vld [vmem:[#allocation17 + $0xb48] sm:$0xff] }
 0x196   :  { %2838 = vmatpush1.bf16.msra.mxu1 %v6842_v28  ;;  %v614_v28 = vld [vmem:[#allocation17 + $0x9e8] sm:$0xff] }
 0x197   :  { %2848 = vmatprep.subr.bf16.mxu1 %v6851_v62  ;;  %v487_v62 = vld [vmem:[#allocation17 + $0x5f0] sm:$0xff]  ;;  %v6907_v33 = vcombine.high %v610_v27, %v614_v28 }
 0x198   :  { %2920 = vmatpush1.bf16.msra.mxu0 %v6716_v29  ;;  %v483_v29 = vld [vmem:[#allocation17 + $0x5d0] sm:$0xff] }
 0x199   :  { %2930 = vmatprep.subr.bf16.mxu0 %v6725_v30  ;;  %2840 = vmatmul.mubr.bf16.vlgmr.msra.gmra.mrb[4].mxu1 %v8296_v48  ;;  %v6898_v30 = vcombine.low %v602_v21, %v606_v22  ;;  %v6781_v34 = vcombine.high %v483_v29, %v487_v62  ;;  %v6780_v39 = vcombine.low %v483_v29, %v487_v62  ;;  %v666_v62 = vld [vmem:[#allocation17 + $0xb88] sm:$0xff] }
 0x19a   :  { %2849 = vmatpush1.bf16.msra.mxu1 %v6850_v36  ;;  %2880 = vmatprep.mubr.bf16.mxu1 %v8298_v55  ;;  %v622_v36 = vld [vmem:[#allocation17 + $0xa28] sm:$0xff] }
 0x19b   :  { %6993 = vmatmul.mubr.msk.bf16.vlgmr.msra.gmra.mrb[4].mxu0 %vm8271_vm4, %v8294_v43  ;;  %2850 = vmatprep.subr.bf16.mxu1 %v6859_v2  ;;  %v495_v2 = vld [vmem:[#allocation17 + $0x630] sm:$0xff]  ;;  %v6915_v40 = vcombine.high %v618_v35, %v622_v36 }
 0x19c   :  { %2931 = vmatpush1.bf16.msra.mxu0 %v6724_v37  ;;  %2962 = vmatprep.mubr.bf16.mxu0 %v8263_v7  ;;  %v491_v37 = vld [vmem:[#allocation17 + $0x610] sm:$0xff] }
 0x19d   :  { %2932 = vmatprep.subr.bf16.mxu0 %v6733_v38  ;;  %v6906_v38 = vcombine.low %v610_v27, %v614_v28  ;;  %v6789_v42 = vcombine.high %v491_v37, %v495_v2  ;;  %v6788_v51 = vcombine.low %v491_v37, %v495_v2  ;;  %v674_v2 = vld [vmem:[#allocation17 + $0xbc8] sm:$0xff] }
 0x19e   :  { %2851 = vmatpush1.bf16.msra.mxu1 %v6858_v45  ;;  %v630_v45 = vld [vmem:[#allocation17 + $0xa68] sm:$0xff] }
 0x19f   :  { %2852 = vmatprep.subr.bf16.mxu1 %v6867_v47  ;;  %v503_v47 = vld [vmem:[#allocation17 + $0x670] sm:$0xff]  ;;  %v6923_v52 = vcombine.high %v626_v44, %v630_v45 }
 0x1a0   :  { %2933 = vmatpush1.bf16.msra.mxu0 %v6732_v46  ;;  %v499_v46 = vld [vmem:[#allocation17 + $0x650] sm:$0xff] }
 0x1a1   :  { %2934 = vmatprep.subr.bf16.mxu0 %v6741_v49  ;;  %v6914_v49 = vcombine.low %v618_v35, %v622_v36  ;;  %v6797_v53 = vcombine.high %v499_v46, %v503_v47  ;;  %v6796_v63 = vcombine.low %v499_v46, %v503_v47  ;;  %v300_v47 = vld [vmem:[#allocation17 + $0x18] sm:$0xff] }
 0x1a2   :  { %2853 = vmatpush1.bf16.msra.mxu1 %v6866_v56  ;;  %v638_v56 = vld [vmem:[#allocation17 + $0xaa8] sm:$0xff] }
 0x1a3   :  { %2854 = vmatprep.subr.bf16.mxu1 %v6875_v59  ;;  %v511_v59 = vld [vmem:[#allocation17 + $0x6b0] sm:$0xff]  ;;  %v6931_v1 = vcombine.high %v634_v54, %v638_v56 }
 0x1a4   :  { %2935 = vmatpush1.bf16.msra.mxu0 %v6740_v57  ;;  %v507_v57 = vld [vmem:[#allocation17 + $0x690] sm:$0xff] }
 0x1a5   :  { %2936 = vmatprep.subr.bf16.mxu0 %v6749_v60  ;;  %v6922_v60 = vcombine.low %v626_v44, %v630_v45  ;;  %v6805_v3 = vcombine.high %v507_v57, %v511_v59  ;;  %v6804_v10 = vcombine.low %v507_v57, %v511_v59  ;;  %v308_v59 = vld [vmem:[#allocation17 + $0x58] sm:$0xff] }
 0x1a6   :  { %2855 = vmatpush1.bf16.msra.mxu1 %v6874_v5  ;;  %v646_v5 = vld [vmem:[#allocation17 + $0xae8] sm:$0xff] }
 0x1a7   :  { %2856 = vmatprep.subr.bf16.mxu1 %v6883_v8  ;;  %v519_v8 = vld [vmem:[#allocation17 + $0x6f0] sm:$0xff]  ;;  %v6939_v11 = vcombine.high %v642_v4, %v646_v5 }
 0x1a8   :  { %2937 = vmatpush1.bf16.msra.mxu0 %v6748_v6  ;;  %v515_v6 = vld [vmem:[#allocation17 + $0x6d0] sm:$0xff] }
 0x1a9   :  { %2938 = vmatprep.subr.bf16.mxu0 %v6757_v9  ;;  %v6930_v9 = vcombine.low %v634_v54, %v638_v56  ;;  %v6813_v12 = vcombine.high %v515_v6, %v519_v8  ;;  %v6812_v21 = vcombine.low %v515_v6, %v519_v8  ;;  %v316_v8 = vld [vmem:[#allocation17 + $0x98] sm:$0xff] }
 0x1aa   :  { %2857 = vmatpush1.bf16.msra.mxu1 %v6882_v15  ;;  %v654_v15 = vld [vmem:[#allocation17 + $0xb28] sm:$0xff] }
 0x1ab   :  { %2858 = vmatprep.subr.bf16.mxu1 %v6891_v17  ;;  %v527_v17 = vld [vmem:[#allocation17 + $0x730] sm:$0xff]  ;;  %v6947_v22 = vcombine.high %v650_v14, %v654_v15 }
 0x1ac   :  { %2939 = vmatpush1.bf16.msra.mxu0 %v6756_v16  ;;  %v523_v16 = vld [vmem:[#allocation17 + $0x710] sm:$0xff] }
 0x1ad   :  { %2940 = vmatprep.subr.bf16.mxu0 %v6765_v19  ;;  %v6938_v19 = vcombine.low %v642_v4, %v646_v5  ;;  %v6821_v23 = vcombine.high %v523_v16, %v527_v17  ;;  %v6820_v27 = vcombine.low %v523_v16, %v527_v17  ;;  %v324_v17 = vld [vmem:[#allocation17 + $0xd8] sm:$0xff] }
 0x1ae   :  { %2859 = vmatpush1.bf16.msra.mxu1 %v6890_v24  ;;  %v662_v24 = vld [vmem:[#allocation17 + $0xb68] sm:$0xff] }
 0x1af   :  { %2860 = vmatprep.subr.bf16.mxu1 %v6899_v61  ;;  %v535_v61 = vld [vmem:[#allocation17 + $0x770] sm:$0xff]  ;;  %v6955_v28 = vcombine.high %v658_v58, %v662_v24 }
 0x1b0   :  { %2941 = vmatpush1.bf16.msra.mxu0 %v6764_v25  ;;  %v531_v25 = vld [vmem:[#allocation17 + $0x750] sm:$0xff] }
 0x1b1   :  { %2942 = vmatprep.subr.bf16.mxu0 %v6773_v26  ;;  %v6946_v26 = vcombine.low %v650_v14, %v654_v15  ;;  %v6829_v29 = vcombine.high %v531_v25, %v535_v61  ;;  %v6828_v35 = vcombine.low %v531_v25, %v535_v61  ;;  %v332_v61 = vld [vmem:[#allocation17 + $0x118] sm:$0xff] }
 0x1b2   :  { %2861 = vmatpush1.bf16.msra.mxu1 %v6898_v30  ;;  %v670_v30 = vld [vmem:[#allocation17 + $0xba8] sm:$0xff] }
 0x1b3   :  { %2862 = vmatprep.subr.bf16.mxu1 %v6907_v33  ;;  %v543_v33 = vld [vmem:[#allocation17 + $0x7b0] sm:$0xff]  ;;  %v6963_v36 = vcombine.high %v666_v62, %v670_v30 }
 0x1b4   :  { %2943 = vmatpush1.bf16.msra.mxu0 %v6772_v31  ;;  %v539_v31 = vld [vmem:[#allocation17 + $0x790] sm:$0xff] }
 0x1b5   :  { %2944 = vmatprep.subr.bf16.mxu0 %v6781_v34  ;;  %v6954_v34 = vcombine.low %v658_v58, %v662_v24  ;;  %v6837_v37 = vcombine.high %v539_v31, %v543_v33  ;;  %v6836_v44 = vcombine.low %v539_v31, %v543_v33  ;;  %v340_v31 = vld [vmem:[#allocation17 + $0x158] sm:$0xff] }
 0x1b6   :  { %2863 = vmatpush1.bf16.msra.mxu1 %v6906_v38  ;;  %v678_v38 = vld [vmem:[#allocation17 + $0xbe8] sm:$0xff]  ;;  %v344_v33 = vld [vmem:[#allocation17 + $0x178] sm:$0xff] }
 0x1b7   :  { %2864 = vmatprep.subr.bf16.mxu1 %v6915_v40  ;;  %v551_v40 = vld [vmem:[#allocation17 + $0x7f0] sm:$0xff]  ;;  %v6971_v45 = vcombine.high %v674_v2, %v678_v38 }
 0x1b8   :  { %2945 = vmatpush1.bf16.msra.mxu0 %v6780_v39  ;;  %v547_v39 = vld [vmem:[#allocation17 + $0x7d0] sm:$0xff] }
 0x1b9   :  { %2946 = vmatprep.subr.bf16.mxu0 %v6789_v42  ;;  %v6962_v42 = vcombine.low %v666_v62, %v670_v30  ;;  %v6845_v46 = vcombine.high %v547_v39, %v551_v40  ;;  %v6844_v54 = vcombine.low %v547_v39, %v551_v40  ;;  %v348_v39 = vld [vmem:[#allocation17 + $0x198] sm:$0xff] }
 0x1ba   :  { %2865 = vmatpush1.bf16.msra.mxu1 %v6914_v49  ;;  %v304_v49 = vld [vmem:[#allocation17 + $0x38] sm:$0xff] }
 0x1bb   :  { %2866 = vmatprep.subr.bf16.mxu1 %v6923_v52  ;;  %v559_v52 = vld [vmem:[#allocation17 + $0x830] sm:$0xff]  ;;  %v6599_v56 = vcombine.high %v300_v47, %v304_v49  ;;  %v352_v40 = vld [vmem:[#allocation17 + $0x1b8] sm:$0xff] }
 0x1bc   :  { %2947 = vmatpush1.bf16.msra.mxu0 %v6788_v51  ;;  %v555_v51 = vld [vmem:[#allocation17 + $0x810] sm:$0xff] }
 0x1bd   :  { %2948 = vmatprep.subr.bf16.mxu0 %v6797_v53  ;;  %v6970_v53 = vcombine.low %v674_v2, %v678_v38  ;;  %v6853_v57 = vcombine.high %v555_v51, %v559_v52  ;;  %v6852_v4 = vcombine.low %v555_v51, %v559_v52  ;;  %v6639_v2 = vcombine.high %v340_v31, %v344_v33  ;;  %v356_v52 = vld [vmem:[#allocation17 + $0x1d8] sm:$0xff] }
 0x1be   :  { %2867 = vmatpush1.bf16.msra.mxu1 %v6922_v60  ;;  %v312_v60 = vld [vmem:[#allocation17 + $0x78] sm:$0xff] }
 0x1bf   :  { %2868 = vmatprep.subr.bf16.mxu1 %v6931_v1  ;;  %v567_v1 = vld [vmem:[#allocation17 + $0x870] sm:$0xff]  ;;  %v6607_v5 = vcombine.high %v308_v59, %v312_v60 }
 0x1c0   :  { %2949 = vmatpush1.bf16.msra.mxu0 %v6796_v63  ;;  %v563_v63 = vld [vmem:[#allocation17 + $0x850] sm:$0xff] }
 0x1c1   :  { %2950 = vmatprep.subr.bf16.mxu0 %v6805_v3  ;;  %v6598_v3 = vcombine.low %v300_v47, %v304_v49  ;;  %v6861_v6 = vcombine.high %v563_v63, %v567_v1  ;;  %v6860_v14 = vcombine.low %v563_v63, %v567_v1  ;;  %v6647_v47 = vcombine.high %v348_v39, %v352_v40 }
 0x1c2   :  { %2869 = vmatpush1.bf16.msra.mxu1 %v6930_v9  ;;  %v320_v9 = vld [vmem:[#allocation17 + $0xb8] sm:$0xff] }
 0x1c3   :  { %2870 = vmatprep.subr.bf16.mxu1 %v6939_v11  ;;  %v575_v11 = vld [vmem:[#allocation17 + $0x8b0] sm:$0xff]  ;;  %v6615_v15 = vcombine.high %v316_v8, %v320_v9 }
 0x1c4   :  { %2951 = vmatpush1.bf16.msra.mxu0 %v6804_v10  ;;  %v571_v10 = vld [vmem:[#allocation17 + $0x890] sm:$0xff] }
 0x1c5   :  { %2952 = vmatprep.subr.bf16.mxu0 %v6813_v12  ;;  %v6606_v12 = vcombine.low %v308_v59, %v312_v60  ;;  %v6869_v16 = vcombine.high %v571_v10, %v575_v11  ;;  %v6868_v58 = vcombine.low %v571_v10, %v575_v11  ;;  %v6646_v60 = vcombine.low %v348_v39, %v352_v40  ;;  %v651_v39 = vld [vmem:[#allocation17 + $0xb10] sm:$0xff] }
 0x1c6   :  { %2871 = vmatpush1.bf16.msra.mxu1 %v6938_v19  ;;  %v328_v19 = vld [vmem:[#allocation17 + $0xf8] sm:$0xff]  ;;  %v655_v40 = vld [vmem:[#allocation17 + $0xb30] sm:$0xff] }
 0x1c7   :  { %2872 = vmatprep.subr.bf16.mxu1 %v6947_v22  ;;  %v583_v22 = vld [vmem:[#allocation17 + $0x8f0] sm:$0xff]  ;;  %v6623_v24 = vcombine.high %v324_v17, %v328_v19 }
 0x1c8   :  { %2953 = vmatpush1.bf16.msra.mxu0 %v6812_v21  ;;  %v579_v21 = vld [vmem:[#allocation17 + $0x8d0] sm:$0xff] }
 0x1c9   :  { %2954 = vmatprep.subr.bf16.mxu0 %v6821_v23  ;;  %v6614_v23 = vcombine.low %v316_v8, %v320_v9  ;;  %v6877_v25 = vcombine.high %v579_v21, %v583_v22  ;;  %v6876_v62 = vcombine.low %v579_v21, %v583_v22  ;;  %v619_v8 = vld [vmem:[#allocation17 + $0xa10] sm:$0xff] }
 0x1ca   :  { %2873 = vmatpush1.bf16.msra.mxu1 %v6946_v26  ;;  %v336_v26 = vld [vmem:[#allocation17 + $0x138] sm:$0xff]  ;;  %v623_v9 = vld [vmem:[#allocation17 + $0xa30] sm:$0xff] }
 0x1cb   :  { %2874 = vmatprep.subr.bf16.mxu1 %v6955_v28  ;;  %v591_v28 = vld [vmem:[#allocation17 + $0x930] sm:$0xff]  ;;  %v6631_v30 = vcombine.high %v332_v61, %v336_v26  ;;  %v6916_v22 = vcombine.low %v619_v8, %v623_v9 }
 0x1cc   :  { %2955 = vmatpush1.bf16.msra.mxu0 %v6820_v27  ;;  %v587_v27 = vld [vmem:[#allocation17 + $0x910] sm:$0xff] }
 0x1cd   :  { %2956 = vmatprep.subr.bf16.mxu0 %v6829_v29  ;;  %v6622_v29 = vcombine.low %v324_v17, %v328_v19  ;;  %v627_v17 = vld [vmem:[#allocation17 + $0xa50] sm:$0xff] }
 0x1ce   :  { %2875 = vmatpush1.bf16.msra.mxu1 %v6954_v34  ;;  %v595_v34 = vld [vmem:[#allocation17 + $0x950] sm:$0xff] }
 0x1cf   :  { %2876 = vmatprep.subr.bf16.mxu1 %v6963_v36  ;;  %v6630_v36 = vcombine.low %v332_v61, %v336_v26  ;;  %v631_v19 = vld [vmem:[#allocation17 + $0xa70] sm:$0xff] }
 0x1d0   :  { %2957 = vmatpush1.bf16.msra.mxu0 %v6828_v35  ;;  %v599_v35 = vld [vmem:[#allocation17 + $0x970] sm:$0xff] }
 0x1d1   :  { %2958 = vmatprep.subr.bf16.mxu0 %v6837_v37  ;;  %v6884_v37 = vcombine.low %v587_v27, %v591_v28  ;;  %v6893_v38 = vcombine.high %v595_v34, %v599_v35  ;;  %v635_v61 = vld [vmem:[#allocation17 + $0xa90] sm:$0xff] }
 0x1d2   :  { %2877 = vmatpush1.bf16.msra.mxu1 %v6962_v42  ;;  %v603_v42 = vld [vmem:[#allocation17 + $0x990] sm:$0xff] }
 0x1d3   :  { %2878 = vmatprep.subr.bf16.mxu1 %v6971_v45  ;;  %v6638_v45 = vcombine.low %v340_v31, %v344_v33  ;;  %v639_v26 = vld [vmem:[#allocation17 + $0xab0] sm:$0xff] }
 0x1d4   :  { %2959 = vmatpush1.bf16.msra.mxu0 %v6836_v44  ;;  %v607_v44 = vld [vmem:[#allocation17 + $0x9b0] sm:$0xff] }
 0x1d5   :  { %2960 = vmatprep.subr.bf16.mxu0 %v6845_v46  ;;  %v6892_v46 = vcombine.low %v595_v34, %v599_v35  ;;  %v6901_v51 = vcombine.high %v603_v42, %v607_v44  ;;  %v6900_v1 = vcombine.low %v603_v42, %v607_v44  ;;  %v643_v31 = vld [vmem:[#allocation17 + $0xad0] sm:$0xff]  ;;  %v6932_v35 = vcombine.low %v635_v61, %v639_v26 }
 0x1d6   :  { %2879 = vmatpush1.bf16.msra.mxu1 %v6970_v53  ;;  %v360_v53 = vld [vmem:[#allocation17 + $0x1f8] sm:$0xff]  ;;  %v647_v33 = vld [vmem:[#allocation17 + $0xaf0] sm:$0xff] }
 0x1d7   :  { %3012 = vmatprep.subr.bf16.mxu1 %v6599_v56  ;;  %v611_v56 = vld [vmem:[#allocation17 + $0x9d0] sm:$0xff]  ;;  %v6654_v10 = vcombine.low %v356_v52, %v360_v53  ;;  %v6940_v44 = vcombine.low %v643_v31, %v647_v33 }
 0x1d8   :  { %2961 = vmatpush1.bf16.msra.mxu0 %v6844_v54 }
 0x1d9   :  { %2971 = vmatprep.subr.bf16.mxu0 %v6853_v57  ;;  %2881 = vmatmul.mubr.bf16.vlgmr.msra.gmra.mrb[4].mxu1 %v8308_v13  ;;  %v615_v57 = vld [vmem:[#allocation17 + $0x9f0] sm:$0xff] }
 0x1da   :  { %3013 = vmatpush1.bf16.msra.mxu1 %v6598_v3  ;;  %6996 = vmatprep.mubr.msk.bf16.mxu1 %vm8271_vm4, %v8275_v20  ;;  %v6885_v20 = vcombine.high %v587_v27, %v591_v28  ;;  %v6655_v3 = vcombine.high %v356_v52, %v360_v53  ;;  %v6908_v11 = vcombine.low %v611_v56, %v615_v57  ;;  %v659_v52 = vld [vmem:[#allocation17 + $0xb50] sm:$0xff] }
 0x1db   :  { %2963 = vmatmul.mubr.bf16.vlgmr.msra.gmra.mrb[4].mxu0 %v8296_v48  ;;  %3014 = vmatprep.subr.bf16.mxu1 %v6607_v5  ;;  %v364_v5 = vld [vmem:[#allocation17 + $0x218] sm:$0xff]  ;;  %v6924_v28 = vcombine.low %v627_v17, %v631_v19  ;;  %v663_v53 = vld [vmem:[#allocation17 + $0xb70] sm:$0xff] }
 0x1dc   :  { %2972 = vmatpush1.bf16.msra.mxu0 %v6852_v4  ;;  %3003 = vmatprep.mubr.bf16.mxu0 %v8298_v55  ;;  %v6909_v4 = vcombine.high %v611_v56, %v615_v57  ;;  %v6948_v57 = vcombine.low %v651_v39, %v655_v40 }
 0x1dd   :  { %2973 = vmatprep.subr.bf16.mxu0 %v6861_v6  ;;  %v368_v6 = vld [vmem:[#allocation17 + $0x238] sm:$0xff] }
 0x1de   :  { %3015 = vmatpush1.bf16.msra.mxu1 %v6606_v12  ;;  %v6663_v12 = vcombine.high %v364_v5, %v368_v6  ;;  %v6662_v21 = vcombine.low %v364_v5, %v368_v6  ;;  %v6956_v6 = vcombine.low %v659_v52, %v663_v53 }
 0x1df   :  { %3016 = vmatprep.subr.bf16.mxu1 %v6615_v15  ;;  %v372_v15 = vld [vmem:[#allocation17 + $0x258] sm:$0xff] }
 0x1e0   :  { %2974 = vmatpush1.bf16.msra.mxu0 %v6860_v14  ;;  %v6917_v14 = vcombine.high %v619_v8, %v623_v9 }
 0x1e1   :  { %2975 = vmatprep.subr.bf16.mxu0 %v6869_v16  ;;  %v376_v16 = vld [vmem:[#allocation17 + $0x278] sm:$0xff] }
 0x1e2   :  { %3017 = vmatpush1.bf16.msra.mxu1 %v6614_v23  ;;  %v6671_v23 = vcombine.high %v372_v15, %v376_v16  ;;  %v6670_v27 = vcombine.low %v372_v15, %v376_v16 }
 0x1e3   :  { %3018 = vmatprep.subr.bf16.mxu1 %v6623_v24  ;;  %v380_v24 = vld [vmem:[#allocation17 + $0x298] sm:$0xff] }
 0x1e4   :  { %2976 = vmatpush1.bf16.msra.mxu0 %v6868_v58  ;;  %v6925_v58 = vcombine.high %v627_v17, %v631_v19 }
 0x1e5   :  { %2977 = vmatprep.subr.bf16.mxu0 %v6877_v25  ;;  %v384_v25 = vld [vmem:[#allocation17 + $0x2b8] sm:$0xff] }
 0x1e6   :  { %3019 = vmatpush1.bf16.msra.mxu1 %v6622_v29  ;;  %v6679_v29 = vcombine.high %v380_v24, %v384_v25  ;;  %v6678_v34 = vcombine.low %v380_v24, %v384_v25  ;;  %v436_v25 = vld [vmem:[#allocation17 + $0x458] sm:$0xff] }
 0x1e7   :  { %3020 = vmatprep.subr.bf16.mxu1 %v6631_v30  ;;  %v388_v30 = vld [vmem:[#allocation17 + $0x2d8] sm:$0xff] }
 0x1e8   :  { %2978 = vmatpush1.bf16.msra.mxu0 %v6876_v62  ;;  %v6933_v62 = vcombine.high %v635_v61, %v639_v26  ;;  %v440_v61 = vld [vmem:[#allocation17 + $0x478] sm:$0xff] }
 0x1e9   :  { %2979 = vmatprep.subr.bf16.mxu0 %v6885_v20  ;;  %v392_v20 = vld [vmem:[#allocation17 + $0x2f8] sm:$0xff] }
 0x1ea   :  { %3021 = vmatpush1.bf16.msra.mxu1 %v6630_v36  ;;  %v6687_v36 = vcombine.high %v388_v30, %v392_v20  ;;  %v6686_v42 = vcombine.low %v388_v30, %v392_v20  ;;  %v452_v20 = vld [vmem:[#allocation17 + $0x4d8] sm:$0xff] }
 0x1eb   :  { %3022 = vmatprep.subr.bf16.mxu1 %v6639_v2  ;;  %v396_v2 = vld [vmem:[#allocation17 + $0x318] sm:$0xff] }
 0x1ec   :  { %2980 = vmatpush1.bf16.msra.mxu0 %v6884_v37  ;;  %v8330_v49 = vpop.f32.mrb[0].mxu1  ;;  %v6941_v37 = vcombine.high %v643_v31, %v647_v33  ;;  %v456_v31 = vld [vmem:[#allocation17 + $0x4f8] sm:$0xff] }
 0x1ed   :  { %2981 = vmatprep.subr.bf16.mxu0 %v6893_v38  ;;  %v8332_v54 = vpop.f32.mrb[1].mxu1  ;;  %v400_v38 = vld [vmem:[#allocation17 + $0x338] sm:$0xff] }
 0x1ee   :  { %v2681_v59 = vpop.f32.mrb[2].mxu1  ;;  %3023 = vmatpush1.bf16.msra.mxu1 %v6638_v45  ;;  %v6695_v45 = vcombine.high %v396_v2, %v400_v38  ;;  %v6694_v56 = vcombine.low %v396_v2, %v400_v38  ;;  %v472_v2 = vld [vmem:[#allocation17 + $0x578] sm:$0xff]  ;;  %v8339_v38 = vld [vmem:[#allocation19] sm:$0xff] }
 0x1ef   :  { %v2682_v63 = vpop.f32.mrb[3].mxu1  ;;  %3024 = vmatprep.subr.bf16.mxu1 %v6647_v47  ;;  %v404_v47 = vld [vmem:[#allocation17 + $0x358] sm:$0xff] }
 0x1f0   :  { %2982 = vmatpush1.bf16.msra.mxu0 %v6892_v46  ;;  %v6949_v46 = vcombine.high %v651_v39, %v655_v40  ;;  %v412_v63 = vld [vmem:[#allocation17 + $0x398] sm:$0xff]  ;;  %v686_v40 = vrot.slane %v8339_v38, %v8281_v0 }
 0x1f1   :  { %2983 = vmatprep.subr.bf16.mxu0 %v6901_v51  ;;  %v408_v51 = vld [vmem:[#allocation17 + $0x378] sm:$0xff] }
 0x1f2   :  { %3025 = vmatpush1.bf16.msra.mxu1 %v6646_v60  ;;  %v6703_v59 = vcombine.high %v404_v47, %v408_v51  ;;  %v6957_v60 = vcombine.high %v659_v52, %v663_v53  ;;  %v6702_v5 = vcombine.low %v404_v47, %v408_v51  ;;  %v2678_v51 = vadd.f32 %v8330_v49, %v686_v40  ;;  %v484_v52 = vld [vmem:[#allocation17 + $0x5d8] sm:$0xff] }
 0x1f3   :  { %3026 = vmatprep.subr.bf16.mxu1 %v6655_v3  ;;  %v667_v3 = vld [vmem:[#allocation17 + $0xb90] sm:$0xff]  ;;  %v488_v53 = vld [vmem:[#allocation17 + $0x5f8] sm:$0xff] }
 0x1f4   :  { %2984 = vmatpush1.bf16.msra.mxu0 %v6900_v1  ;;  %v416_v1 = vld [vmem:[#allocation17 + $0x3b8] sm:$0xff]  ;;  %v6782_v49 = vcombine.low %v484_v52, %v488_v53 }
 0x1f5   :  { %2985 = vmatprep.subr.bf16.mxu0 %v6909_v4  ;;  %v671_v4 = vld [vmem:[#allocation17 + $0xbb0] sm:$0xff]  ;;  %v6711_v8 = vcombine.high %v412_v63, %v416_v1  ;;  %v6710_v15 = vcombine.low %v412_v63, %v416_v1 }
 0x1f6   :  { %3027 = vmatpush1.bf16.msra.mxu1 %v6654_v10  ;;  %v6965_v9 = vcombine.high %v667_v3, %v671_v4  ;;  %v420_v10 = vld [vmem:[#allocation17 + $0x3d8] sm:$0xff]  ;;  %v6964_v16 = vcombine.low %v667_v3, %v671_v4  ;;  %v6783_v3 = vcombine.high %v484_v52, %v488_v53 }
 0x1f7   :  { %3028 = vmatprep.subr.bf16.mxu1 %v6663_v12  ;;  %v675_v12 = vld [vmem:[#allocation17 + $0xbd0] sm:$0xff]  ;;  %v584_v52 = vld [vmem:[#allocation17 + $0x8f8] sm:$0xff] }
 0x1f8   :  { %2986 = vmatpush1.bf16.msra.mxu0 %v6908_v11  ;;  %v424_v11 = vld [vmem:[#allocation17 + $0x3f8] sm:$0xff] }
 0x1f9   :  { %2987 = vmatprep.subr.bf16.mxu0 %v6917_v14  ;;  %v679_v14 = vld [vmem:[#allocation17 + $0xbf0] sm:$0xff]  ;;  %v6719_v17 = vcombine.high %v420_v10, %v424_v11 }
 0x1fa   :  { %3029 = vmatpush1.bf16.msra.mxu1 %v6662_v21  ;;  %v6973_v19 = vcombine.high %v675_v12, %v679_v14  ;;  %v428_v21 = vld [vmem:[#allocation17 + $0x418] sm:$0xff] }
 0x1fb   :  { %3030 = vmatprep.subr.bf16.mxu1 %v6671_v23  ;;  %v6718_v23 = vcombine.low %v420_v10, %v424_v11  ;;  %v500_v10 = vld [vmem:[#allocation17 + $0x658] sm:$0xff] }
 0x1fc   :  { %2988 = vmatpush1.bf16.msra.mxu0 %v6916_v22  ;;  %v432_v22 = vld [vmem:[#allocation17 + $0x438] sm:$0xff] }
 0x1fd   :  { %2989 = vmatprep.subr.bf16.mxu0 %v6925_v58  ;;  %v6972_v58 = vcombine.low %v675_v12, %v679_v14  ;;  %v6727_v24 = vcombine.high %v428_v21, %v432_v22  ;;  %v6726_v26 = vcombine.low %v428_v21, %v432_v22  ;;  %v508_v14 = vld [vmem:[#allocation17 + $0x698] sm:$0xff] }
 0x1fe   :  { %3031 = vmatpush1.bf16.msra.mxu1 %v6670_v27  ;;  %v6735_v27 = vcombine.high %v436_v25, %v440_v61  ;;  %v520_v21 = vld [vmem:[#allocation17 + $0x6f8] sm:$0xff] }
 0x1ff   :  { %3032 = vmatprep.subr.bf16.mxu1 %v6679_v29  ;;  %v448_v29 = vld [vmem:[#allocation17 + $0x4b8] sm:$0xff] }
 0x200   :  { %2990 = vmatpush1.bf16.msra.mxu0 %v6924_v28  ;;  %v444_v28 = vld [vmem:[#allocation17 + $0x498] sm:$0xff] }
 0x201   :  { %2991 = vmatprep.subr.bf16.mxu0 %v6933_v62  ;;  %v6734_v62 = vcombine.low %v436_v25, %v440_v61  ;;  %v6743_v30 = vcombine.high %v444_v28, %v448_v29  ;;  %v6742_v33 = vcombine.low %v444_v28, %v448_v29 }
 0x202   :  { %3033 = vmatpush1.bf16.msra.mxu1 %v6678_v34  ;;  %v6751_v34 = vcombine.high %v452_v20, %v456_v31 }
 0x203   :  { %3034 = vmatprep.subr.bf16.mxu1 %v6687_v36  ;;  %v464_v36 = vld [vmem:[#allocation17 + $0x538] sm:$0xff] }
 0x204   :  { %2992 = vmatpush1.bf16.msra.mxu0 %v6932_v35  ;;  %v460_v35 = vld [vmem:[#allocation17 + $0x518] sm:$0xff] }
 0x205   :  { %2993 = vmatprep.subr.bf16.mxu0 %v6941_v37  ;;  %v6750_v37 = vcombine.low %v452_v20, %v456_v31  ;;  %v6759_v18 = vcombine.high %v460_v35, %v464_v36  ;;  %v6758_v39 = vcombine.low %v460_v35, %v464_v36 }
 0x206   :  { %3035 = vmatpush1.bf16.msra.mxu1 %v6686_v42  ;;  %v476_v42 = vld [vmem:[#allocation17 + $0x598] sm:$0xff] }
 0x207   :  { %3036 = vmatprep.subr.bf16.mxu1 %v6695_v45  ;;  %v690_v45 = vrot.slane %v8339_v38, %v8242_v50 }
 0x208   :  { %2994 = vmatpush1.bf16.msra.mxu0 %v6940_v44  ;;  %v480_v44 = vld [vmem:[#allocation17 + $0x5b8] sm:$0xff] }
 0x209   :  { %2995 = vmatprep.subr.bf16.mxu0 %v6949_v46  ;;  %v6775_v47 = vcombine.high %v476_v42, %v480_v44  ;;  %v6774_v63 = vcombine.low %v476_v42, %v480_v44  ;;  %v572_v44 = vld [vmem:[#allocation17 + $0x898] sm:$0xff] }
 0x20a   :  { %3037 = vmatpush1.bf16.msra.mxu1 %v6694_v56  ;;  %v2680_v56 = vadd.f32 %v8332_v54, %v690_v45  ;;  %v504_v54 = vld [vmem:[#allocation17 + $0x678] sm:$0xff] }
 0x20b   :  { %3038 = vmatprep.subr.bf16.mxu1 %v6703_v59  ;;  %v6799_v12 = vcombine.high %v500_v10, %v504_v54  ;;  %v576_v45 = vld [vmem:[#allocation17 + $0x8b8] sm:$0xff] }
 0x20c   :  { %2996 = vmatpush1.bf16.msra.mxu0 %v6948_v57  ;;  %v6870_v53 = vcombine.low %v572_v44, %v576_v45 }
 0x20d   :  { %2997 = vmatprep.subr.bf16.mxu0 %v6957_v60 }
 0x20e   :  { %3039 = vmatpush1.bf16.msra.mxu1 %v6702_v5  ;;  %v492_v5 = vld [vmem:[#allocation17 + $0x618] sm:$0xff] }
 0x20f   :  { %3040 = vmatprep.subr.bf16.mxu1 %v6711_v8 }
 0x210   :  { %2998 = vmatpush1.bf16.msra.mxu0 %v6956_v6  ;;  %v496_v6 = vld [vmem:[#allocation17 + $0x638] sm:$0xff] }
 0x211   :  { %2999 = vmatprep.subr.bf16.mxu0 %v6965_v9  ;;  %v6791_v9 = vcombine.high %v492_v5, %v496_v6  ;;  %v6790_v11 = vcombine.low %v492_v5, %v496_v6  ;;  %v604_v6 = vld [vmem:[#allocation17 + $0x998] sm:$0xff] }
 0x212   :  { %3041 = vmatpush1.bf16.msra.mxu1 %v6710_v15  ;;  %v512_v15 = vld [vmem:[#allocation17 + $0x6b8] sm:$0xff] }
 0x213   :  { %3042 = vmatprep.subr.bf16.mxu1 %v6719_v17  ;;  %v6807_v17 = vcombine.high %v508_v14, %v512_v15  ;;  %v6806_v22 = vcombine.low %v508_v14, %v512_v15  ;;  %v620_v14 = vld [vmem:[#allocation17 + $0xa18] sm:$0xff] }
 0x214   :  { %3000 = vmatpush1.bf16.msra.mxu0 %v6964_v16  ;;  %v6798_v16 = vcombine.low %v500_v10, %v504_v54  ;;  %v612_v10 = vld [vmem:[#allocation17 + $0x9d8] sm:$0xff] }
 0x215   :  { %3001 = vmatprep.subr.bf16.mxu0 %v6973_v19  ;;  %v516_v19 = vld [vmem:[#allocation17 + $0x6d8] sm:$0xff] }
 0x216   :  { %3043 = vmatpush1.bf16.msra.mxu1 %v6718_v23  ;;  %v6815_v23 = vcombine.high %v516_v19, %v520_v21  ;;  %v6814_v25 = vcombine.low %v516_v19, %v520_v21  ;;  %v616_v54 = vld [vmem:[#allocation17 + $0x9f8] sm:$0xff] }
 0x217   :  { %3053 = vmatprep.subr.bf16.mxu1 %v6727_v24  ;;  %v528_v24 = vld [vmem:[#allocation17 + $0x738] sm:$0xff] }
 0x218   :  { %3002 = vmatpush1.bf16.msra.mxu0 %v6972_v58  ;;  %v524_v58 = vld [vmem:[#allocation17 + $0x718] sm:$0xff] }
 0x219   :  { %6999 = vmatmul.mubr.msk.bf16.vlgmr.msra.gmra.mrb[8].mxu1 %vm8271_vm4, %v8294_v43  ;;  %v468_v43 = vld [vmem:[#allocation17 + $0x558] sm:$0xff]  ;;  %v6823_v61 = vcombine.high %v524_v58, %v528_v24  ;;  %v6822_v28 = vcombine.low %v524_v58, %v528_v24 }
 0x21a   :  { %3054 = vmatpush1.bf16.msra.mxu1 %v6726_v26  ;;  %3085 = vmatprep.mubr.bf16.mxu1 %v8263_v7  ;;  %v6767_v7 = vcombine.high %v468_v43, %v472_v2  ;;  %v6766_v46 = vcombine.low %v468_v43, %v472_v2  ;;  %v532_v26 = vld [vmem:[#allocation17 + $0x758] sm:$0xff] }
 0x21b   :  { %3004 = vmatmul.mubr.bf16.vlgmr.msra.gmra.mrb[4].mxu0 %v8308_v13  ;;  %3055 = vmatprep.subr.bf16.mxu1 %v6735_v27  ;;  %v536_v27 = vld [vmem:[#allocation17 + $0x778] sm:$0xff] }
 0x21c   :  { %v6831_v29 = vcombine.high %v532_v26, %v536_v27  ;;  %v6830_v20 = vcombine.low %v532_v26, %v536_v27  ;;  %v624_v15 = vld [vmem:[#allocation17 + $0xa38] sm:$0xff] }
 0x21d   :  { %v628_v19 = vld [vmem:[#allocation17 + $0xa58] sm:$0xff] }
 0x21e   :  { %3056 = vmatpush1.bf16.msra.mxu1 %v6734_v62  ;;  %v540_v62 = vld [vmem:[#allocation17 + $0x798] sm:$0xff] }
 0x21f   :  { %3057 = vmatprep.subr.bf16.mxu1 %v6743_v30  ;;  %v544_v30 = vld [vmem:[#allocation17 + $0x7b8] sm:$0xff] }
 0x220   :  { %v6839_v31 = vcombine.high %v540_v62, %v544_v30  ;;  %v6838_v35 = vcombine.low %v540_v62, %v544_v30  ;;  %v632_v21 = vld [vmem:[#allocation17 + $0xa78] sm:$0xff] }
 0x221   :  { %v636_v58 = vld [vmem:[#allocation17 + $0xa98] sm:$0xff] }
 0x222   :  { %3058 = vmatpush1.bf16.msra.mxu1 %v6742_v33  ;;  %v548_v33 = vld [vmem:[#allocation17 + $0x7d8] sm:$0xff] }
 0x223   :  { %3059 = vmatprep.subr.bf16.mxu1 %v6751_v34  ;;  %v552_v34 = vld [vmem:[#allocation17 + $0x7f8] sm:$0xff] }
 0x224   :  { %v6847_v36 = vcombine.high %v548_v33, %v552_v34  ;;  %v6846_v43 = vcombine.low %v548_v33, %v552_v34  ;;  %v640_v24 = vld [vmem:[#allocation17 + $0xab8] sm:$0xff] }
 0x225   :  { %v644_v26 = vld [vmem:[#allocation17 + $0xad8] sm:$0xff] }
 0x226   :  { %3060 = vmatpush1.bf16.msra.mxu1 %v6750_v37  ;;  %v556_v37 = vld [vmem:[#allocation17 + $0x818] sm:$0xff] }
 0x227   :  { %3061 = vmatprep.subr.bf16.mxu1 %v6759_v18  ;;  %v560_v18 = vld [vmem:[#allocation17 + $0x838] sm:$0xff] }
 0x228   :  { %v6855_v2 = vcombine.high %v556_v37, %v560_v18  ;;  %v6854_v40 = vcombine.low %v556_v37, %v560_v18  ;;  %v648_v27 = vld [vmem:[#allocation17 + $0xaf8] sm:$0xff] }
 0x229   :  { %v652_v62 = vld [vmem:[#allocation17 + $0xb18] sm:$0xff]  ;;  %v6942_v37 = vcombine.low %v644_v26, %v648_v27 }
 0x22a   :  { %3062 = vmatpush1.bf16.msra.mxu1 %v6758_v39  ;;  %v564_v39 = vld [vmem:[#allocation17 + $0x858] sm:$0xff] }
 0x22b   :  { %3063 = vmatprep.subr.bf16.mxu1 %v6767_v7  ;;  %v568_v7 = vld [vmem:[#allocation17 + $0x878] sm:$0xff] }
 0x22c   :  { %v6863_v42 = vcombine.high %v564_v39, %v568_v7  ;;  %v656_v30 = vld [vmem:[#allocation17 + $0xb38] sm:$0xff] }
 0x22e   :  { %v2759_v57 = vpop.f32.mrb[0].mxu0  ;;  %3064 = vmatpush1.bf16.msra.mxu1 %v6766_v46  ;;  %v6862_v46 = vcombine.low %v564_v39, %v568_v7  ;;  %v3213_v39 = vld [vmem:[#allocation20 + $0xa0] sm:$0xff]  ;;  %v660_v7 = vld [vmem:[#allocation17 + $0xb58] sm:$0xff] }
 0x22f   :  { %v8347_v59 = vadd.f32 %v2759_v57, %v2678_v51  ;;  %v2761_v60 = vpop.f32.mrb[1].mxu0  ;;  %3065 = vmatprep.subr.bf16.mxu1 %v6775_v47  ;;  %v6871_v47 = vcombine.high %v572_v44, %v576_v45  ;;  %v580_v51 = vld [vmem:[#allocation17 + $0x8d8] sm:$0xff]  ;;  %v6950_v45 = vcombine.low %v652_v62, %v656_v30 }
 0x230   :  { %v8349_v1 = vadd.f32 %v2761_v60, %v2680_v56  ;;  %v2763_v4 = vpop.f32.mrb[2].mxu0  ;;  %v6879_v56 = vcombine.high %v580_v51, %v584_v52  ;;  %v588_v57 = vld [vmem:[#allocation17 + $0x918] sm:$0xff] }
 0x231   :  { %v2764_v8 = vpop.f32.mrb[3].mxu0  ;;  %v592_v60 = vld [vmem:[#allocation17 + $0x938] sm:$0xff] }
 0x232   :  { %3066 = vmatpush1.bf16.msra.mxu1 %v6774_v63  ;;  %v6878_v63 = vcombine.low %v580_v51, %v584_v52  ;;  %v596_v4 = vld [vmem:[#allocation17 + $0x958] sm:$0xff]  ;;  %v6886_v5 = vcombine.low %v588_v57, %v592_v60 }
 0x233   :  { %3067 = vmatprep.subr.bf16.mxu1 %v6783_v3  ;;  %v6887_v3 = vcombine.high %v588_v57, %v592_v60  ;;  %v608_v8 = vld [vmem:[#allocation17 + $0x9b8] sm:$0xff] }
 0x234   :  { %v668_v52 = vld [vmem:[#allocation17 + $0xb98] sm:$0xff] }
 0x236   :  { %3068 = vmatpush1.bf16.msra.mxu1 %v6782_v49 }
 0x237   :  { %3069 = vmatprep.subr.bf16.mxu1 %v6791_v9  ;;  %v6903_v9 = vcombine.high %v604_v6, %v608_v8 }
 0x23a   :  { %3070 = vmatpush1.bf16.msra.mxu1 %v6790_v11  ;;  %v6902_v11 = vcombine.low %v604_v6, %v608_v8 }
 0x23b   :  { %3071 = vmatprep.subr.bf16.mxu1 %v6799_v12  ;;  %v6911_v12 = vcombine.high %v612_v10, %v616_v54 }
 0x23e   :  { %3072 = vmatpush1.bf16.msra.mxu1 %v6798_v16  ;;  %v6910_v16 = vcombine.low %v612_v10, %v616_v54  ;;  %v3194_v54 = vld [vmem:[#allocation20 + $0x8] sm:$0xff] }
 0x23f   :  { %3073 = vmatprep.subr.bf16.mxu1 %v6807_v17  ;;  %v6919_v17 = vcombine.high %v620_v14, %v624_v15 }
 0x242   :  { %3074 = vmatpush1.bf16.msra.mxu1 %v6806_v22  ;;  %v6918_v22 = vcombine.low %v620_v14, %v624_v15 }
 0x243   :  { %3075 = vmatprep.subr.bf16.mxu1 %v6815_v23  ;;  %v6927_v23 = vcombine.high %v628_v19, %v632_v21 }
 0x246   :  { %3076 = vmatpush1.bf16.msra.mxu1 %v6814_v25  ;;  %v6926_v25 = vcombine.low %v628_v19, %v632_v21  ;;  %v3202_v21 = vld [vmem:[#allocation20 + $0x48] sm:$0xff] }
 0x247   :  { %3077 = vmatprep.subr.bf16.mxu1 %v6823_v61  ;;  %v6935_v61 = vcombine.high %v636_v58, %v640_v24 }
 0x24a   :  { %3078 = vmatpush1.bf16.msra.mxu1 %v6822_v28  ;;  %v6934_v28 = vcombine.low %v636_v58, %v640_v24 }
 0x24b   :  { %3079 = vmatprep.subr.bf16.mxu1 %v6831_v29  ;;  %v6943_v29 = vcombine.high %v644_v26, %v648_v27  ;;  %v3210_v27 = vld [vmem:[#allocation20 + $0x88] sm:$0xff] }
 0x24e   :  { %3080 = vmatpush1.bf16.msra.mxu1 %v6830_v20  ;;  %v3193_v20 = vld [vmem:[#allocation20] sm:$0xff] }
 0x24f   :  { %3081 = vmatprep.subr.bf16.mxu1 %v6839_v31  ;;  %v3197_v31 = vld [vmem:[#allocation20 + $0x20] sm:$0xff] }
 0x250   :  { %v7006_v33 = vcombine.low %v3193_v20, %v3197_v31  ;;  %v7007_v34 = vcombine.high %v3193_v20, %v3197_v31  ;;  %v3218_v31 = vld [vmem:[#allocation20 + $0xc8] sm:$0xff] }
 0x252   :  { %3082 = vmatpush1.bf16.msra.mxu1 %v6838_v35  ;;  %v3201_v35 = vld [vmem:[#allocation20 + $0x40] sm:$0xff]  ;;  %4771 = vmatprep.subr.bf16.mxu0 %v7007_v34 }
 0x253   :  { %3083 = vmatprep.subr.bf16.mxu1 %v6847_v36  ;;  %v3205_v36 = vld [vmem:[#allocation20 + $0x60] sm:$0xff]  ;;  %4772 = vmatpush1.bf16.msra.mxu0 %v7006_v33  ;;  %v3222_v33 = vld [vmem:[#allocation20 + $0xe8] sm:$0xff] }
 0x254   :  { %v7015_v18 = vcombine.high %v3201_v35, %v3205_v36 }
 0x256   :  { %3084 = vmatpush1.bf16.msra.mxu1 %v6846_v43  ;;  %v3209_v43 = vld [vmem:[#allocation20 + $0x80] sm:$0xff]  ;;  %4773 = vmatprep.subr.bf16.mxu0 %v7015_v18  ;;  %v3230_v18 = vld [vmem:[#allocation20 + $0x128] sm:$0xff] }
 0x257   :  { %3094 = vmatprep.subr.bf16.mxu1 %v6855_v2  ;;  %v6951_v2 = vcombine.high %v652_v62, %v656_v30  ;;  %v7023_v44 = vcombine.high %v3209_v43, %v3213_v39 }
 0x259   :  { %3086 = vmatmul.mubr.bf16.vlgmr.msra.gmra.mrb[8].mxu1 %v8296_v48  ;;  %v600_v48 = vld [vmem:[#allocation17 + $0x978] sm:$0xff] }
 0x25a   :  { %3095 = vmatpush1.bf16.msra.mxu1 %v6854_v40  ;;  %3126 = vmatprep.mubr.bf16.mxu1 %v8298_v55  ;;  %v6895_v55 = vcombine.high %v596_v4, %v600_v48  ;;  %v6894_v49 = vcombine.low %v596_v4, %v600_v48  ;;  %v664_v40 = vld [vmem:[#allocation17 + $0xb78] sm:$0xff] }
 0x25b   :  { %3096 = vmatprep.subr.bf16.mxu1 %v6863_v42  ;;  %v7014_v42 = vcombine.low %v3201_v35, %v3205_v36  ;;  %v6959_v51 = vcombine.high %v660_v7, %v664_v40  ;;  %v6958_v60 = vcombine.low %v660_v7, %v664_v40  ;;  %v676_v48 = vld [vmem:[#allocation17 + $0xbd8] sm:$0xff]  ;;  %v7033_v36 = vcombine.high %v3218_v31, %v3222_v33 }
 0x25d   :  { %4774 = vmatpush1.bf16.msra.mxu0 %v7014_v42  ;;  %v3242_v42 = vld [vmem:[#allocation20 + $0x188] sm:$0xff] }
 0x25e   :  { %3097 = vmatpush1.bf16.msra.mxu1 %v6862_v46  ;;  %v3217_v46 = vld [vmem:[#allocation20 + $0xc0] sm:$0xff]  ;;  %4775 = vmatprep.subr.bf16.mxu0 %v7023_v44  ;;  %v3246_v44 = vld [vmem:[#allocation20 + $0x1a8] sm:$0xff] }
 0x25f   :  { %3098 = vmatprep.subr.bf16.mxu1 %v6871_v47  ;;  %v3221_v47 = vld [vmem:[#allocation20 + $0xe0] sm:$0xff] }
 0x260   :  { %v7031_v57 = vcombine.high %v3217_v46, %v3221_v47 }
 0x262   :  { %3099 = vmatpush1.bf16.msra.mxu1 %v6870_v53  ;;  %v672_v53 = vld [vmem:[#allocation17 + $0xbb8] sm:$0xff] }
 0x263   :  { %3100 = vmatprep.subr.bf16.mxu1 %v6879_v56  ;;  %v7022_v56 = vcombine.low %v3209_v43, %v3213_v39  ;;  %v6967_v4 = vcombine.high %v668_v52, %v672_v53  ;;  %v6966_v8 = vcombine.low %v668_v52, %v672_v53  ;;  %v3238_v39 = vld [vmem:[#allocation20 + $0x168] sm:$0xff] }
 0x264   :  { %v3254_v52 = vld [vmem:[#allocation20 + $0x1e8] sm:$0xff] }
 0x265   :  { %4776 = vmatpush1.bf16.msra.mxu0 %v7022_v56 }
 0x266   :  { %3101 = vmatpush1.bf16.msra.mxu1 %v6878_v63  ;;  %v3225_v63 = vld [vmem:[#allocation20 + $0x100] sm:$0xff]  ;;  %4777 = vmatprep.subr.bf16.mxu0 %v7031_v57  ;;  %v7056_v57 = vcombine.low %v3242_v42, %v3246_v44 }
 0x267   :  { %3102 = vmatprep.subr.bf16.mxu1 %v6887_v3  ;;  %v3229_v3 = vld [vmem:[#allocation20 + $0x120] sm:$0xff] }
 0x268   :  { %v7039_v6 = vcombine.high %v3225_v63, %v3229_v3 }
 0x26a   :  { %3103 = vmatpush1.bf16.msra.mxu1 %v6886_v5  ;;  %v680_v5 = vld [vmem:[#allocation17 + $0xbf8] sm:$0xff] }
 0x26b   :  { %3104 = vmatprep.subr.bf16.mxu1 %v6895_v55  ;;  %v7030_v55 = vcombine.low %v3217_v46, %v3221_v47  ;;  %v6975_v10 = vcombine.high %v676_v48, %v680_v5  ;;  %v6974_v15 = vcombine.low %v676_v48, %v680_v5  ;;  %v7057_v46 = vcombine.high %v3242_v42, %v3246_v44  ;;  %v3274_v42 = vld [vmem:[#allocation20 + $0x288] sm:$0xff] }
 0x26c   :  { %v8358_v48 = vsub.s32 3, %v8233_v41 }
 0x26d   :  { %4778 = vmatpush1.bf16.msra.mxu0 %v7030_v55 }
 0x26e   :  { %3105 = vmatpush1.bf16.msra.mxu1 %v6894_v49  ;;  %v3233_v49 = vld [vmem:[#allocation20 + $0x140] sm:$0xff]  ;;  %4779 = vmatprep.subr.bf16.mxu0 %v7039_v6  ;;  %v698_v55 = vrot.slane %v8339_v38, %v8358_v48 }
 0x26f   :  { %3106 = vmatprep.subr.bf16.mxu1 %v6903_v9  ;;  %v3237_v9 = vld [vmem:[#allocation20 + $0x160] sm:$0xff] }
 0x270   :  { %v7047_v14 = vcombine.high %v3233_v49, %v3237_v9 }
 0x272   :  { %3107 = vmatpush1.bf16.msra.mxu1 %v6902_v11  ;;  %v3198_v11 = vld [vmem:[#allocation20 + $0x28] sm:$0xff] }
 0x273   :  { %3108 = vmatprep.subr.bf16.mxu1 %v6911_v12  ;;  %v7038_v12 = vcombine.low %v3225_v63, %v3229_v3  ;;  %v7009_v19 = vcombine.high %v3194_v54, %v3198_v11  ;;  %v7008_v24 = vcombine.low %v3194_v54, %v3198_v11 }
 0x275   :  { %4780 = vmatpush1.bf16.msra.mxu0 %v7038_v12 }
 0x276   :  { %3109 = vmatpush1.bf16.msra.mxu1 %v6910_v16  ;;  %v3241_v16 = vld [vmem:[#allocation20 + $0x180] sm:$0xff]  ;;  %4781 = vmatprep.subr.bf16.mxu0 %v7047_v14 }
 0x277   :  { %3110 = vmatprep.subr.bf16.mxu1 %v6919_v17  ;;  %v3245_v17 = vld [vmem:[#allocation20 + $0x1a0] sm:$0xff] }
 0x278   :  { %v7055_v58 = vcombine.high %v3241_v16, %v3245_v17 }
 0x27a   :  { %3111 = vmatpush1.bf16.msra.mxu1 %v6918_v22  ;;  %v3206_v22 = vld [vmem:[#allocation20 + $0x68] sm:$0xff] }
 0x27b   :  { %3112 = vmatprep.subr.bf16.mxu1 %v6927_v23  ;;  %v7046_v23 = vcombine.low %v3233_v49, %v3237_v9  ;;  %v7017_v26 = vcombine.high %v3202_v21, %v3206_v22  ;;  %v7016_v30 = vcombine.low %v3202_v21, %v3206_v22  ;;  %v7001_v9 = vmul.f32 -1.442695, %v8349_v1 }
 0x27d   :  { %4782 = vmatpush1.bf16.msra.mxu0 %v7046_v23 }
 0x27e   :  { %3113 = vmatpush1.bf16.msra.mxu1 %v6926_v25  ;;  %v3249_v25 = vld [vmem:[#allocation20 + $0x1c0] sm:$0xff]  ;;  %4783 = vmatprep.subr.bf16.mxu0 %v7055_v58 }
 0x27f   :  { %3114 = vmatprep.subr.bf16.mxu1 %v6935_v61  ;;  %v3253_v61 = vld [vmem:[#allocation20 + $0x1e0] sm:$0xff] }
 0x280   :  { %v7063_v62 = vcombine.high %v3249_v25, %v3253_v61  ;;  %v7062_v34 = vcombine.low %v3249_v25, %v3253_v61  ;;  %v3257_v58 = vld [vmem:[#allocation20 + $0x200] sm:$0xff]  ;;  %v3258_v25 = vld [vmem:[#allocation20 + $0x208] sm:$0xff] }
 0x282   :  { %3115 = vmatpush1.bf16.msra.mxu1 %v6934_v28  ;;  %v3214_v28 = vld [vmem:[#allocation20 + $0xa8] sm:$0xff] }
 0x283   :  { %3116 = vmatprep.subr.bf16.mxu1 %v6943_v29  ;;  %v7054_v29 = vcombine.low %v3241_v16, %v3245_v17  ;;  %v7025_v20 = vcombine.high %v3210_v27, %v3214_v28  ;;  %v7024_v35 = vcombine.low %v3210_v27, %v3214_v28  ;;  %v8370_v17 = vsub.s32 5, %v8233_v41  ;;  %v3262_v27 = vld [vmem:[#allocation20 + $0x228] sm:$0xff] }
 0x285   :  { %4784 = vmatpush1.bf16.msra.mxu0 %v7054_v29  ;;  %v706_v23 = vrot.slane %v8339_v38, %v8370_v17 }
 0x286   :  { %3117 = vmatpush1.bf16.msra.mxu1 %v6942_v37  ;;  %4785 = vmatprep.subr.bf16.mxu0 %v7063_v62  ;;  %v3226_v37 = vld [vmem:[#allocation20 + $0x108] sm:$0xff] }
 0x287   :  { %3118 = vmatprep.subr.bf16.mxu1 %v6951_v2  ;;  %v7041_v43 = vcombine.high %v3226_v37, %v3230_v18  ;;  %v3234_v2 = vld [vmem:[#allocation20 + $0x148] sm:$0xff]  ;;  %v7040_v7 = vcombine.low %v3226_v37, %v3230_v18 }
 0x288   :  { %v7049_v40 = vcombine.high %v3234_v2, %v3238_v39  ;;  %v3266_v37 = vld [vmem:[#allocation20 + $0x248] sm:$0xff] }
 0x289   :  { %4786 = vmatpush1.bf16.msra.mxu0 %v7062_v34 }
 0x28a   :  { %3119 = vmatpush1.bf16.msra.mxu1 %v6950_v45  ;;  %v7048_v45 = vcombine.low %v3234_v2, %v3238_v39 }
 0x28b   :  { %3120 = vmatprep.subr.bf16.mxu1 %v6959_v51  ;;  %v3250_v51 = vld [vmem:[#allocation20 + $0x1c8] sm:$0xff] }
 0x28c   :  { %v7065_v63 = vcombine.high %v3250_v51, %v3254_v52  ;;  %v7064_v3 = vcombine.low %v3250_v51, %v3254_v52 }
 0x28e   :  { %3121 = vmatpush1.bf16.msra.mxu1 %v6958_v60 }
 0x28f   :  { %3122 = vmatprep.subr.bf16.mxu1 %v6967_v4  ;;  %v8355_v4 = vsub.s32 2, %v8233_v41 }
 0x291   :  { %v694_v5 = vrot.slane %v8339_v38, %v8355_v4 }
 0x292   :  { %3123 = vmatpush1.bf16.msra.mxu1 %v6966_v8  ;;  %v7000_v8 = vmul.f32 -1.442695, %v8347_v59 }
 0x293   :  { %3124 = vmatprep.subr.bf16.mxu1 %v6975_v10 }
 0x294   :  { %7522 = vpow2.f32 %v7000_v8  ;;  %v3286_v8 = vld [vmem:[#allocation20 + $0x2e8] sm:$0xff] }
 0x295   :  { %7524 = vpow2.f32 %v7001_v9 }
 0x296   :  { %3125 = vmatpush1.bf16.msra.mxu1 %v6974_v15  ;;  %v8367_v15 = vsub.s32 4, %v8233_v41 }
 0x297   :  { %4853 = vmatprep.subr.bf16.mxu1 %v7009_v19 }
 0x298   :  { %v702_v1 = vrot.slane %v8339_v38, %v8367_v15 }
 0x299   :  { %3127 = vmatmul.mubr.bf16.vlgmr.msra.gmra.mrb[8].mxu1 %v8308_v13  ;;  %v7032_v13 = vcombine.low %v3218_v31, %v3222_v33 }
 0x29a   :  { %4854 = vmatpush1.bf16.msra.mxu1 %v7008_v24  ;;  %v3261_v24 = vld [vmem:[#allocation20 + $0x220] sm:$0xff] }
 0x29b   :  { %4855 = vmatprep.subr.bf16.mxu1 %v7017_v26  ;;  %v7071_v26 = vcombine.high %v3257_v58, %v3261_v24  ;;  %v7070_v62 = vcombine.low %v3257_v58, %v3261_v24  ;;  %v3294_v58 = vld [vmem:[#allocation20 + $0x328] sm:$0xff] }
 0x29d   :  { %4787 = vmatprep.subr.bf16.mxu0 %v7071_v26 }
 0x29e   :  { %4856 = vmatpush1.bf16.msra.mxu1 %v7016_v30  ;;  %v7523_v11 = vpop.eup %7522  ;;  %v7072_v30 = vcombine.low %v3258_v25, %v3262_v27  ;;  %4788 = vmatpush1.bf16.msra.mxu0 %v7070_v62 }
 0x29f   :  { %4857 = vmatprep.subr.bf16.mxu1 %v7025_v20  ;;  %v7525_v12 = vpop.eup %7524  ;;  %v3141_v16 = vadd.f32 1.0, %v7523_v11  ;;  %v7073_v20 = vcombine.high %v3258_v25, %v3262_v27  ;;  %v3297_v27 = vld [vmem:[#allocation20 + $0x340] sm:$0xff] }
 0x2a0   :  { %v3142_v19 = vadd.f32 1.0, %v7525_v12 }
 0x2a2   :  { %4858 = vmatpush1.bf16.msra.mxu1 %v7024_v35  ;;  %v3265_v35 = vld [vmem:[#allocation20 + $0x240] sm:$0xff] }
 0x2a3   :  { %4859 = vmatprep.subr.bf16.mxu1 %v7033_v36  ;;  %v3269_v36 = vld [vmem:[#allocation20 + $0x260] sm:$0xff] }
 0x2a4   :  { %v7079_v18 = vcombine.high %v3265_v35, %v3269_v36 }
 0x2a6   :  { %4860 = vmatpush1.bf16.msra.mxu1 %v7032_v13  ;;  %v3270_v13 = vld [vmem:[#allocation20 + $0x268] sm:$0xff]  ;;  %4789 = vmatprep.subr.bf16.mxu0 %v7079_v18 }
 0x2a7   :  { %4861 = vmatprep.subr.bf16.mxu1 %v7041_v43  ;;  %v7078_v43 = vcombine.low %v3265_v35, %v3269_v36  ;;  %v7080_v2 = vcombine.low %v3266_v37, %v3270_v13  ;;  %v7081_v39 = vcombine.high %v3266_v37, %v3270_v13  ;;  %v3306_v37 = vld [vmem:[#allocation20 + $0x388] sm:$0xff] }
 0x2a8   :  { %v3310_v18 = vld [vmem:[#allocation20 + $0x3a8] sm:$0xff] }
 0x2a9   :  { %4790 = vmatpush1.bf16.msra.mxu0 %v7078_v43  ;;  %v7121_v13 = vcombine.high %v3306_v37, %v3310_v18  ;;  %v3313_v43 = vld [vmem:[#allocation20 + $0x3c0] sm:$0xff] }
 0x2aa   :  { %4862 = vmatpush1.bf16.msra.mxu1 %v7040_v7  ;;  %v3273_v7 = vld [vmem:[#allocation20 + $0x280] sm:$0xff] }
 0x2ab   :  { %4863 = vmatprep.subr.bf16.mxu1 %v7049_v40  ;;  %v3277_v40 = vld [vmem:[#allocation20 + $0x2a0] sm:$0xff] }
 0x2ac   :  { %v2882_v47 = vpop.f32.mrb[4].mxu1  ;;  %v7086_v51 = vcombine.low %v3273_v7, %v3277_v40 }
 0x2ad   :  { %v2884_v53 = vpop.f32.mrb[5].mxu1  ;;  %v7340_v6 = vadd.f32 %v2882_v47, %v694_v5 }
 0x2ae   :  { %v2886_v56 = vpop.f32.mrb[6].mxu1  ;;  %4864 = vmatpush1.bf16.msra.mxu1 %v7048_v45  ;;  %v7341_v49 = vadd.f32 %v2884_v53, %v698_v55  ;;  %v7087_v45 = vcombine.high %v3273_v7, %v3277_v40  ;;  %v290_v55 = vld [vmem:[#allocation16 + $0x8] sm:$0xff]  ;;  %v3318_v7 = vld [vmem:[#allocation20 + $0x3e8] sm:$0xff] }
 0x2af   :  { %v2887_v60 = vpop.f32.mrb[7].mxu1  ;;  %4865 = vmatprep.subr.bf16.mxu1 %v7057_v46  ;;  %v7002_v10 = vmul.f32 -1.442695, %v7340_v6  ;;  %v3278_v46 = vld [vmem:[#allocation20 + $0x2a8] sm:$0xff] }
 0x2b0   :  { %v7003_v54 = vmul.f32 -1.442695, %v7341_v49  ;;  %v7088_v52 = vcombine.low %v3274_v42, %v3278_v46  ;;  %v7089_v53 = vcombine.high %v3274_v42, %v3278_v46  ;;  %4791 = vmatprep.subr.bf16.mxu0 %v7087_v45  ;;  %v3281_v60 = vld [vmem:[#allocation20 + $0x2c0] sm:$0xff]  ;;  %v7120_v42 = vcombine.low %v3306_v37, %v3310_v18 }
 0x2b1   :  { %7526 = vpow2.f32 %v7002_v10  ;;  %4792 = vmatpush1.bf16.msra.mxu0 %v7086_v51  ;;  %v3321_v51 = vld [vmem:[#allocation20 + $0x400] sm:$0xff] }
 0x2b2   :  { %4866 = vmatpush1.bf16.msra.mxu1 %v7056_v57  ;;  %7528 = vpow2.f32 %v7003_v54  ;;  %v289_v57 = vld [vmem:[#allocation16] sm:$0xff] }
 0x2b3   :  { %4867 = vmatprep.subr.bf16.mxu1 %v7065_v63  ;;  %7530 = vrcp.f32 %v3141_v16  ;;  %v3285_v63 = vld [vmem:[#allocation20 + $0x2e0] sm:$0xff] }
 0x2b4   :  { %7532 = vrcp.f32 %v3142_v19  ;;  %v7095_v6 = vcombine.high %v3281_v60, %v3285_v63  ;;  %v7094_v9 = vcombine.low %v3281_v60, %v3285_v63  ;;  %v3289_v19 = vld [vmem:[#allocation20 + $0x300] sm:$0xff] }
 0x2b6   :  { %4868 = vmatpush1.bf16.msra.mxu1 %v7064_v3  ;;  %v3282_v3 = vld [vmem:[#allocation20 + $0x2c8] sm:$0xff]  ;;  %4793 = vmatprep.subr.bf16.mxu0 %v7095_v6 }
 0x2b7   :  { %4869 = vmatprep.subr.bf16.mxu1 %v7073_v20  ;;  %v7096_v10 = vcombine.low %v3282_v3, %v3286_v8  ;;  %v7097_v54 = vcombine.high %v3282_v3, %v3286_v8  ;;  %4794 = vmatpush1.bf16.msra.mxu0 %v7094_v9  ;;  %v3302_v20 = vld [vmem:[#allocation20 + $0x368] sm:$0xff] }
 0x2ba   :  { %4870 = vmatpush1.bf16.msra.mxu1 %v7072_v30 }
 0x2bb   :  { %v7527_v14 = vpop.eup %7526  ;;  %4871 = vmatprep.subr.bf16.mxu1 %v7081_v39  ;;  %v3314_v39 = vld [vmem:[#allocation20 + $0x3c8] sm:$0xff] }
 0x2bc   :  { %v7529_v59 = vpop.eup %7528  ;;  %v3153_v21 = vadd.f32 1.0, %v7527_v14  ;;  %v7129_v45 = vcombine.high %v3314_v39, %v3318_v7 }
 0x2bd   :  { %v3154_v22 = vadd.f32 1.0, %v7529_v59  ;;  %v7531_v44 = vpop.eup %7530 }
 0x2be   :  { %7534 = vrcp.f32 %v3153_v21  ;;  %4872 = vmatpush1.bf16.msra.mxu1 %v7080_v2  ;;  %v7533_v47 = vpop.eup %7532  ;;  %v3293_v21 = vld [vmem:[#allocation20 + $0x320] sm:$0xff] }
 0x2bf   :  { %7536 = vrcp.f32 %v3154_v22  ;;  %4873 = vmatprep.subr.bf16.mxu1 %v7089_v53  ;;  %v7102_v25 = vcombine.low %v3289_v19, %v3293_v21  ;;  %v3317_v2 = vld [vmem:[#allocation20 + $0x3e0] sm:$0xff]  ;;  %v3322_v53 = vld [vmem:[#allocation20 + $0x408] sm:$0xff] }
 0x2c0   :  { %v7126_v46 = vcombine.low %v3313_v43, %v3317_v2 }
 0x2c2   :  { %4874 = vmatpush1.bf16.msra.mxu1 %v7088_v52  ;;  %v3325_v52 = vld [vmem:[#allocation20 + $0x420] sm:$0xff] }
 0x2c3   :  { %4875 = vmatprep.subr.bf16.mxu1 %v7097_v54  ;;  %v7134_v60 = vcombine.low %v3321_v51, %v3325_v52 }
 0x2c6   :  { %4876 = vmatpush1.bf16.msra.mxu1 %v7096_v10 }
 0x2c8   :  { %v7535_v56 = vpop.eup %7534 }
 0x2c9   :  { %v7537_v5 = vpop.eup %7536  ;;  %v3173_v12 = vmul.f32 %v7535_v56, %v289_v57  ;;  %v7135_v56 = vcombine.high %v3321_v51, %v3325_v52  ;;  %v3326_v57 = vld [vmem:[#allocation20 + $0x428] sm:$0xff]  ;;  %v3353_v51 = vld [vmem:[#allocation20 + $0x500] sm:$0xff] }
 0x2ca   :  { %v3174_v16 = vmul.f32 %v7537_v5, %v290_v55  ;;  %v7136_v63 = vcombine.low %v3322_v53, %v3326_v57  ;;  %v7137_v3 = vcombine.high %v3322_v53, %v3326_v57  ;;  %v8383_v5 = vsub.s32 6, %v8233_v41  ;;  %v3357_v52 = vld [vmem:[#allocation20 + $0x520] sm:$0xff]  ;;  %v3354_v53 = vld [vmem:[#allocation20 + $0x508] sm:$0xff] }
 0x2cb   :  { %v8386_v55 = vsub.s32 7, %v8233_v41 }
 0x2cc   :  { %v710_v6 = vrot.slane %v8339_v38, %v8383_v5 }
 0x2cd   :  { %v714_v8 = vrot.slane %v8339_v38, %v8386_v55 }
 0x2ee   :  { %v3005_v61 = vpop.f32.mrb[4].mxu0 }
 0x2ef   :  { %v7342_v28 = vadd.f32 %v3005_v61, %v702_v1  ;;  %v3007_v29 = vpop.f32.mrb[5].mxu0  ;;  %v3290_v1 = vld [vmem:[#allocation20 + $0x308] sm:$0xff] }
 0x2f0   :  { %v7343_v31 = vadd.f32 %v3007_v29, %v706_v23  ;;  %v3009_v33 = vpop.f32.mrb[6].mxu0  ;;  %v7103_v23 = vcombine.high %v3289_v19, %v3293_v21  ;;  %v7104_v61 = vcombine.low %v3290_v1, %v3294_v58  ;;  %v7105_v26 = vcombine.high %v3290_v1, %v3294_v58  ;;  %v3298_v29 = vld [vmem:[#allocation20 + $0x348] sm:$0xff] }
 0x2f1   :  { %7538 = vtanh.f32 %v7342_v28  ;;  %v3010_v34 = vpop.f32.mrb[7].mxu0  ;;  %v3301_v28 = vld [vmem:[#allocation20 + $0x360] sm:$0xff]  ;;  %v7113_v35 = vcombine.high %v3298_v29, %v3302_v20 }
 0x2f2   :  { %7540 = vtanh.f32 %v7343_v31  ;;  %4795 = vmatprep.subr.bf16.mxu0 %v7103_v23  ;;  %4877 = vmatprep.subr.bf16.mxu1 %v7105_v26  ;;  %v7110_v62 = vcombine.low %v3297_v27, %v3301_v28  ;;  %v7111_v30 = vcombine.high %v3297_v27, %v3301_v28  ;;  %v3305_v31 = vld [vmem:[#allocation20 + $0x380] sm:$0xff]  ;;  %v7112_v34 = vcombine.low %v3298_v29, %v3302_v20  ;;  %v3330_v29 = vld [vmem:[#allocation20 + $0x448] sm:$0xff] }
 0x2f3   :  { %4796 = vmatpush1.bf16.msra.mxu0 %v7102_v25  ;;  %v3309_v33 = vld [vmem:[#allocation20 + $0x3a0] sm:$0xff]  ;;  %4878 = vmatpush1.bf16.msra.mxu1 %v7104_v61 }
 0x2f4   :  { %v7119_v36 = vcombine.high %v3305_v31, %v3309_v33  ;;  %4797 = vmatprep.subr.bf16.mxu0 %v7111_v30  ;;  %4879 = vmatprep.subr.bf16.mxu1 %v7113_v35  ;;  %v7118_v40 = vcombine.low %v3305_v31, %v3309_v33  ;;  %v3329_v26 = vld [vmem:[#allocation20 + $0x440] sm:$0xff]  ;;  %v3185_v30 = vld [vmem:[#allocation14 + $0x18] sm:$0xff]  ;;  %v3338_v35 = vld [vmem:[#allocation20 + $0x488] sm:$0xff] }
 0x2f5   :  { %v3333_v28 = vld [vmem:[#allocation20 + $0x460] sm:$0xff]  ;;  %v8400_v37 = vpack.c.bf16 %v3185_v30, %v3185_v30 }
 0x2f6   :  { %v3337_v33 = vld [vmem:[#allocation20 + $0x480] sm:$0xff]  ;;  %v7142_v18 = vcombine.low %v3329_v26, %v3333_v28 }
 0x2f7   :  { %4798 = vmatpush1.bf16.msra.mxu0 %v7110_v62  ;;  %4880 = vmatpush1.bf16.msra.mxu1 %v7112_v34  ;;  %v3334_v62 = vld [vmem:[#allocation20 + $0x468] sm:$0xff]  ;;  %v3341_v34 = vld [vmem:[#allocation20 + $0x4a0] sm:$0xff] }
 0x2f8   :  { %4799 = vmatprep.subr.bf16.mxu0 %v7119_v36  ;;  %4881 = vmatprep.subr.bf16.mxu1 %v7121_v13  ;;  %v7145_v31 = vcombine.high %v3330_v29, %v3334_v62  ;;  %v3342_v36 = vld [vmem:[#allocation20 + $0x4a8] sm:$0xff]  ;;  %v7144_v13 = vcombine.low %v3330_v29, %v3334_v62  ;;  %v3385_v30 = vld [vmem:[#allocation20 + $0x600] sm:$0xff] }
 0x2fb   :  { %v7539_v49 = vpop.eup %7538  ;;  %4800 = vmatpush1.bf16.msra.mxu0 %v7118_v40  ;;  %4882 = vmatpush1.bf16.msra.mxu1 %v7120_v42  ;;  %v3346_v40 = vld [vmem:[#allocation20 + $0x4c8] sm:$0xff] }
 0x2fc   :  { %v7541_v11 = vpop.eup %7540  ;;  %v3175_v14 = vmul.f32 %v7539_v49, %v7531_v44  ;;  %v7127_v44 = vcombine.high %v3313_v43, %v3317_v2  ;;  %4883 = vmatprep.subr.bf16.mxu1 %v7129_v45  ;;  %v7151_v43 = vcombine.high %v3337_v33, %v3341_v34  ;;  %v7153_v2 = vcombine.high %v3338_v35, %v3342_v36  ;;  %v3350_v42 = vld [vmem:[#allocation20 + $0x4e8] sm:$0xff] }
 0x2fd   :  { %v3176_v59 = vmul.f32 %v7541_v11, %v7533_v47  ;;  %v7128_v47 = vcombine.low %v3314_v39, %v3318_v7  ;;  %v3345_v39 = vld [vmem:[#allocation20 + $0x4c0] sm:$0xff]  ;;  %v7152_v45 = vcombine.low %v3338_v35, %v3342_v36 }
 0x2fe   :  { %v8376_v22 = vadd.f32 %v3175_v14, %v3173_v12  ;;  %4801 = vmatprep.subr.bf16.mxu0 %v7127_v44  ;;  %v3349_v7 = vld [vmem:[#allocation20 + $0x4e0] sm:$0xff]  ;;  %v7150_v44 = vcombine.low %v3337_v33, %v3341_v34  ;;  %v3390_v33 = vld [vmem:[#allocation20 + $0x628] sm:$0xff] }
 0x2ff   :  { %v8378_v24 = vadd.f32 %v3176_v59, %v3174_v16  ;;  %4802 = vmatpush1.bf16.msra.mxu0 %v7126_v46  ;;  %4884 = vmatpush1.bf16.msra.mxu1 %v7128_v47  ;;  %v7159_v46 = vcombine.high %v3345_v39, %v3349_v7  ;;  %v7161_v47 = vcombine.high %v3346_v40, %v3350_v42 }
 0x300   :  { %5152 = vst [vmem:[#allocation29] sm:$0xff] %v8376_v22  ;;  %4812 = vmatprep.subr.bf16.mxu0 %v7135_v56  ;;  %4894 = vmatprep.subr.bf16.mxu1 %v7137_v3  ;;  %v3358_v56 = vld [vmem:[#allocation20 + $0x528] sm:$0xff]  ;;  %v7158_v57 = vcombine.low %v3345_v39, %v3349_v7 }
 0x301   :  { %5153 = vst [vmem:[#allocation29 + $0x8] sm:$0xff] %v8378_v24  ;;  %v7169_v3 = vcombine.high %v3354_v53, %v3358_v56  ;;  %v3398_v39 = vld [vmem:[#allocation20 + $0x668] sm:$0xff] }
 0x36c   :  { %v3128_v49 = vpop.f32.mrb[8].mxu1 }
 0x36d   :  { %v7344_v9 = vadd.f32 %v3128_v49, %v710_v6  ;;  %v3130_v10 = vpop.f32.mrb[9].mxu1  ;;  %v3361_v6 = vld [vmem:[#allocation20 + $0x540] sm:$0xff]  ;;  %v3362_v49 = vld [vmem:[#allocation20 + $0x548] sm:$0xff] }
 0x36e   :  { %v7345_v54 = vadd.f32 %v3130_v10, %v714_v8  ;;  %v3132_v11 = vpop.f32.mrb[10].mxu1  ;;  %v3365_v8 = vld [vmem:[#allocation20 + $0x560] sm:$0xff]  ;;  %v7166_v10 = vcombine.low %v3353_v51, %v3357_v52 }
 0x36f   :  { %v7004_v12 = vmul.f32 -1.442695, %v7344_v9  ;;  %v3133_v14 = vpop.f32.mrb[11].mxu1  ;;  %v3366_v9 = vld [vmem:[#allocation20 + $0x568] sm:$0xff]  ;;  %v7175_v11 = vcombine.high %v3361_v6, %v3365_v8 }
 0x370   :  { %v7005_v16 = vmul.f32 -1.442695, %v7345_v54  ;;  %v7168_v54 = vcombine.low %v3354_v53, %v3358_v56  ;;  %v3369_v14 = vld [vmem:[#allocation20 + $0x580] sm:$0xff] }
 0x371   :  { %7542 = vpow2.f32 %v7004_v12  ;;  %v7177_v12 = vcombine.high %v3362_v49, %v3366_v9 }
 0x372   :  { %7544 = vpow2.f32 %v7005_v16  ;;  %v3373_v16 = vld [vmem:[#allocation20 + $0x5a0] sm:$0xff] }
 0x373   :  { %7546 = vtanh.f32 %v8376_v22 }
 0x374   :  { %7548 = vtanh.f32 %v8378_v24  ;;  %v7143_v24 = vcombine.high %v3329_v26, %v3333_v28  ;;  %v3382_v26 = vld [vmem:[#allocation20 + $0x5e8] sm:$0xff] }
 0x37b   :  { %v7543_v59 = vpop.eup %7542 }
 0x37c   :  { %v7545_v19 = vpop.eup %7544  ;;  %v3167_v21 = vadd.f32 1.0, %v7543_v59  ;;  %v3370_v59 = vld [vmem:[#allocation20 + $0x588] sm:$0xff] }
 0x37d   :  { %v3168_v1 = vadd.f32 1.0, %v7545_v19  ;;  %v7547_v38 = vpop.eup %7546  ;;  %v3374_v19 = vld [vmem:[#allocation20 + $0x5a8] sm:$0xff] }
 0x37e   :  { %7550 = vrcp.f32 %v3167_v21  ;;  %v7549_v23 = vpop.eup %7548  ;;  %v7174_v21 = vcombine.low %v3361_v6, %v3365_v8  ;;  %v7184_v28 = vcombine.low %v3370_v59, %v3374_v19  ;;  %v3414_v6 = vld [vmem:[#allocation20 + $0x6e8] sm:$0xff] }
 0x37f   :  { %7552 = vrcp.f32 %v3168_v1  ;;  %v7176_v1 = vcombine.low %v3362_v49, %v3366_v9 }
 0x388   :  { %v7551_v58 = vpop.eup %7550 }
 0x389   :  { %v7553_v25 = vpop.eup %7552  ;;  %v3181_v61 = vmul.f32 %v7551_v58, %v7547_v38  ;;  %v7183_v38 = vcombine.high %v3369_v14, %v3373_v16  ;;  %v3377_v58 = vld [vmem:[#allocation20 + $0x5c0] sm:$0xff] }
 0x38a   :  { %v3182_v27 = vmul.f32 %v7553_v25, %v7549_v23  ;;  %v7185_v23 = vcombine.high %v3370_v59, %v3374_v19  ;;  %v3381_v25 = vld [vmem:[#allocation20 + $0x5e0] sm:$0xff] }
 0x38b   :  { %5147 = vst [vmem:[#allocation27] sm:$0xff] %v3181_v61  ;;  %v8396_v22 = vpack.c.bf16 %v3181_v61, %v3181_v61  ;;  %v3378_v61 = vld [vmem:[#allocation20 + $0x5c8] sm:$0xff]  ;;  %v7191_v29 = vcombine.high %v3377_v58, %v3381_v25  ;;  %v7190_v34 = vcombine.low %v3377_v58, %v3381_v25 }
 0x38c   :  { %v8394_v20 = vpack.c.bf16 %v3182_v27, %v3182_v27  ;;  %5148 = vst [vmem:[#allocation27 + $0x8] sm:$0xff] %v3182_v27  ;;  %v7182_v27 = vcombine.low %v3369_v14, %v3373_v16  ;;  %v7193_v62 = vcombine.high %v3378_v61, %v3382_v26  ;;  %v7192_v35 = vcombine.low %v3378_v61, %v3382_v26  ;;  %v3422_v14 = vld [vmem:[#allocation20 + $0x728] sm:$0xff] }
 0x38d   :  { %v3430_v58 = vld [vmem:[#allocation20 + $0x768] sm:$0xff] }
 0x38e   :  { %4803 = vmatprep.mubr.bf16.mxu0 %v8394_v20  ;;  %4885 = vmatprep.mubr.bf16.mxu1 %v8394_v20 }
 0x38f   :  { %4804 = vmatmul.mubr.bf16.vlgmr.msra.gmra.mrb[8].mxu0 %v8396_v22  ;;  %4886 = vmatmul.mubr.bf16.vlgmr.msra.gmra.mrb[12].mxu1 %v8396_v22 }
 0x390   :  { %4813 = vmatpush1.bf16.msra.mxu0 %v7134_v60  ;;  %4895 = vmatpush1.bf16.msra.mxu1 %v7136_v63  ;;  %v7160_v60 = vcombine.low %v3346_v40, %v3350_v42  ;;  %v7167_v63 = vcombine.high %v3353_v51, %v3357_v52  ;;  %v3406_v51 = vld [vmem:[#allocation20 + $0x6a8] sm:$0xff] }
 0x391   :  { %4814 = vmatprep.subr.bf16.mxu0 %v7143_v24  ;;  %4896 = vmatprep.subr.bf16.mxu1 %v7145_v31  ;;  %v3389_v24 = vld [vmem:[#allocation20 + $0x620] sm:$0xff]  ;;  %v3386_v31 = vld [vmem:[#allocation20 + $0x608] sm:$0xff] }
 0x392   :  { %4844 = vmatprep.mubr.bf16.mxu0 %v8400_v37  ;;  %4926 = vmatprep.mubr.bf16.mxu1 %v8400_v37  ;;  %v7199_v36 = vcombine.high %v3385_v30, %v3389_v24  ;;  %v7198_v7 = vcombine.low %v3385_v30, %v3389_v24  ;;  %v7200_v40 = vcombine.low %v3386_v31, %v3390_v33  ;;  %v3438_v30 = vld [vmem:[#allocation20 + $0x7a8] sm:$0xff] }
 0x394   :  { %4815 = vmatpush1.bf16.msra.mxu0 %v7142_v18  ;;  %4897 = vmatpush1.bf16.msra.mxu1 %v7144_v13  ;;  %v7201_v18 = vcombine.high %v3386_v31, %v3390_v33  ;;  %v3393_v13 = vld [vmem:[#allocation20 + $0x640] sm:$0xff] }
 0x395   :  { %4816 = vmatprep.subr.bf16.mxu0 %v7151_v43  ;;  %4898 = vmatprep.subr.bf16.mxu1 %v7153_v2  ;;  %v3397_v43 = vld [vmem:[#allocation20 + $0x660] sm:$0xff]  ;;  %v3394_v2 = vld [vmem:[#allocation20 + $0x648] sm:$0xff] }
 0x396   :  { %v7207_v42 = vcombine.high %v3393_v13, %v3397_v43  ;;  %v7206_v52 = vcombine.low %v3393_v13, %v3397_v43  ;;  %v7208_v53 = vcombine.low %v3394_v2, %v3398_v39  ;;  %v3446_v13 = vld [vmem:[#allocation20 + $0x7e8] sm:$0xff] }
 0x398   :  { %4817 = vmatpush1.bf16.msra.mxu0 %v7150_v44  ;;  %4899 = vmatpush1.bf16.msra.mxu1 %v7152_v45  ;;  %v7209_v44 = vcombine.high %v3394_v2, %v3398_v39  ;;  %v3401_v45 = vld [vmem:[#allocation20 + $0x680] sm:$0xff] }
 0x399   :  { %4818 = vmatprep.subr.bf16.mxu0 %v7159_v46  ;;  %4900 = vmatprep.subr.bf16.mxu1 %v7161_v47  ;;  %v3405_v46 = vld [vmem:[#allocation20 + $0x6a0] sm:$0xff]  ;;  %v3402_v47 = vld [vmem:[#allocation20 + $0x688] sm:$0xff] }
 0x39a   :  { %v7215_v56 = vcombine.high %v3401_v45, %v3405_v46  ;;  %v7214_v8 = vcombine.low %v3401_v45, %v3405_v46  ;;  %v7216_v49 = vcombine.low %v3402_v47, %v3406_v51  ;;  %v3200_v45 = vld [vmem:[#allocation20 + $0x38] sm:$0xff] }
 0x39c   :  { %4819 = vmatpush1.bf16.msra.mxu0 %v7158_v57  ;;  %4901 = vmatpush1.bf16.msra.mxu1 %v7160_v60  ;;  %v7217_v57 = vcombine.high %v3402_v47, %v3406_v51  ;;  %v3409_v60 = vld [vmem:[#allocation20 + $0x6c0] sm:$0xff]  ;;  %v3184_v51 = vld [vmem:[#allocation14 + $0x10] sm:$0xff] }
 0x39d   :  { %4820 = vmatprep.subr.bf16.mxu0 %v7167_v63  ;;  %4902 = vmatprep.subr.bf16.mxu1 %v7169_v3  ;;  %v3413_v63 = vld [vmem:[#allocation20 + $0x6e0] sm:$0xff]  ;;  %v3410_v3 = vld [vmem:[#allocation20 + $0x6c8] sm:$0xff] }
 0x39e   :  { %v7223_v9 = vcombine.high %v3409_v60, %v3413_v63  ;;  %v7222_v16 = vcombine.low %v3409_v60, %v3413_v63  ;;  %v7224_v59 = vcombine.low %v3410_v3, %v3414_v6  ;;  %v3207_v60 = vld [vmem:[#allocation20 + $0x70] sm:$0xff]  ;;  %v3204_v63 = vld [vmem:[#allocation20 + $0x58] sm:$0xff] }
 0x3a0   :  { %4821 = vmatpush1.bf16.msra.mxu0 %v7166_v10  ;;  %4903 = vmatpush1.bf16.msra.mxu1 %v7168_v54  ;;  %v7225_v10 = vcombine.high %v3410_v3, %v3414_v6  ;;  %v3417_v54 = vld [vmem:[#allocation20 + $0x700] sm:$0xff]  ;;  %v3208_v3 = vld [vmem:[#allocation20 + $0x78] sm:$0xff] }
 0x3a1   :  { %4822 = vmatprep.subr.bf16.mxu0 %v7175_v11  ;;  %4904 = vmatprep.subr.bf16.mxu1 %v7177_v12  ;;  %v3421_v11 = vld [vmem:[#allocation20 + $0x720] sm:$0xff]  ;;  %v3418_v12 = vld [vmem:[#allocation20 + $0x708] sm:$0xff] }
 0x3a2   :  { %v7231_v19 = vcombine.high %v3417_v54, %v3421_v11  ;;  %v7230_v25 = vcombine.low %v3417_v54, %v3421_v11  ;;  %v7232_v61 = vcombine.low %v3418_v12, %v3422_v14  ;;  %v3215_v54 = vld [vmem:[#allocation20 + $0xb0] sm:$0xff]  ;;  %v3212_v11 = vld [vmem:[#allocation20 + $0x98] sm:$0xff] }
 0x3a4   :  { %4823 = vmatpush1.bf16.msra.mxu0 %v7174_v21  ;;  %4905 = vmatpush1.bf16.msra.mxu1 %v7176_v1  ;;  %v7233_v21 = vcombine.high %v3418_v12, %v3422_v14  ;;  %v3425_v1 = vld [vmem:[#allocation20 + $0x740] sm:$0xff]  ;;  %v3216_v12 = vld [vmem:[#allocation20 + $0xb8] sm:$0xff] }
 0x3a5   :  { %4824 = vmatprep.subr.bf16.mxu0 %v7183_v38  ;;  %4906 = vmatprep.subr.bf16.mxu1 %v7185_v23  ;;  %v3429_v38 = vld [vmem:[#allocation20 + $0x760] sm:$0xff]  ;;  %v3426_v23 = vld [vmem:[#allocation20 + $0x748] sm:$0xff] }
 0x3a6   :  { %v7239_v26 = vcombine.high %v3425_v1, %v3429_v38  ;;  %v7238_v24 = vcombine.low %v3425_v1, %v3429_v38  ;;  %v7240_v31 = vcombine.low %v3426_v23, %v3430_v58  ;;  %v3223_v1 = vld [vmem:[#allocation20 + $0xf0] sm:$0xff]  ;;  %v3220_v38 = vld [vmem:[#allocation20 + $0xd8] sm:$0xff] }
 0x3a8   :  { %4825 = vmatpush1.bf16.msra.mxu0 %v7182_v27  ;;  %4907 = vmatpush1.bf16.msra.mxu1 %v7184_v28  ;;  %v7241_v27 = vcombine.high %v3426_v23, %v3430_v58  ;;  %v3433_v28 = vld [vmem:[#allocation20 + $0x780] sm:$0xff]  ;;  %v3224_v23 = vld [vmem:[#allocation20 + $0xf8] sm:$0xff] }
 0x3a9   :  { %4826 = vmatprep.subr.bf16.mxu0 %v7191_v29  ;;  %4908 = vmatprep.subr.bf16.mxu1 %v7193_v62  ;;  %v3437_v29 = vld [vmem:[#allocation20 + $0x7a0] sm:$0xff]  ;;  %v3434_v62 = vld [vmem:[#allocation20 + $0x788] sm:$0xff] }
 0x3aa   :  { %v7247_v33 = vcombine.high %v3433_v28, %v3437_v29  ;;  %v7246_v43 = vcombine.low %v3433_v28, %v3437_v29  ;;  %v7248_v2 = vcombine.low %v3434_v62, %v3438_v30  ;;  %v3231_v28 = vld [vmem:[#allocation20 + $0x130] sm:$0xff]  ;;  %v3232_v29 = vld [vmem:[#allocation20 + $0x138] sm:$0xff] }
 0x3ac   :  { %4827 = vmatpush1.bf16.msra.mxu0 %v7190_v34  ;;  %4909 = vmatpush1.bf16.msra.mxu1 %v7192_v35  ;;  %v7249_v34 = vcombine.high %v3434_v62, %v3438_v30  ;;  %v3441_v35 = vld [vmem:[#allocation20 + $0x7c0] sm:$0xff]  ;;  %v7036_v30 = vcombine.low %v3220_v38, %v3224_v23 }
 0x3ad   :  { %4828 = vmatprep.subr.bf16.mxu0 %v7199_v36  ;;  %4910 = vmatprep.subr.bf16.mxu1 %v7201_v18  ;;  %v3445_v36 = vld [vmem:[#allocation20 + $0x7e0] sm:$0xff]  ;;  %v3442_v18 = vld [vmem:[#allocation20 + $0x7c8] sm:$0xff] }
 0x3ae   :  { %v7255_v39 = vcombine.high %v3441_v35, %v3445_v36  ;;  %v7254_v46 = vcombine.low %v3441_v35, %v3445_v36  ;;  %v7256_v47 = vcombine.low %v3442_v18, %v3446_v13  ;;  %v3236_v35 = vld [vmem:[#allocation20 + $0x158] sm:$0xff] }
 0x3af   :  { %v3240_v36 = vld [vmem:[#allocation20 + $0x178] sm:$0xff] }
 0x3b0   :  { %4829 = vmatpush1.bf16.msra.mxu0 %v7198_v7  ;;  %4911 = vmatpush1.bf16.msra.mxu1 %v7200_v40  ;;  %v7257_v7 = vcombine.high %v3442_v18, %v3446_v13  ;;  %v3195_v40 = vld [vmem:[#allocation20 + $0x10] sm:$0xff] }
 0x3b1   :  { %4830 = vmatprep.subr.bf16.mxu0 %v7207_v42  ;;  %4912 = vmatprep.subr.bf16.mxu1 %v7209_v44  ;;  %v3199_v42 = vld [vmem:[#allocation20 + $0x30] sm:$0xff]  ;;  %v3196_v44 = vld [vmem:[#allocation20 + $0x18] sm:$0xff] }
 0x3b2   :  { %v7010_v6 = vcombine.low %v3195_v40, %v3199_v42 }
 0x3b4   :  { %4831 = vmatpush1.bf16.msra.mxu0 %v7206_v52  ;;  %4913 = vmatpush1.bf16.msra.mxu1 %v7208_v53  ;;  %v7011_v52 = vcombine.high %v3195_v40, %v3199_v42  ;;  %v7013_v53 = vcombine.high %v3196_v44, %v3200_v45  ;;  %v3244_v40 = vld [vmem:[#allocation20 + $0x198] sm:$0xff] }
 0x3b5   :  { %4832 = vmatprep.subr.bf16.mxu0 %v7215_v56  ;;  %4914 = vmatprep.subr.bf16.mxu1 %v7217_v57  ;;  %v3203_v56 = vld [vmem:[#allocation20 + $0x50] sm:$0xff]  ;;  %v8406_v57 = vpack.c.bf16 %v3184_v51, %v3184_v51  ;;  %v3248_v42 = vld [vmem:[#allocation20 + $0x1b8] sm:$0xff] }
 0x3b6   :  { %v7018_v14 = vcombine.low %v3203_v56, %v3207_v60  ;;  %v3251_v51 = vld [vmem:[#allocation20 + $0x1d0] sm:$0xff] }
 0x3b8   :  { %4833 = vmatpush1.bf16.msra.mxu0 %v7214_v8  ;;  %4915 = vmatpush1.bf16.msra.mxu1 %v7216_v49  ;;  %v7012_v8 = vcombine.low %v3196_v44, %v3200_v45  ;;  %v7019_v49 = vcombine.high %v3203_v56, %v3207_v60  ;;  %v7052_v45 = vcombine.low %v3236_v35, %v3240_v36  ;;  %v3256_v56 = vld [vmem:[#allocation20 + $0x1f8] sm:$0xff] }
 0x3b9   :  { %4834 = vmatprep.subr.bf16.mxu0 %v7223_v9  ;;  %4916 = vmatprep.subr.bf16.mxu1 %v7225_v10  ;;  %v7021_v9 = vcombine.high %v3204_v63, %v3208_v3  ;;  %v3211_v10 = vld [vmem:[#allocation20 + $0x90] sm:$0xff] }
 0x3ba   :  { %v7026_v58 = vcombine.low %v3211_v10, %v3215_v54 }
 0x3bc   :  { %4835 = vmatpush1.bf16.msra.mxu0 %v7222_v16  ;;  %4917 = vmatpush1.bf16.msra.mxu1 %v7224_v59  ;;  %v7020_v16 = vcombine.low %v3204_v63, %v3208_v3  ;;  %v7027_v59 = vcombine.high %v3211_v10, %v3215_v54  ;;  %v7060_v63 = vcombine.low %v3244_v40, %v3248_v42  ;;  %v3264_v10 = vld [vmem:[#allocation20 + $0x238] sm:$0xff] }
 0x3bd   :  { %4836 = vmatprep.subr.bf16.mxu0 %v7231_v19  ;;  %4918 = vmatprep.subr.bf16.mxu1 %v7233_v21  ;;  %v7029_v19 = vcombine.high %v3212_v11, %v3216_v12  ;;  %v3219_v21 = vld [vmem:[#allocation20 + $0xd0] sm:$0xff] }
 0x3be   :  { %v7034_v62 = vcombine.low %v3219_v21, %v3223_v1 }
 0x3c0   :  { %4837 = vmatpush1.bf16.msra.mxu0 %v7230_v25  ;;  %4919 = vmatpush1.bf16.msra.mxu1 %v7232_v61  ;;  %v7028_v25 = vcombine.low %v3212_v11, %v3216_v12  ;;  %v7035_v61 = vcombine.high %v3219_v21, %v3223_v1  ;;  %v3272_v21 = vld [vmem:[#allocation20 + $0x278] sm:$0xff] }
 0x3c1   :  { %4838 = vmatprep.subr.bf16.mxu0 %v7239_v26  ;;  %4920 = vmatprep.subr.bf16.mxu1 %v7241_v27  ;;  %v7037_v26 = vcombine.high %v3220_v38, %v3224_v23  ;;  %v3227_v27 = vld [vmem:[#allocation20 + $0x110] sm:$0xff] }
 0x3c2   :  { %v7042_v18 = vcombine.low %v3227_v27, %v3231_v28 }
 0x3c4   :  { %4839 = vmatpush1.bf16.msra.mxu0 %v7238_v24  ;;  %4921 = vmatpush1.bf16.msra.mxu1 %v7240_v31  ;;  %v7043_v24 = vcombine.high %v3227_v27, %v3231_v28  ;;  %v3280_v27 = vld [vmem:[#allocation20 + $0x2b8] sm:$0xff] }
 0x3c5   :  { %4840 = vmatprep.subr.bf16.mxu0 %v7247_v33  ;;  %4922 = vmatprep.subr.bf16.mxu1 %v7249_v34  ;;  %v3235_v33 = vld [vmem:[#allocation20 + $0x150] sm:$0xff] }
 0x3c6   :  { %v3239_v34 = vld [vmem:[#allocation20 + $0x170] sm:$0xff] }
 0x3c7   :  { %v7050_v44 = vcombine.low %v3235_v33, %v3239_v34 }
 0x3c8   :  { %4841 = vmatpush1.bf16.msra.mxu0 %v7246_v43  ;;  %4923 = vmatpush1.bf16.msra.mxu1 %v7248_v2  ;;  %v7051_v43 = vcombine.high %v3235_v33, %v3239_v34  ;;  %v7053_v2 = vcombine.high %v3236_v35, %v3240_v36  ;;  %v3288_v33 = vld [vmem:[#allocation20 + $0x2f8] sm:$0xff] }
 0x3c9   :  { %4842 = vmatprep.subr.bf16.mxu0 %v7255_v39  ;;  %4924 = vmatprep.subr.bf16.mxu1 %v7257_v7  ;;  %v3243_v39 = vld [vmem:[#allocation20 + $0x190] sm:$0xff] }
 0x3ca   :  { %v3247_v7 = vld [vmem:[#allocation20 + $0x1b0] sm:$0xff] }
 0x3cb   :  { %v7058_v60 = vcombine.low %v3243_v39, %v3247_v7 }
 0x3cc   :  { %4843 = vmatpush1.bf16.msra.mxu0 %v7254_v46  ;;  %4925 = vmatpush1.bf16.msra.mxu1 %v7256_v47  ;;  %v7059_v46 = vcombine.high %v3243_v39, %v3247_v7  ;;  %v7061_v47 = vcombine.high %v3244_v40, %v3248_v42  ;;  %v3296_v39 = vld [vmem:[#allocation20 + $0x338] sm:$0xff] }
 0x3cd   :  { %4935 = vmatprep.subr.bf16.mxu0 %v7011_v52  ;;  %5017 = vmatprep.subr.bf16.mxu1 %v7013_v53  ;;  %v3255_v52 = vld [vmem:[#allocation20 + $0x1f0] sm:$0xff]  ;;  %v3252_v53 = vld [vmem:[#allocation20 + $0x1d8] sm:$0xff] }
 0x3ce   :  { %v7067_v3 = vcombine.high %v3251_v51, %v3255_v52  ;;  %v7066_v54 = vcombine.low %v3251_v51, %v3255_v52  ;;  %v7068_v11 = vcombine.low %v3252_v53, %v3256_v56  ;;  %v3304_v51 = vld [vmem:[#allocation20 + $0x378] sm:$0xff] }
 0x3cf   :  { %4845 = vmatmul.mubr.bf16.vlgmr.msra.gmra.mrb[8].mxu0 %v8406_v57  ;;  %4927 = vmatmul.mubr.bf16.vlgmr.msra.gmra.mrb[12].mxu1 %v8406_v57 }
 0x3d0   :  { %4936 = vmatpush1.bf16.msra.mxu0 %v7010_v6  ;;  %4967 = vmatprep.mubr.bf16.mxu0 %v8394_v20  ;;  %v7069_v6 = vcombine.high %v3252_v53, %v3256_v56 }
 0x3d1   :  { %5018 = vmatpush1.bf16.msra.mxu1 %v7012_v8  ;;  %5049 = vmatprep.mubr.bf16.mxu1 %v8394_v20  ;;  %v3228_v20 = vld [vmem:[#allocation20 + $0x118] sm:$0xff]  ;;  %v3259_v8 = vld [vmem:[#allocation20 + $0x210] sm:$0xff] }
 0x3d2   :  { %4937 = vmatprep.subr.bf16.mxu0 %v7019_v49  ;;  %5019 = vmatprep.subr.bf16.mxu1 %v7021_v9  ;;  %v7045_v31 = vcombine.high %v3228_v20, %v3232_v29  ;;  %v7044_v13 = vcombine.low %v3228_v20, %v3232_v29  ;;  %v3263_v49 = vld [vmem:[#allocation20 + $0x230] sm:$0xff]  ;;  %v3260_v9 = vld [vmem:[#allocation20 + $0x218] sm:$0xff] }
 0x3d3   :  { %v7075_v12 = vcombine.high %v3259_v8, %v3263_v49  ;;  %v7074_v1 = vcombine.low %v3259_v8, %v3263_v49  ;;  %v7076_v38 = vcombine.low %v3260_v9, %v3264_v10  ;;  %v3312_v8 = vld [vmem:[#allocation20 + $0x3b8] sm:$0xff] }
 0x3d4   :  { %4938 = vmatpush1.bf16.msra.mxu0 %v7018_v14  ;;  %v7077_v14 = vcombine.high %v3260_v9, %v3264_v10 }
 0x3d5   :  { %5020 = vmatpush1.bf16.msra.mxu1 %v7020_v16  ;;  %4939 = vmatprep.subr.bf16.mxu0 %v7027_v59  ;;  %v3267_v16 = vld [vmem:[#allocation20 + $0x250] sm:$0xff] }
 0x3d6   :  { %5021 = vmatprep.subr.bf16.mxu1 %v7029_v19  ;;  %v3271_v59 = vld [vmem:[#allocation20 + $0x270] sm:$0xff]  ;;  %v3268_v19 = vld [vmem:[#allocation20 + $0x258] sm:$0xff] }
 0x3d7   :  { %v7083_v23 = vcombine.high %v3267_v16, %v3271_v59  ;;  %v7082_v28 = vcombine.low %v3267_v16, %v3271_v59  ;;  %v7084_v20 = vcombine.low %v3268_v19, %v3272_v21  ;;  %v3320_v16 = vld [vmem:[#allocation20 + $0x3f8] sm:$0xff] }
 0x3d8   :  { %4940 = vmatpush1.bf16.msra.mxu0 %v7026_v58  ;;  %v7085_v58 = vcombine.high %v3268_v19, %v3272_v21 }
 0x3d9   :  { %5022 = vmatpush1.bf16.msra.mxu1 %v7028_v25  ;;  %4941 = vmatprep.subr.bf16.mxu0 %v7035_v61  ;;  %v3275_v25 = vld [vmem:[#allocation20 + $0x290] sm:$0xff] }
 0x3da   :  { %5023 = vmatprep.subr.bf16.mxu1 %v7037_v26  ;;  %v3279_v61 = vld [vmem:[#allocation20 + $0x2b0] sm:$0xff]  ;;  %v3276_v26 = vld [vmem:[#allocation20 + $0x298] sm:$0xff] }
 0x3db   :  { %v7091_v29 = vcombine.high %v3275_v25, %v3279_v61  ;;  %v7090_v34 = vcombine.low %v3275_v25, %v3279_v61  ;;  %v7092_v35 = vcombine.low %v3276_v26, %v3280_v27  ;;  %v3328_v25 = vld [vmem:[#allocation20 + $0x438] sm:$0xff] }
 0x3dc   :  { %4942 = vmatpush1.bf16.msra.mxu0 %v7034_v62  ;;  %v7093_v62 = vcombine.high %v3276_v26, %v3280_v27 }
 0x3dd   :  { %5024 = vmatpush1.bf16.msra.mxu1 %v7036_v30  ;;  %4943 = vmatprep.subr.bf16.mxu0 %v7043_v24  ;;  %v3283_v30 = vld [vmem:[#allocation20 + $0x2d0] sm:$0xff] }
 0x3de   :  { %5025 = vmatprep.subr.bf16.mxu1 %v7045_v31  ;;  %v3287_v24 = vld [vmem:[#allocation20 + $0x2f0] sm:$0xff]  ;;  %v3284_v31 = vld [vmem:[#allocation20 + $0x2d8] sm:$0xff] }
 0x3df   :  { %v7099_v36 = vcombine.high %v3283_v30, %v3287_v24  ;;  %v7098_v7 = vcombine.low %v3283_v30, %v3287_v24  ;;  %v7100_v40 = vcombine.low %v3284_v31, %v3288_v33  ;;  %v3336_v30 = vld [vmem:[#allocation20 + $0x478] sm:$0xff] }
 0x3e0   :  { %4944 = vmatpush1.bf16.msra.mxu0 %v7042_v18  ;;  %v7101_v18 = vcombine.high %v3284_v31, %v3288_v33 }
 0x3e1   :  { %5026 = vmatpush1.bf16.msra.mxu1 %v7044_v13  ;;  %4945 = vmatprep.subr.bf16.mxu0 %v7051_v43  ;;  %v3291_v13 = vld [vmem:[#allocation20 + $0x310] sm:$0xff] }
 0x3e2   :  { %5027 = vmatprep.subr.bf16.mxu1 %v7053_v2  ;;  %v3295_v43 = vld [vmem:[#allocation20 + $0x330] sm:$0xff]  ;;  %v3292_v2 = vld [vmem:[#allocation20 + $0x318] sm:$0xff] }
 0x3e3   :  { %v7107_v42 = vcombine.high %v3291_v13, %v3295_v43  ;;  %v7106_v52 = vcombine.low %v3291_v13, %v3295_v43  ;;  %v7108_v53 = vcombine.low %v3292_v2, %v3296_v39  ;;  %v3344_v13 = vld [vmem:[#allocation20 + $0x4b8] sm:$0xff] }
 0x3e4   :  { %4946 = vmatpush1.bf16.msra.mxu0 %v7050_v44  ;;  %v7109_v44 = vcombine.high %v3292_v2, %v3296_v39 }
 0x3e5   :  { %5028 = vmatpush1.bf16.msra.mxu1 %v7052_v45  ;;  %4947 = vmatprep.subr.bf16.mxu0 %v7059_v46  ;;  %v3299_v45 = vld [vmem:[#allocation20 + $0x350] sm:$0xff] }
 0x3e6   :  { %5029 = vmatprep.subr.bf16.mxu1 %v7061_v47  ;;  %v3303_v46 = vld [vmem:[#allocation20 + $0x370] sm:$0xff]  ;;  %v3300_v47 = vld [vmem:[#allocation20 + $0x358] sm:$0xff] }
 0x3e7   :  { %v7115_v56 = vcombine.high %v3299_v45, %v3303_v46  ;;  %v7114_v49 = vcombine.low %v3299_v45, %v3303_v46  ;;  %v7116_v9 = vcombine.low %v3300_v47, %v3304_v51  ;;  %v3352_v45 = vld [vmem:[#allocation20 + $0x4f8] sm:$0xff] }
 0x3e8   :  { %4948 = vmatpush1.bf16.msra.mxu0 %v7058_v60  ;;  %v7117_v60 = vcombine.high %v3300_v47, %v3304_v51 }
 0x3e9   :  { %5030 = vmatpush1.bf16.msra.mxu1 %v7060_v63  ;;  %4949 = vmatprep.subr.bf16.mxu0 %v7067_v3  ;;  %v3307_v63 = vld [vmem:[#allocation20 + $0x390] sm:$0xff] }
 0x3ea   :  { %5031 = vmatprep.subr.bf16.mxu1 %v7069_v6  ;;  %v3311_v3 = vld [vmem:[#allocation20 + $0x3b0] sm:$0xff]  ;;  %v3308_v6 = vld [vmem:[#allocation20 + $0x398] sm:$0xff] }
 0x3eb   :  { %v7123_v10 = vcombine.high %v3307_v63, %v3311_v3  ;;  %v7122_v59 = vcombine.low %v3307_v63, %v3311_v3  ;;  %v7124_v19 = vcombine.low %v3308_v6, %v3312_v8 }
 0x3ec   :  { %4950 = vmatpush1.bf16.msra.mxu0 %v7066_v54  ;;  %v7125_v54 = vcombine.high %v3308_v6, %v3312_v8  ;;  %v3363_v8 = vld [vmem:[#allocation20 + $0x550] sm:$0xff] }
 0x3ed   :  { %5032 = vmatpush1.bf16.msra.mxu1 %v7068_v11  ;;  %4951 = vmatprep.subr.bf16.mxu0 %v7075_v12  ;;  %v3315_v11 = vld [vmem:[#allocation20 + $0x3d0] sm:$0xff] }
 0x3ee   :  { %5033 = vmatprep.subr.bf16.mxu1 %v7077_v14  ;;  %v3319_v12 = vld [vmem:[#allocation20 + $0x3f0] sm:$0xff]  ;;  %v3316_v14 = vld [vmem:[#allocation20 + $0x3d8] sm:$0xff] }
 0x3ef   :  { %v7131_v21 = vcombine.high %v3315_v11, %v3319_v12  ;;  %v7130_v61 = vcombine.low %v3315_v11, %v3319_v12  ;;  %v7132_v26 = vcombine.low %v3316_v14, %v3320_v16 }
 0x3f0   :  { %4952 = vmatpush1.bf16.msra.mxu0 %v7074_v1  ;;  %v7133_v1 = vcombine.high %v3316_v14, %v3320_v16  ;;  %v3371_v16 = vld [vmem:[#allocation20 + $0x590] sm:$0xff] }
 0x3f1   :  { %5034 = vmatpush1.bf16.msra.mxu1 %v7076_v38  ;;  %4953 = vmatprep.subr.bf16.mxu0 %v7083_v23  ;;  %v3323_v38 = vld [vmem:[#allocation20 + $0x410] sm:$0xff] }
 0x3f2   :  { %5035 = vmatprep.subr.bf16.mxu1 %v7085_v58  ;;  %v3327_v23 = vld [vmem:[#allocation20 + $0x430] sm:$0xff]  ;;  %v3324_v58 = vld [vmem:[#allocation20 + $0x418] sm:$0xff] }
 0x3f3   :  { %v7139_v27 = vcombine.high %v3323_v38, %v3327_v23  ;;  %v7138_v24 = vcombine.low %v3323_v38, %v3327_v23  ;;  %v7140_v31 = vcombine.low %v3324_v58, %v3328_v25 }
 0x3f4   :  { %4954 = vmatpush1.bf16.msra.mxu0 %v7082_v28  ;;  %v7141_v28 = vcombine.high %v3324_v58, %v3328_v25  ;;  %v3379_v25 = vld [vmem:[#allocation20 + $0x5d0] sm:$0xff] }
 0x3f5   :  { %5036 = vmatpush1.bf16.msra.mxu1 %v7084_v20  ;;  %4955 = vmatprep.subr.bf16.mxu0 %v7091_v29  ;;  %v3331_v20 = vld [vmem:[#allocation20 + $0x450] sm:$0xff] }
 0x3f6   :  { %5037 = vmatprep.subr.bf16.mxu1 %v7093_v62  ;;  %v3335_v29 = vld [vmem:[#allocation20 + $0x470] sm:$0xff]  ;;  %v3332_v62 = vld [vmem:[#allocation20 + $0x458] sm:$0xff] }
 0x3f7   :  { %v7147_v33 = vcombine.high %v3331_v20, %v3335_v29  ;;  %v7146_v43 = vcombine.low %v3331_v20, %v3335_v29  ;;  %v7148_v2 = vcombine.low %v3332_v62, %v3336_v30 }
 0x3f8   :  { %4956 = vmatpush1.bf16.msra.mxu0 %v7090_v34  ;;  %v7149_v34 = vcombine.high %v3332_v62, %v3336_v30  ;;  %v3387_v30 = vld [vmem:[#allocation20 + $0x610] sm:$0xff] }
 0x3f9   :  { %5038 = vmatpush1.bf16.msra.mxu1 %v7092_v35  ;;  %4957 = vmatprep.subr.bf16.mxu0 %v7099_v36  ;;  %v3339_v35 = vld [vmem:[#allocation20 + $0x490] sm:$0xff] }
 0x3fa   :  { %5039 = vmatprep.subr.bf16.mxu1 %v7101_v18  ;;  %v3343_v36 = vld [vmem:[#allocation20 + $0x4b0] sm:$0xff]  ;;  %v3340_v18 = vld [vmem:[#allocation20 + $0x498] sm:$0xff] }
 0x3fb   :  { %v7155_v39 = vcombine.high %v3339_v35, %v3343_v36  ;;  %v7154_v46 = vcombine.low %v3339_v35, %v3343_v36 }
 0x3fc   :  { %4958 = vmatpush1.bf16.msra.mxu0 %v7098_v7  ;;  %v7157_v7 = vcombine.high %v3340_v18, %v3344_v13 }
 0x3fd   :  { %5040 = vmatpush1.bf16.msra.mxu1 %v7100_v40  ;;  %4959 = vmatprep.subr.bf16.mxu0 %v7107_v42  ;;  %v3347_v40 = vld [vmem:[#allocation20 + $0x4d0] sm:$0xff] }
 0x3fe   :  { %5041 = vmatprep.subr.bf16.mxu1 %v7109_v44  ;;  %v3351_v42 = vld [vmem:[#allocation20 + $0x4f0] sm:$0xff]  ;;  %v3348_v44 = vld [vmem:[#allocation20 + $0x4d8] sm:$0xff] }
 0x3ff   :  { %v7163_v47 = vcombine.high %v3347_v40, %v3351_v42  ;;  %v7165_v51 = vcombine.high %v3348_v44, %v3352_v45  ;;  %v7162_v63 = vcombine.low %v3347_v40, %v3351_v42  ;;  %v7164_v3 = vcombine.low %v3348_v44, %v3352_v45  ;;  %v3403_v45 = vld [vmem:[#allocation20 + $0x690] sm:$0xff] }
 0x400   :  { %4960 = vmatpush1.bf16.msra.mxu0 %v7106_v52  ;;  %v3355_v52 = vld [vmem:[#allocation20 + $0x510] sm:$0xff] }
 0x401   :  { %5042 = vmatpush1.bf16.msra.mxu1 %v7108_v53  ;;  %4961 = vmatprep.subr.bf16.mxu0 %v7115_v56  ;;  %v3359_v53 = vld [vmem:[#allocation20 + $0x530] sm:$0xff]  ;;  %v3356_v56 = vld [vmem:[#allocation20 + $0x518] sm:$0xff] }
 0x402   :  { %5043 = vmatprep.subr.bf16.mxu1 %v7117_v60  ;;  %v3360_v60 = vld [vmem:[#allocation20 + $0x538] sm:$0xff]  ;;  %v7171_v6 = vcombine.high %v3355_v52, %v3359_v53 }
 0x403   :  { %v7172_v11 = vcombine.low %v3356_v56, %v3360_v60 }
 0x404   :  { %4962 = vmatpush1.bf16.msra.mxu0 %v7114_v49  ;;  %v3367_v49 = vld [vmem:[#allocation20 + $0x570] sm:$0xff] }
 0x405   :  { %5044 = vmatpush1.bf16.msra.mxu1 %v7116_v9  ;;  %4963 = vmatprep.subr.bf16.mxu0 %v7123_v10  ;;  %v3364_v9 = vld [vmem:[#allocation20 + $0x558] sm:$0xff]  ;;  %v7179_v12 = vcombine.high %v3363_v8, %v3367_v49 }
 0x406   :  { %5045 = vmatprep.subr.bf16.mxu1 %v7125_v54  ;;  %v3368_v10 = vld [vmem:[#allocation20 + $0x578] sm:$0xff]  ;;  %v7170_v54 = vcombine.low %v3355_v52, %v3359_v53 }
 0x407   :  { %v7181_v14 = vcombine.high %v3364_v9, %v3368_v10  ;;  %v7180_v38 = vcombine.low %v3364_v9, %v3368_v10  ;;  %v3419_v10 = vld [vmem:[#allocation20 + $0x710] sm:$0xff] }
 0x408   :  { %4964 = vmatpush1.bf16.msra.mxu0 %v7122_v59  ;;  %v3375_v59 = vld [vmem:[#allocation20 + $0x5b0] sm:$0xff] }
 0x409   :  { %5046 = vmatpush1.bf16.msra.mxu1 %v7124_v19  ;;  %4965 = vmatprep.subr.bf16.mxu0 %v7131_v21  ;;  %v3372_v19 = vld [vmem:[#allocation20 + $0x598] sm:$0xff]  ;;  %v7187_v23 = vcombine.high %v3371_v16, %v3375_v59 }
 0x40a   :  { %5047 = vmatprep.subr.bf16.mxu1 %v7133_v1  ;;  %v3376_v21 = vld [vmem:[#allocation20 + $0x5b8] sm:$0xff]  ;;  %v7178_v1 = vcombine.low %v3363_v8, %v3367_v49 }
 0x40b   :  { %v7189_v58 = vcombine.high %v3372_v19, %v3376_v21  ;;  %v7188_v20 = vcombine.low %v3372_v19, %v3376_v21  ;;  %v3427_v21 = vld [vmem:[#allocation20 + $0x750] sm:$0xff] }
 0x40c   :  { %4966 = vmatpush1.bf16.msra.mxu0 %v7130_v61  ;;  %v3383_v61 = vld [vmem:[#allocation20 + $0x5f0] sm:$0xff] }
 0x40d   :  { %5048 = vmatpush1.bf16.msra.mxu1 %v7132_v26  ;;  %4976 = vmatprep.subr.bf16.mxu0 %v7139_v27  ;;  %v3380_v26 = vld [vmem:[#allocation20 + $0x5d8] sm:$0xff]  ;;  %v7195_v29 = vcombine.high %v3379_v25, %v3383_v61 }
 0x40e   :  { %5058 = vmatprep.subr.bf16.mxu1 %v7141_v28  ;;  %v3384_v27 = vld [vmem:[#allocation20 + $0x5f8] sm:$0xff]  ;;  %v7186_v28 = vcombine.low %v3371_v16, %v3375_v59 }
 0x40f   :  { %4968 = vmatmul.mubr.bf16.vlgmr.msra.gmra.mrb[12].mxu0 %v8396_v22  ;;  %v7197_v62 = vcombine.high %v3380_v26, %v3384_v27  ;;  %v7196_v35 = vcombine.low %v3380_v26, %v3384_v27  ;;  %v3435_v27 = vld [vmem:[#allocation20 + $0x790] sm:$0xff] }
 0x410   :  { %5050 = vmatmul.mubr.bf16.vlgmr.msra.gmra.mrb[16].mxu1 %v8396_v22  ;;  %4977 = vmatpush1.bf16.msra.mxu0 %v7138_v24  ;;  %v7156_v22 = vcombine.low %v3340_v18, %v3344_v13  ;;  %v3391_v24 = vld [vmem:[#allocation20 + $0x630] sm:$0xff] }
 0x411   :  { %5059 = vmatpush1.bf16.msra.mxu1 %v7140_v31  ;;  %4978 = vmatprep.subr.bf16.mxu0 %v7147_v33  ;;  %v3388_v31 = vld [vmem:[#allocation20 + $0x618] sm:$0xff]  ;;  %v7203_v36 = vcombine.high %v3387_v30, %v3391_v24  ;;  %v3395_v13 = vld [vmem:[#allocation20 + $0x650] sm:$0xff] }
 0x412   :  { %5060 = vmatprep.subr.bf16.mxu1 %v7149_v34  ;;  %5008 = vmatprep.mubr.bf16.mxu0 %v8400_v37  ;;  %v3392_v33 = vld [vmem:[#allocation20 + $0x638] sm:$0xff]  ;;  %v7194_v34 = vcombine.low %v3379_v25, %v3383_v61 }
 0x413   :  { %5090 = vmatprep.mubr.bf16.mxu1 %v8400_v37  ;;  %v7173_v37 = vcombine.high %v3356_v56, %v3360_v60  ;;  %v7205_v18 = vcombine.high %v3388_v31, %v3392_v33  ;;  %v7204_v40 = vcombine.low %v3388_v31, %v3392_v33  ;;  %v3411_v60 = vld [vmem:[#allocation20 + $0x6d0] sm:$0xff] }
 0x414   :  { %4979 = vmatpush1.bf16.msra.mxu0 %v7146_v43  ;;  %v3399_v43 = vld [vmem:[#allocation20 + $0x670] sm:$0xff] }
 0x415   :  { %5061 = vmatpush1.bf16.msra.mxu1 %v7148_v2  ;;  %4980 = vmatprep.subr.bf16.mxu0 %v7155_v39  ;;  %v3396_v2 = vld [vmem:[#allocation20 + $0x658] sm:$0xff]  ;;  %v7211_v42 = vcombine.high %v3395_v13, %v3399_v43  ;;  %v3443_v33 = vld [vmem:[#allocation20 + $0x7d0] sm:$0xff] }
 0x416   :  { %5062 = vmatprep.subr.bf16.mxu1 %v7157_v7  ;;  %v3400_v39 = vld [vmem:[#allocation20 + $0x678] sm:$0xff]  ;;  %v7202_v7 = vcombine.low %v3387_v30, %v3391_v24 }
 0x417   :  { %v7213_v44 = vcombine.high %v3396_v2, %v3400_v39  ;;  %v7212_v52 = vcombine.low %v3396_v2, %v3400_v39 }
 0x418   :  { %4981 = vmatpush1.bf16.msra.mxu0 %v7154_v46  ;;  %v3407_v46 = vld [vmem:[#allocation20 + $0x6b0] sm:$0xff] }
 0x419   :  { %5063 = vmatpush1.bf16.msra.mxu1 %v7156_v22  ;;  %4982 = vmatprep.subr.bf16.mxu0 %v7163_v47  ;;  %v3404_v22 = vld [vmem:[#allocation20 + $0x698] sm:$0xff]  ;;  %v7219_v53 = vcombine.high %v3403_v45, %v3407_v46 }
 0x41a   :  { %5064 = vmatprep.subr.bf16.mxu1 %v7165_v51  ;;  %v3408_v47 = vld [vmem:[#allocation20 + $0x6b8] sm:$0xff]  ;;  %v7210_v51 = vcombine.low %v3395_v13, %v3399_v43 }
 0x41b   :  { %v7221_v56 = vcombine.high %v3404_v22, %v3408_v47  ;;  %v7220_v8 = vcombine.low %v3404_v22, %v3408_v47 }
 0x41c   :  { %4983 = vmatpush1.bf16.msra.mxu0 %v7162_v63  ;;  %v3415_v63 = vld [vmem:[#allocation20 + $0x6f0] sm:$0xff] }
 0x41d   :  { %5065 = vmatpush1.bf16.msra.mxu1 %v7164_v3  ;;  %4984 = vmatprep.subr.bf16.mxu0 %v7171_v6  ;;  %v3412_v3 = vld [vmem:[#allocation20 + $0x6d8] sm:$0xff]  ;;  %v7227_v49 = vcombine.high %v3411_v60, %v3415_v63 }
 0x41e   :  { %5066 = vmatprep.subr.bf16.mxu1 %v7173_v37  ;;  %v3416_v6 = vld [vmem:[#allocation20 + $0x6f8] sm:$0xff]  ;;  %v7218_v37 = vcombine.low %v3403_v45, %v3407_v46 }
 0x41f   :  { %v7229_v9 = vcombine.high %v3412_v3, %v3416_v6  ;;  %v7228_v16 = vcombine.low %v3412_v3, %v3416_v6 }
 0x420   :  { %4985 = vmatpush1.bf16.msra.mxu0 %v7170_v54  ;;  %v3423_v54 = vld [vmem:[#allocation20 + $0x730] sm:$0xff] }
 0x421   :  { %5067 = vmatpush1.bf16.msra.mxu1 %v7172_v11  ;;  %4986 = vmatprep.subr.bf16.mxu0 %v7179_v12  ;;  %v3420_v11 = vld [vmem:[#allocation20 + $0x718] sm:$0xff]  ;;  %v7235_v59 = vcombine.high %v3419_v10, %v3423_v54 }
 0x422   :  { %5068 = vmatprep.subr.bf16.mxu1 %v7181_v14  ;;  %v3424_v12 = vld [vmem:[#allocation20 + $0x738] sm:$0xff]  ;;  %v7226_v14 = vcombine.low %v3411_v60, %v3415_v63 }
 0x423   :  { %v7237_v19 = vcombine.high %v3420_v11, %v3424_v12  ;;  %v7236_v25 = vcombine.low %v3420_v11, %v3424_v12 }
 0x424   :  { %4987 = vmatpush1.bf16.msra.mxu0 %v7178_v1  ;;  %v3431_v1 = vld [vmem:[#allocation20 + $0x770] sm:$0xff] }
 0x425   :  { %5069 = vmatpush1.bf16.msra.mxu1 %v7180_v38  ;;  %4988 = vmatprep.subr.bf16.mxu0 %v7187_v23  ;;  %v3428_v38 = vld [vmem:[#allocation20 + $0x758] sm:$0xff]  ;;  %v7243_v61 = vcombine.high %v3427_v21, %v3431_v1 }
 0x426   :  { %5070 = vmatprep.subr.bf16.mxu1 %v7189_v58  ;;  %v3432_v23 = vld [vmem:[#allocation20 + $0x778] sm:$0xff]  ;;  %v7234_v58 = vcombine.low %v3419_v10, %v3423_v54 }
 0x427   :  { %v7245_v26 = vcombine.high %v3428_v38, %v3432_v23  ;;  %v7244_v30 = vcombine.low %v3428_v38, %v3432_v23 }
 0x428   :  { %4989 = vmatpush1.bf16.msra.mxu0 %v7186_v28  ;;  %v3439_v28 = vld [vmem:[#allocation20 + $0x7b0] sm:$0xff] }
 0x429   :  { %5071 = vmatpush1.bf16.msra.mxu1 %v7188_v20  ;;  %4990 = vmatprep.subr.bf16.mxu0 %v7195_v29  ;;  %v3436_v20 = vld [vmem:[#allocation20 + $0x798] sm:$0xff]  ;;  %v7251_v24 = vcombine.high %v3435_v27, %v3439_v28 }
 0x42a   :  { %5072 = vmatprep.subr.bf16.mxu1 %v7197_v62  ;;  %v3440_v29 = vld [vmem:[#allocation20 + $0x7b8] sm:$0xff]  ;;  %v7242_v62 = vcombine.low %v3427_v21, %v3431_v1 }
 0x42b   :  { %v7253_v31 = vcombine.high %v3436_v20, %v3440_v29  ;;  %v7252_v13 = vcombine.low %v3436_v20, %v3440_v29 }
 0x42c   :  { %4991 = vmatpush1.bf16.msra.mxu0 %v7194_v34  ;;  %v3447_v34 = vld [vmem:[#allocation20 + $0x7f0] sm:$0xff] }
 0x42d   :  { %5073 = vmatpush1.bf16.msra.mxu1 %v7196_v35  ;;  %4992 = vmatprep.subr.bf16.mxu0 %v7203_v36  ;;  %v3444_v35 = vld [vmem:[#allocation20 + $0x7d8] sm:$0xff]  ;;  %v7259_v43 = vcombine.high %v3443_v33, %v3447_v34  ;;  %v7258_v39 = vcombine.low %v3443_v33, %v3447_v34 }
 0x42e   :  { %5074 = vmatprep.subr.bf16.mxu1 %v7205_v18  ;;  %v3448_v36 = vld [vmem:[#allocation20 + $0x7f8] sm:$0xff]  ;;  %v7250_v18 = vcombine.low %v3435_v27, %v3439_v28 }
 0x42f   :  { %v7261_v2 = vcombine.high %v3444_v35, %v3448_v36 }
 0x430   :  { %4993 = vmatpush1.bf16.msra.mxu0 %v7202_v7  ;;  %v7260_v7 = vcombine.low %v3444_v35, %v3448_v36 }
 0x431   :  { %5075 = vmatpush1.bf16.msra.mxu1 %v7204_v40  ;;  %4994 = vmatprep.subr.bf16.mxu0 %v7211_v42 }
 0x432   :  { %5076 = vmatprep.subr.bf16.mxu1 %v7213_v44 }
 0x434   :  { %4995 = vmatpush1.bf16.msra.mxu0 %v7210_v51 }
 0x435   :  { %5077 = vmatpush1.bf16.msra.mxu1 %v7212_v52  ;;  %4996 = vmatprep.subr.bf16.mxu0 %v7219_v53  ;;  %v3449_v52 = vld [vmem:[#allocation22] sm:$0xff] }
 0x436   :  { %5078 = vmatprep.subr.bf16.mxu1 %v7221_v56  ;;  %v3454_v53 = vrot.slane %v3449_v52, %v8281_v0  ;;  %v3462_v56 = vrot.slane %v3449_v52, %v8355_v4  ;;  %v3458_v60 = vrot.slane %v3449_v52, %v8242_v50  ;;  %v3466_v63 = vrot.slane %v3449_v52, %v8358_v48 }
 0x437   :  { %v3470_v21 = vrot.slane %v3449_v52, %v8367_v15  ;;  %v3478_v38 = vrot.slane %v3449_v52, %v8383_v5  ;;  %v3474_v23 = vrot.slane %v3449_v52, %v8370_v17 }
 0x438   :  { %4997 = vmatpush1.bf16.msra.mxu0 %v7218_v37 }
 0x439   :  { %5079 = vmatpush1.bf16.msra.mxu1 %v7220_v8  ;;  %4998 = vmatprep.subr.bf16.mxu0 %v7227_v49 }
 0x43a   :  { %5080 = vmatprep.subr.bf16.mxu1 %v7229_v9 }
 0x43c   :  { %4999 = vmatpush1.bf16.msra.mxu0 %v7226_v14 }
 0x43d   :  { %5081 = vmatpush1.bf16.msra.mxu1 %v7228_v16  ;;  %5000 = vmatprep.subr.bf16.mxu0 %v7235_v59 }
 0x43e   :  { %5082 = vmatprep.subr.bf16.mxu1 %v7237_v19 }
 0x440   :  { %5001 = vmatpush1.bf16.msra.mxu0 %v7234_v58  ;;  %v3482_v58 = vrot.slane %v3449_v52, %v8386_v55 }
 0x441   :  { %5083 = vmatpush1.bf16.msra.mxu1 %v7236_v25  ;;  %5002 = vmatprep.subr.bf16.mxu0 %v7243_v61 }
 0x442   :  { %5084 = vmatprep.subr.bf16.mxu1 %v7245_v26 }
 0x444   :  { %5003 = vmatpush1.bf16.msra.mxu0 %v7242_v62 }
 0x445   :  { %5085 = vmatpush1.bf16.msra.mxu1 %v7244_v30  ;;  %5004 = vmatprep.subr.bf16.mxu0 %v7251_v24 }
 0x446   :  { %5086 = vmatprep.subr.bf16.mxu1 %v7253_v31 }
 0x448   :  { %5005 = vmatpush1.bf16.msra.mxu0 %v7250_v18 }
 0x449   :  { %5087 = vmatpush1.bf16.msra.mxu1 %v7252_v13  ;;  %5006 = vmatprep.subr.bf16.mxu0 %v7259_v43  ;;  %v3187_v43 = vld [vmem:[#allocation16 + $0x10] sm:$0xff] }
 0x44a   :  { %5088 = vmatprep.subr.bf16.mxu1 %v7261_v2 }
 0x44c   :  { %5007 = vmatpush1.bf16.msra.mxu0 %v7258_v39  ;;  %v3188_v39 = vld [vmem:[#allocation16 + $0x18] sm:$0xff] }
 0x44d   :  { %5089 = vmatpush1.bf16.msra.mxu1 %v7260_v7 }
 0x44f   :  { %5009 = vmatmul.mubr.bf16.vlgmr.msra.gmra.mrb[12].mxu0 %v8406_v57 }
 0x450   :  { %5091 = vmatmul.mubr.bf16.vlgmr.msra.gmra.mrb[16].mxu1 %v8406_v57 }
 0x4a2   :  { %v4846_v40 = vpop.f32.mrb[8].mxu0  ;;  %v4928_v42 = vpop.f32.mrb[12].mxu1 }
 0x4a3   :  { %v4848_v44 = vpop.f32.mrb[9].mxu0  ;;  %v4930_v45 = vpop.f32.mrb[13].mxu1  ;;  %v7346_v3 = vadd.f32 %v4846_v40, %v3454_v53  ;;  %v7348_v6 = vadd.f32 %v4928_v42, %v3462_v56 }
 0x4a4   :  { %v4850_v46 = vpop.f32.mrb[10].mxu0  ;;  %v4932_v22 = vpop.f32.mrb[14].mxu1  ;;  %v7347_v57 = vadd.f32 %v4848_v44, %v3458_v60  ;;  %v7349_v37 = vadd.f32 %v4930_v45, %v3466_v63  ;;  %v7964_v60 = vmov 1966171168  }
 0x4a5   :  { %v4851_v47 = vpop.f32.mrb[11].mxu0  ;;  %v4933_v51 = vpop.f32.mrb[15].mxu1  ;;  %v7262_v8 = vmul.f32 -1.442695, %v7346_v3  ;;  %v7264_v49 = vmul.f32 -1.442695, %v7348_v6  ;;  %v5234_v63 = vunpack.c.l.s4 %v7964_v60 }
 0x4a6   :  { %v7263_v9 = vmul.f32 -1.442695, %v7347_v57  ;;  %v7265_v10 = vmul.f32 -1.442695, %v7349_v37 }
 0x4a7   :  { %7554 = vpow2.f32 %v7262_v8  ;;  %v5235_v6 = vunpack.c.0.s8 %v5234_v63 }
 0x4a8   :  { %7556 = vpow2.f32 %v7264_v49 }
 0x4a9   :  { %7558 = vpow2.f32 %v7263_v9 }
 0x4aa   :  { %7560 = vpow2.f32 %v7265_v10  ;;  %v8427_v10 = vsub.s32 %v5235_v6, %v8233_v41  ;;  %v8504_v6 = vld [vmem:[#allocation13 + $0x70] sm:$0xff] }
 0x4b1   :  { %v7555_v54 = vpop.eup %7554 }
 0x4b2   :  { %v7557_v11 = vpop.eup %7556  ;;  %v5105_v16 = vadd.f32 1.0, %v7555_v54  ;;  %v8429_v54 = vld [vmem:[#allocation13 + $0x68] sm:$0xff] }
 0x4b3   :  { %v7559_v12 = vpop.eup %7558  ;;  %v5117_v59 = vadd.f32 1.0, %v7557_v11 }
 0x4b4   :  { %v7561_v14 = vpop.eup %7560  ;;  %v5106_v19 = vadd.f32 1.0, %v7559_v12  ;;  %7562 = vrcp.f32 %v5105_v16  ;;  %v8431_v12 = vld [vmem:[#allocation13] sm:$0xff] }
 0x4b5   :  { %v5118_v1 = vadd.f32 1.0, %v7561_v14  ;;  %7564 = vrcp.f32 %v5117_v59 }
 0x4b6   :  { %7566 = vrcp.f32 %v5106_v19  ;;  %v8437_v19 = vld [vmem:[#allocation13 + $0x8] sm:$0xff] }
 0x4b7   :  { %7568 = vrcp.f32 %v5118_v1  ;;  %v8979_v1 = vunpack.c.l.bf16 %v8429_v54 }
 0x4be   :  { %v7563_v36 = vpop.eup %7562 }
 0x4bf   :  { %v7565_v18 = vpop.eup %7564 }
 0x4c0   :  { %v7567_v13 = vpop.eup %7566  ;;  %v5137_v42 = vmul.f32 %v7565_v18, %v3187_v43 }
 0x4c1   :  { %v7569_v2 = vpop.eup %7568 }
 0x4c2   :  { %v5138_v45 = vmul.f32 %v7569_v2, %v3188_v39 }
 0x522   :  { %v5010_v25 = vpop.f32.mrb[12].mxu0 }
 0x523   :  { %v7350_v61 = vadd.f32 %v5010_v25, %v3470_v21  ;;  %v5092_v26 = vpop.f32.mrb[16].mxu1  ;;  %v5012_v27 = vpop.f32.mrb[13].mxu0  ;;  %v8439_v21 = vld [vmem:[#allocation13 + $0x10] sm:$0xff]  ;;  %v9006_v25 = vunpack.c.h.bf16 %v8431_v12 }
 0x524   :  { %v7352_v28 = vadd.f32 %v5092_v26, %v3478_v38  ;;  %v7351_v20 = vadd.f32 %v5012_v27, %v3474_v23  ;;  %v5094_v29 = vpop.f32.mrb[17].mxu1  ;;  %v5014_v62 = vpop.f32.mrb[14].mxu0  ;;  %v8978_v38 = vunpack.c.h.bf16 %v8429_v54  ;;  %v9007_v23 = vunpack.c.l.bf16 %v8431_v12  ;;  %v8450_v26 = vld [vmem:[#allocation13 + $0x18] sm:$0xff] }
 0x525   :  { %7570 = vtanh.f32 %v7350_v61  ;;  %v7353_v30 = vadd.f32 %v5094_v29, %v3482_v58  ;;  %v5096_v24 = vpop.f32.mrb[18].mxu1  ;;  %v5015_v31 = vpop.f32.mrb[15].mxu0  ;;  %v8985_v29 = vunpack.c.l.bf16 %v8439_v21  ;;  %v8984_v18 = vunpack.c.h.bf16 %v8439_v21 }
 0x526   :  { %v7266_v33 = vmul.f32 -1.442695, %v7352_v28  ;;  %7572 = vtanh.f32 %v7351_v20  ;;  %v5097_v34 = vpop.f32.mrb[19].mxu1  ;;  %v8989_v28 = vunpack.c.l.bf16 %v8437_v19  ;;  %v8988_v20 = vunpack.c.h.bf16 %v8437_v19 }
 0x527   :  { %v7267_v35 = vmul.f32 -1.442695, %v7353_v30  ;;  %v9025_v34 = vunpack.c.l.bf16 %v8450_v26 }
 0x528   :  { %7574 = vpow2.f32 %v7266_v33  ;;  %v8465_v33 = vld [vmem:[#allocation13 + $0x20] sm:$0xff] }
 0x529   :  { %7576 = vpow2.f32 %v7267_v35  ;;  %v9024_v35 = vunpack.c.h.bf16 %v8450_v26 }
 0x52f   :  { %v7571_v7 = vpop.eup %7570 }
 0x530   :  { %v7573_v40 = vpop.eup %7572  ;;  %v5139_v44 = vmul.f32 %v7571_v7, %v7563_v36 }
 0x531   :  { %v5140_v46 = vmul.f32 %v7573_v40, %v7567_v13 }
 0x532   :  { %v7575_v22 = vpop.eup %7574  ;;  %v5141_v47 = vadd.f32 %v5139_v44, %v5137_v42  ;;  %v9023_v42 = vunpack.c.l.bf16 %v8465_v33  ;;  %v9022_v44 = vunpack.c.h.bf16 %v8465_v33 }
 0x533   :  { %v7577_v51 = vpop.eup %7576  ;;  %v5131_v52 = vadd.f32 1.0, %v7575_v22  ;;  %v5142_v53 = vadd.f32 %v5140_v46, %v5138_v45  ;;  %v8489_v45 = vld [vmem:[#allocation13 + $0x60] sm:$0xff]  ;;  %v8491_v46 = vld [vmem:[#allocation13 + $0x28] sm:$0xff] }
 0x534   :  { %7578 = vtanh.f32 %v5141_v47  ;;  %5155 = vst [vmem:[#allocation29 + $0x10] sm:$0xff] %v5141_v47  ;;  %v5132_v56 = vadd.f32 1.0, %v7577_v51  ;;  %v9003_v60 = vunpack.c.l.bf16 %v8489_v45  ;;  %v8996_v63 = vunpack.c.h.bf16 %v8489_v45 }
 0x535   :  { %7580 = vrcp.f32 %v5131_v52  ;;  %5156 = vst [vmem:[#allocation29 + $0x18] sm:$0xff] %v5142_v53 }
 0x536   :  { %7582 = vtanh.f32 %v5142_v53 }
 0x537   :  { %7584 = vrcp.f32 %v5132_v56 }
 0x53e   :  { %v7579_v3 = vpop.eup %7578 }
 0x53f   :  { %v7581_v57 = vpop.eup %7580 }
 0x540   :  { %v7583_v37 = vpop.eup %7582  ;;  %v5145_v8 = vmul.f32 %v7581_v57, %v7579_v3  ;;  %v9021_v3 = vunpack.c.l.bf16 %v8491_v46 }
 0x541   :  { %v7585_v49 = vpop.eup %7584 }
 0x542   :  { %5150 = vst [vmem:[#allocation27 + $0x10] sm:$0xff] %v5145_v8  ;;  %v5146_v9 = vmul.f32 %v7585_v49, %v7583_v37  ;;  %v9020_v49 = vunpack.c.h.bf16 %v8491_v46 }
 0x544   :  { %5151 = vst [vmem:[#allocation27 + $0x18] sm:$0xff] %v5146_v9  ;;  %v5232_v11 = vcombine.high %v5145_v8, %v5146_v9  ;;  %v5231_v14 = vcombine.low %v5145_v8, %v5146_v9  ;;  %v8513_v9 = vld [vmem:[#allocation13 + $0x38] sm:$0xff] }
 0x546   :  { %v8434_v16 = vrot.slane %v5232_v11, %v8427_v10  ;;  %v5239_v59 = vrot.slane %v5231_v14, %v8427_v10 }
 0x548   :  { %v8446_v58 = vrot.slane %v8434_v16, %v8427_v10  ;;  %v5255_v61 = vrot.slane %v5239_v59, %v8427_v10  ;;  %v5247_v27 = vcombine.high %v5239_v59, %v5239_v59  ;;  %v5248_v57 = vcombine.high %v8434_v16, %v8434_v16 }
 0x549   :  { %v8981_v16 = vunpack.c.l.bf16 %v8504_v6 }
 0x54a   :  { %v8457_v62 = vrot.slane %v8446_v58, %v8281_v0  ;;  %v8461_v30 = vrot.slane %v8446_v58, %v8242_v50  ;;  %v5284_v24 = vrot.slane %v5255_v61, %v8281_v0  ;;  %v5288_v31 = vrot.slane %v5255_v61, %v8242_v50 }
 0x54b   :  { %v8470_v36 = vrot.slane %v5247_v27, %v8427_v10  ;;  %v5277_v11 = vcombine.high %v5255_v61, %v5255_v61  ;;  %v8524_v61 = vrot.slane %v5248_v57, %v8427_v10 }
 0x54c   :  { %v5387_v13 = vmul.f32 %v8457_v62, %v8979_v1  ;;  %v5388_v43 = vmul.f32 %v8461_v30, %v8978_v38  ;;  %v5361_v2 = vmul.f32 %v5284_v24, %v9007_v23  ;;  %v5362_v39 = vmul.f32 %v5288_v31, %v9006_v25 }
 0x54d   :  { %v5292_v7 = vrot.slane %v8470_v36, %v8281_v0  ;;  %v5296_v40 = vrot.slane %v8470_v36, %v8242_v50  ;;  %v5363_v51 = vmul.f32 %v5284_v24, %v8989_v28  ;;  %v5364_v52 = vmul.f32 %v5288_v31, %v8988_v20 }
 0x54e   :  { %v5448_v22 = vadd.f32 %v5388_v43, %v5387_v13  ;;  %v5409_v47 = vadd.f32 %v5362_v39, %v5361_v2  ;;  %v5365_v37 = vmul.f32 %v5284_v24, %v8985_v29  ;;  %v5366_v8 = vmul.f32 %v5288_v31, %v8984_v18 }
 0x54f   :  { %v5367_v53 = vmul.f32 %v5292_v7, %v9025_v34  ;;  %v5368_v56 = vmul.f32 %v5296_v40, %v9024_v35  ;;  %v5412_v14 = vadd.f32 %v5364_v52, %v5363_v51  ;;  %v5369_v27 = vmul.f32 %v5292_v7, %v9023_v42  ;;  %v8536_v51 = vld [vmem:[#allocation13 + $0x30] sm:$0xff]  ;;  %v8538_v52 = vld [vmem:[#allocation13 + $0x78] sm:$0xff] }
 0x550   :  { %5449 = vadd.xlane.f32.xlu1 %v5448_v22  ;;  %5410 = vadd.xlane.f32.xlu0 %v5409_v47  ;;  %v5370_v13 = vmul.f32 %v5296_v40, %v9022_v44  ;;  %v8980_v24 = vunpack.c.h.bf16 %v8504_v6  ;;  %v8983_v31 = vunpack.c.l.bf16 %v8513_v9  ;;  %v8982_v43 = vunpack.c.h.bf16 %v8513_v9 }
 0x551   :  { %v5418_v59 = vadd.f32 %v5368_v56, %v5367_v53  ;;  %v5385_v2 = vmul.f32 %v8457_v62, %v9003_v60  ;;  %v5386_v39 = vmul.f32 %v8461_v30, %v8996_v63  ;;  %v5371_v22 = vmul.f32 %v5292_v7, %v9021_v3 }
 0x552   :  { %v5372_v47 = vmul.f32 %v5296_v40, %v9020_v49  ;;  %v5415_v10 = vadd.f32 %v5366_v8, %v5365_v37  ;;  %v5421_v53 = vadd.f32 %v5370_v13, %v5369_v27  ;;  %v5300_v56 = vrot.slane %v5277_v11, %v8281_v0  ;;  %v8554_v27 = vld [vmem:[#allocation13 + $0x88] sm:$0xff] }
 0x553   :  { %v5304_v57 = vrot.slane %v5277_v11, %v8242_v50  ;;  %v8995_v7 = vunpack.c.l.bf16 %v8538_v52  ;;  %v8991_v40 = vunpack.c.h.bf16 %v8538_v52  ;;  %v5445_v38 = vadd.f32 %v5386_v39, %v5385_v2  ;;  %v8552_v11 = vld [vmem:[#allocation13 + $0x40] sm:$0xff]  ;;  %9034 = vst [vmem:[#allocation39_spill] sm:$0xff] %v8554_v27 }
 0x554   :  { %5413 = vadd.xlane.f32.xlu0 %v5412_v14  ;;  %5419 = vadd.xlane.f32.xlu1 %v5418_v59  ;;  %v8986_v14 = vunpack.c.l.bf16 %v8536_v51  ;;  %v8987_v59 = vunpack.c.h.bf16 %v8536_v51  ;;  %v5424_v1 = vadd.f32 %v5372_v47, %v5371_v22  ;;  %v5389_v37 = vmul.f32 %v8457_v62, %v8981_v16  ;;  %v8567_v47 = vld [vmem:[#allocation13 + $0x80] sm:$0xff] }
 0x555   :  { %v5390_v8 = vmul.f32 %v8461_v30, %v8980_v24  ;;  %v5375_v13 = vmul.f32 %v5300_v56, %v8983_v31  ;;  %v5324_v2 = vrot.slane %v8524_v61, %v8281_v0  ;;  %v5328_v62 = vrot.slane %v8524_v61, %v8242_v50 }
 0x556   :  { %v8990_v30 = vunpack.c.l.bf16 %v8552_v11  ;;  %v8994_v39 = vunpack.c.h.bf16 %v8552_v11  ;;  %v8993_v22 = vunpack.c.l.bf16 %v8554_v27  ;;  %v5374_v24 = vmul.f32 %v5304_v57, %v8987_v59 }
 0x557   :  { %v8992_v16 = vunpack.c.h.bf16 %v8554_v27  ;;  %v5391_v18 = vmul.f32 %v5324_v2, %v8995_v7  ;;  %v5392_v29 = vmul.f32 %v5328_v62, %v8991_v40  ;;  %v8997_v20 = vunpack.c.h.bf16 %v8567_v47 }
 0x558   :  { %5416 = vadd.xlane.f32.xlu0 %v5415_v10  ;;  %5422 = vadd.xlane.f32.xlu1 %v5421_v53  ;;  %v5376_v10 = vmul.f32 %v5304_v57, %v8982_v43  ;;  %v5373_v53 = vmul.f32 %v5300_v56, %v8986_v14  ;;  %v8574_v43 = vld [vmem:[#allocation13 + $0x98] sm:$0xff]  ;;  %v8998_v14 = vunpack.c.l.bf16 %v8567_v47  ;;  %v5377_v59 = vmul.f32 %v5300_v56, %v8990_v30 }
 0x559   :  { %v9000_v28 = vunpack.c.l.bf16 %v8574_v43  ;;  %v5454_v56 = vadd.f32 %v5392_v29, %v5391_v18  ;;  %v5394_v18 = vmul.f32 %v5328_v62, %v8997_v20 }
 0x55a   :  { %v5430_v31 = vadd.f32 %v5376_v10, %v5375_v13  ;;  %v5395_v13 = vmul.f32 %v5324_v2, %v8993_v22  ;;  %v5396_v10 = vmul.f32 %v5328_v62, %v8992_v16  ;;  %v5393_v29 = vmul.f32 %v5324_v2, %v8998_v14 }
 0x55c   :  { %5446 = vadd.xlane.f32.xlu0 %v5445_v38  ;;  %5425 = vadd.xlane.f32.xlu1 %v5424_v1  ;;  %v5278_v1 = vcombine.high %v8446_v58, %v8446_v58  ;;  %v5451_v38 = vadd.f32 %v5390_v8, %v5389_v37  ;;  %v8999_v58 = vunpack.c.h.bf16 %v8574_v43  ;;  %v5427_v37 = vadd.f32 %v5374_v24, %v5373_v53 }
 0x55d   :  { %v5378_v8 = vmul.f32 %v5304_v57, %v8994_v39  ;;  %v5279_v24 = vcombine.high %v8470_v36, %v8470_v36  ;;  %v5460_v7 = vadd.f32 %v5396_v10, %v5395_v13  ;;  %v8612_v36 = vld [vmem:[#allocation13 + $0x58] sm:$0xff]  ;;  %v5457_v13 = vadd.f32 %v5394_v18, %v5393_v29 }
 0x55e   :  { %v5332_v30 = vrot.slane %v5278_v1, %v8281_v0  ;;  %v5336_v40 = vrot.slane %v5278_v1, %v8242_v50  ;;  %v8610_v1 = vld [vmem:[#allocation13 + $0xa0] sm:$0xff]  ;;  %v9010_v14 = vunpack.c.h.bf16 %v8612_v36  ;;  %v5280_v29 = vcombine.high %v8524_v61, %v8524_v61 }
 0x55f   :  { %v5433_v39 = vadd.f32 %v5378_v8, %v5377_v59  ;;  %v5308_v63 = vrot.slane %v5279_v24, %v8281_v0  ;;  %v5312_v59 = vrot.slane %v5279_v24, %v8242_v50  ;;  %v9009_v2 = vunpack.c.l.bf16 %v8610_v1  ;;  %v8630_v24 = vld [vmem:[#allocation13 + $0xa8] sm:$0xff] }
 0x560   :  { %5452 = vadd.xlane.f32.xlu0 %v5451_v38  ;;  %5431 = vadd.xlane.f32.xlu1 %v5430_v31  ;;  %v8594_v31 = vld [vmem:[#allocation13 + $0x90] sm:$0xff]  ;;  %v8596_v38 = vld [vmem:[#allocation13 + $0x48] sm:$0xff]  ;;  %v9008_v62 = vunpack.c.h.bf16 %v8610_v1  ;;  %v9011_v8 = vunpack.c.l.bf16 %v8612_v36  ;;  %v9014_v60 = vunpack.c.h.bf16 %v8630_v24  ;;  %v5340_v25 = vrot.slane %v5280_v29, %v8281_v0 }
 0x561   :  { %v9002_v57 = vunpack.c.l.bf16 %v8594_v31  ;;  %v9001_v53 = vunpack.c.h.bf16 %v8594_v31  ;;  %v9005_v16 = vunpack.c.l.bf16 %v8596_v38  ;;  %v9004_v22 = vunpack.c.h.bf16 %v8596_v38 }
 0x562   :  { %v5383_v61 = vmul.f32 %v5308_v63, %v9011_v8  ;;  %v5344_v23 = vrot.slane %v5280_v29, %v8242_v50 }
 0x563   :  { %v5397_v10 = vmul.f32 %v5332_v30, %v9002_v57  ;;  %v5398_v20 = vmul.f32 %v5336_v40, %v9001_v53  ;;  %v9015_v57 = vunpack.c.l.bf16 %v8630_v24 }
 0x564   :  { %5428 = vadd.xlane.f32.xlu0 %v5427_v37  ;;  %5455 = vadd.xlane.f32.xlu1 %v5454_v56  ;;  %v5399_v37 = vmul.f32 %v5332_v30, %v9000_v28  ;;  %v5400_v56 = vmul.f32 %v5336_v40, %v8999_v58  ;;  %v8628_v58 = vld [vmem:[#allocation13 + $0x50] sm:$0xff]  ;;  %v5380_v28 = vmul.f32 %v5312_v59, %v9004_v22 }
 0x565   :  { %v9019_v18 = vunpack.c.l.bf16 %v8628_v58  ;;  %v9018_v53 = vunpack.c.h.bf16 %v8628_v58  ;;  %v5402_v22 = vmul.f32 %v5336_v40, %v9008_v62 }
 0x568   :  { %5434 = vadd.xlane.f32.xlu0 %v5433_v39  ;;  %5461 = vadd.xlane.f32.xlu1 %v5460_v7  ;;  %v5466_v7 = vadd.f32 %v5400_v56, %v5399_v37  ;;  %v5379_v39 = vmul.f32 %v5308_v63, %v9005_v16  ;;  %v5463_v37 = vadd.f32 %v5398_v20, %v5397_v10  ;;  %v8654_v20 = vld [vmem:[#allocation13 + $0xb8] sm:$0xff] }
 0x569   :  { %v5401_v56 = vmul.f32 %v5332_v30, %v9009_v2  ;;  %v5384_v16 = vmul.f32 %v5312_v59, %v9010_v14  ;;  %9036 = vst [vmem:[#allocation41_spill] sm:$0xff] %v8654_v20  ;;  %v5381_v10 = vmul.f32 %v5308_v63, %v9019_v18  ;;  %v9017_v62 = vunpack.c.h.bf16 %v8654_v20 }
 0x56b   :  { %v5469_v2 = vadd.f32 %v5402_v22, %v5401_v56  ;;  %v5442_v29 = vadd.f32 %v5384_v16, %v5383_v61  ;;  %v5408_v16 = vmul.f32 %v5344_v23, %v9017_v62 }
 0x56c   :  { %5458 = vadd.xlane.f32.xlu0 %v5457_v13  ;;  %5467 = vadd.xlane.f32.xlu1 %v5466_v7  ;;  %v8648_v13 = vld [vmem:[#allocation13 + $0xb0] sm:$0xff]  ;;  %v5436_v7 = vadd.f32 %v5380_v28, %v5379_v39  ;;  %v5382_v28 = vmul.f32 %v5312_v59, %v9018_v53  ;;  %v9016_v39 = vunpack.c.l.bf16 %v8654_v20 }
 0x56d   :  { %9035 = vst [vmem:[#allocation40_spill] sm:$0xff] %v8648_v13  ;;  %v9012_v30 = vunpack.c.l.bf16 %v8648_v13  ;;  %v9013_v40 = vunpack.c.h.bf16 %v8648_v13 }
 0x56e   :  { %v5439_v14 = vadd.f32 %v5382_v28, %v5381_v10  ;;  %v5407_v22 = vmul.f32 %v5340_v25, %v9016_v39 }
 0x56f   :  { %v5405_v63 = vmul.f32 %v5340_v25, %v9012_v30  ;;  %v5406_v59 = vmul.f32 %v5344_v23, %v9013_v40 }
 0x570   :  { %5464 = vadd.xlane.f32.xlu0 %v5463_v37  ;;  %5437 = vadd.xlane.f32.xlu1 %v5436_v7  ;;  %v5403_v37 = vmul.f32 %v5340_v25, %v9015_v57  ;;  %v5404_v7 = vmul.f32 %v5344_v23, %v9014_v60  ;;  %v5478_v61 = vadd.f32 %v5408_v16, %v5407_v22  ;;  %v8677_v23 = vand.u32 127, %v230_v32 }
 0x571   :  { %v5475_v56 = vadd.f32 %v5406_v59, %v5405_v63 }
 0x572   :  { %v5472_v8 = vadd.f32 %v5404_v7, %v5403_v37  ;;  %v5512_v63 = vadd.s32 4294967288, %v8677_v23  ;;  %v5519_v59 = vadd.s32 4294967280, %v8677_v23  ;;  %v5510_v32 = vsub.s32 %v8677_v23, %v8233_v41 }
 0x573   :  { %vm5483_vm14 = vcmp.lt.s32.totalorder %v8677_v23, 20 }
 0x574   :  { %5470 = vadd.xlane.f32.xlu0 %v5469_v2  ;;  %5443 = vadd.xlane.f32.xlu1 %v5442_v29 }
 0x578   :  { %5440 = vadd.xlane.f32.xlu0 %v5439_v14  ;;  %5473 = vadd.xlane.f32.xlu1 %v5472_v8 }
 0x57c   :  { %5476 = vadd.xlane.f32.xlu0 %v5475_v56  ;;  %5479 = vadd.xlane.f32.xlu1 %v5478_v61  ;;  %v8684_v56 = vsub.s32 %v5512_v63, %v8233_v41  ;;  %v8687_v61 = vsub.s32 %v5519_v59, %v8233_v41 }
 0x5dd   :  { %v5450_v2 = vpop.xlane.xlu1 %5449  ;;  %v5411_v10 = vpop.xlane.xlu0 %5410 }
 0x5de   :  { %v5511_v34 = vrot.slane %v5411_v10, %v5510_v32  ;;  %v5575_v10 = vrot.slane %v5450_v2, %v8684_v56 }
 0x5e1   :  { %v5414_v28 = vpop.xlane.xlu0 %5413  ;;  %v5420_v29 = vpop.xlane.xlu1 %5419 }
 0x5e2   :  { %v5516_v49 = vrot.slane %v5414_v28, %v8684_v56  ;;  %v5529_v44 = vrot.slane %v5420_v29, %v5510_v32 }
 0x5e5   :  { %v5417_v37 = vpop.xlane.xlu0 %5416  ;;  %v5423_v7 = vpop.xlane.xlu1 %5422 }
 0x5e6   :  { %v5533_v18 = vrot.slane %v5423_v7, %v8684_v56  ;;  %v5523_v63 = vrot.slane %v5417_v37, %v8687_v61 }
 0x5e8   :  { %v5534_v41 = vsel %vm5517_vm5, %v5533_v18, %v5529_v44 }
 0x5e9   :  { %v5447_v30 = vpop.xlane.xlu0 %5446  ;;  %v5426_v40 = vpop.xlane.xlu1 %5425 }
 0x5ea   :  { %v5538_v3 = vrot.slane %v5426_v40, %v8687_v61  ;;  %v5571_v7 = vrot.slane %v5447_v30, %v5510_v32  ;;  %v5518_v40 = vsel %vm5517_vm5, %v5516_v49, %v5511_v34 }
 0x5ec   :  { %v5539_v29 = vsel %vm5524_vm6, %v5538_v3, %v5534_v41  ;;  %v5576_v3 = vsel %vm5517_vm5, %v5575_v10, %v5571_v7 }
 0x5ed   :  { %v5453_v60 = vpop.xlane.xlu0 %5452  ;;  %v5432_v57 = vpop.xlane.xlu1 %5431 }
 0x5ee   :  { %v5547_v28 = vrot.slane %v5432_v57, %v8684_v56  ;;  %v5580_v37 = vrot.slane %v5453_v60, %v8687_v61 }
 0x5f1   :  { %v5429_v25 = vpop.xlane.xlu0 %5428  ;;  %v5456_v39 = vpop.xlane.xlu1 %5455 }
 0x5f2   :  { %v5543_v42 = vrot.slane %v5429_v25, %v5510_v32  ;;  %v5585_v18 = vrot.slane %v5456_v39, %v5510_v32 }
 0x5f4   :  { %v5548_v13 = vsel %vm5517_vm5, %v5547_v28, %v5543_v42 }
 0x5f5   :  { %v5435_v14 = vpop.xlane.xlu0 %5434  ;;  %v8679_v8 = vpop.xlane.xlu1 %5461 }
 0x5f6   :  { %v5552_v20 = vrot.slane %v5435_v14, %v8687_v61  ;;  %v5525_v14 = vsel %vm5524_vm6, %v5523_v63, %v5518_v40 }
 0x5f7   :  { %v5625_v60 = vsel %vm5624_vm7, %v5539_v29, %v5525_v14 }
 0x5f8   :  { %v5553_v57 = vsel %vm5524_vm6, %v5552_v20, %v5548_v13 }
 0x5f9   :  { %v5459_v22 = vpop.xlane.xlu0 %5458  ;;  %v5468_v16 = vpop.xlane.xlu1 %5467  ;;  %v5627_v13 = vsel %vm5626_vm8, %v5553_v57, %v5625_v60 }
 0x5fa   :  { %v5589_v25 = vrot.slane %v5459_v22, %v8684_v56  ;;  %v5581_v22 = vsel %vm5524_vm6, %v5580_v37, %v5576_v3 }
 0x5fc   :  { %v5590_v42 = vsel %vm5517_vm5, %v5589_v25, %v5585_v18 }
 0x5fd   :  { %v5465_v62 = vpop.xlane.xlu0 %5464  ;;  %v5438_v53 = vpop.xlane.xlu1 %5437 }
 0x5fe   :  { %v5557_v30 = vrot.slane %v5438_v53, %v5510_v32  ;;  %v5599_v49 = vrot.slane %v5465_v62, %v5510_v32  ;;  %v5603_v53 = vrot.slane %v5468_v16, %v8684_v56 }
 0x600   :  { %v5604_v29 = vsel %vm5517_vm5, %v5603_v53, %v5599_v49  ;;  %v7438_v53 = vld [vmem:[#allocation23 + $0x40] ss:$8 sps:$4 sm:$0xff]  }
 0x601   :  { %v5471_v59 = vpop.xlane.xlu0 %5470  ;;  %v5444_v35 = vpop.xlane.xlu1 %5443 }
 0x602   :  { %v5566_v2 = vrot.slane %v5444_v35, %v8687_v61  ;;  %v5608_v63 = vrot.slane %v5471_v59, %v8687_v61 }
 0x605   :  { %v5441_v27 = vpop.xlane.xlu0 %5440  ;;  %v5474_v44 = vpop.xlane.xlu1 %5473 }
 0x606   :  { %v5561_v34 = vrot.slane %v5441_v27, %v8684_v56  ;;  %v5594_v27 = vrot.slane %v8679_v8, %v8687_v61  ;;  %v5613_v7 = vrot.slane %v5474_v44, %v5510_v32  ;;  %v5609_v8 = vsel %vm5524_vm6, %v5608_v63, %v5604_v29  ;;  %v7428_v63 = vld [vmem:[#allocation23 + $0x4] ss:$8 sps:$4 sm:$0xff]   ;;  %v7455_v29 = vld [vmem:[#allocation23 + $0x94] ss:$8 sps:$4 sm:$0xff]  }
 0x607   :  { %6432 = vmatprep.subr.bf16.mxu0 %v7428_v63  ;;  %v9038_v63 = vunpack.c.h.bf16 %v8450_v26 }
 0x608   :  { %v5562_v39 = vsel %vm5517_vm5, %v5561_v34, %v5557_v30  ;;  %v5595_v40 = vsel %vm5524_vm6, %v5594_v27, %v5590_v42  ;;  %v7440_v27 = vld [vmem:[#allocation23 + $0x44] ss:$8 sps:$4 sm:$0xff]  }
 0x609   :  { %v5567_v20 = vsel %vm5524_vm6, %v5566_v2, %v5562_v39  ;;  %v5477_v62 = vpop.xlane.xlu0 %5476  ;;  %v5480_v41 = vpop.xlane.xlu1 %5479  ;;  %v7431_v39 = vld [vmem:[#allocation23 + $0x14] ss:$8 sps:$4 sm:$0xff]  }
 0x60a   :  { %v5629_v35 = vsel %vm5628_vm9, %v5567_v20, %v5627_v13  ;;  %v5617_v28 = vrot.slane %v5477_v62, %v8684_v56  ;;  %v5622_v59 = vrot.slane %v5480_v41, %v8687_v61  ;;  %v7437_v13 = vld [vmem:[#allocation23 + $0x34] ss:$8 sps:$4 sm:$0xff]   ;;  %v7441_v62 = vld [vmem:[#allocation23 + $0x50] ss:$8 sps:$4 sm:$0xff]   ;;  %v7444_v41 = vld [vmem:[#allocation23 + $0x60] ss:$8 sps:$4 sm:$0xff]  }
 0x60b   :  { %v5631_v37 = vsel %vm5630_vm10, %v5581_v22, %v5629_v35  ;;  %v7443_v20 = vld [vmem:[#allocation23 + $0x54] ss:$8 sps:$4 sm:$0xff]   ;;  %v7446_v35 = vld [vmem:[#allocation23 + $0x64] ss:$8 sps:$4 sm:$0xff]  }
 0x60c   :  { %v5618_v16 = vsel %vm5517_vm5, %v5617_v28, %v5613_v7  ;;  %v5633_v25 = vsel %vm5632_vm11, %v5595_v40, %v5631_v37  ;;  %v7449_v7 = vld [vmem:[#allocation23 + $0x74] ss:$8 sps:$4 sm:$0xff]   ;;  %v7447_v28 = vld [vmem:[#allocation23 + $0x70] ss:$8 sps:$4 sm:$0xff]   ;;  %v7450_v40 = vld [vmem:[#allocation23 + $0x80] ss:$8 sps:$4 sm:$0xff]  }
 0x60d   :  { %v5623_v32 = vsel %vm5524_vm6, %v5622_v59, %v5618_v16  ;;  %v5635_v56 = vsel %vm5634_vm12, %v5609_v8, %v5633_v25  ;;  %v7452_v59 = vld [vmem:[#allocation23 + $0x84] ss:$8 sps:$4 sm:$0xff]   ;;  %v7453_v37 = vld [vmem:[#allocation23 + $0x90] ss:$8 sps:$4 sm:$0xff]   ;;  %v7456_v16 = vld [vmem:[#allocation23 + $0xa0] ss:$8 sps:$4 sm:$0xff]  }
 0x60e   :  { %v5637_v61 = vsel %vm5636_vm13, %v5623_v32, %v5635_v56  ;;  %v7458_v8 = vld [vmem:[#allocation23 + $0xa4] ss:$8 sps:$4 sm:$0xff]   ;;  %v7459_v25 = vld [vmem:[#allocation23 + $0xb0] ss:$8 sps:$4 sm:$0xff]   ;;  %v7461_v32 = vld [vmem:[#allocation23 + $0xb4] ss:$8 sps:$4 sm:$0xff]  }
 0x60f   :  { %v5639_v10 = vsel %vm5483_vm14, %v5637_v61, -1e+30  ;;  %v7464_v56 = vld [vmem:[#allocation23 + $0xc4] ss:$8 sps:$4 sm:$0xff]   ;;  %v7462_v61 = vld [vmem:[#allocation23 + $0xc0] ss:$8 sps:$4 sm:$0xff]  }
 0x610   :  { %v5641_v14 = vsel %vm5640_vm15, %v5639_v10, -inf }
 0x611   :  { %5642 = vmax.xlane.f32.xlu0 %v5641_v14  ;;  %v7465_v14 = vld [vmem:[#allocation23 + $0xd0] ss:$8 sps:$4 sm:$0xff]  }
 0x69e   :  { %v5643_v44 = vpop.xlane.xlu0 %5642 }
 0x69f   :  { %v5644_v18 = vsub.f32 %v5639_v10, %v5643_v44  ;;  %v7467_v10 = vld [vmem:[#allocation23 + $0xd4] ss:$8 sps:$4 sm:$0xff]   ;;  %v7470_v44 = vld [vmem:[#allocation23 + $0xe4] ss:$8 sps:$4 sm:$0xff]  }
 0x6a1   :  { %v5645_v57 = vmul.f32 1.442695, %v5644_v18  ;;  %v7468_v18 = vld [vmem:[#allocation23 + $0xe0] ss:$8 sps:$4 sm:$0xff]  }
 0x6a3   :  { %7586 = vpow2.f32 %v5645_v57  ;;  %v7473_v57 = vld [vmem:[#allocation23 + $0xf4] ss:$8 sps:$4 sm:$0xff]  }
 0x6ad   :  { %v7587_v30 = vpop.eup %7586 }
 0x6ae   :  { %v5647_v34 = vsel %vm5640_vm15, %v7587_v30, 0.0  ;;  %v5668_v23 = vrot.slane %v7587_v30, %v8242_v50  ;;  %v5653_v3 = vrot.slane %v7587_v30, %v8281_v0  ;;  %v5698_v60 = vrot.slane %v7587_v30, %v8358_v48 }
 0x6af   :  { %5648 = vadd.xlane.f32.xlu1 %v5647_v34  ;;  %v5713_v49 = vrot.slane %v7587_v30, %v8367_v15  ;;  %v5683_v2 = vrot.slane %v7587_v30, %v8355_v4  ;;  %v5728_v22 = vrot.slane %v7587_v30, %v8370_v17  ;;  %v5743_v42 = vrot.slane %v7587_v30, %v8383_v5  ;;  %v7426_v15 = vld [vmem:[#allocation23] ss:$8 sps:$4 sm:$0xff]   ;;  %v7429_v4 = vld [vmem:[#allocation23 + $0x10] ss:$8 sps:$4 sm:$0xff]   ;;  %v7434_v17 = vld [vmem:[#allocation23 + $0x24] ss:$8 sps:$4 sm:$0xff]  }
 0x6b0   :  { %5670 = vbcast.lane.b32.xlu0 %v5668_v23, 256  ;;  %v5758_v48 = vrot.slane %v7587_v30, %v8386_v55  ;;  %6433 = vmatpush1.bf16.msra.mxu0 %v7426_v15  ;;  %v7432_v5 = vld [vmem:[#allocation23 + $0x20] ss:$8 sps:$4 sm:$0xff]   ;;  %v7435_v55 = vld [vmem:[#allocation23 + $0x30] ss:$8 sps:$4 sm:$0xff]  }
 0x6b1   :  { %6434 = vmatprep.subr.bf16.mxu0 %v7431_v39  ;;  %v7471_v30 = vld [vmem:[#allocation23 + $0xf0] ss:$8 sps:$4 sm:$0xff]   ;;  %v7476_v34 = vld [vmem:[#allocation23 + $0x104] ss:$8 sps:$4 sm:$0xff]  }
 0x6b4   :  { %5655 = vbcast.lane.b32.xlu0 %v5653_v3, 256  ;;  %6435 = vmatpush1.bf16.msra.mxu0 %v7429_v4  ;;  %v9039_v4 = vunpack.c.l.bf16 %v8465_v33 }
 0x6b5   :  { %6436 = vmatprep.subr.bf16.mxu0 %v7434_v17 }
 0x6b8   :  { %5678 = vbcast.lane.b32.xlu0 %v5668_v23, 272  ;;  %6437 = vmatpush1.bf16.msra.mxu0 %v7432_v5  ;;  %v9040_v5 = vunpack.c.h.bf16 %v8465_v33 }
 0x6b9   :  { %6438 = vmatprep.subr.bf16.mxu0 %v7437_v13 }
 0x6bc   :  { %5704 = vbcast.lane.b32.xlu0 %v5698_v60, 264  ;;  %6439 = vmatpush1.bf16.msra.mxu0 %v7435_v55 }
 0x6bd   :  { %6440 = vmatprep.subr.bf16.mxu0 %v7440_v27  ;;  %v9041_v27 = vunpack.c.l.bf16 %v8491_v46 }
 0x6c0   :  { %5715 = vbcast.lane.b32.xlu0 %v5713_v49, 256  ;;  %5674 = vbcast.lane.b32.xlu1 %v5668_v23, 264 }
 0x6c1   :  { %6441 = vmatpush1.bf16.msra.mxu0 %v7438_v53 }
 0x6c2   :  { %6442 = vmatprep.subr.bf16.mxu0 %v7443_v20 }
 0x6c4   :  { %5663 = vbcast.lane.b32.xlu0 %v5653_v3, 272  ;;  %5685 = vbcast.lane.b32.xlu1 %v5683_v2, 256 }
 0x6c5   :  { %6443 = vmatpush1.bf16.msra.mxu0 %v7441_v62 }
 0x6c6   :  { %6444 = vmatprep.subr.bf16.mxu0 %v7446_v35  ;;  %v9042_v35 = vunpack.c.h.bf16 %v8491_v46 }
 0x6c8   :  { %5730 = vbcast.lane.b32.xlu0 %v5728_v22, 256  ;;  %5689 = vbcast.lane.b32.xlu1 %v5683_v2, 264 }
 0x6c9   :  { %6445 = vmatpush1.bf16.msra.mxu0 %v7444_v41 }
 0x6ca   :  { %6446 = vmatprep.subr.bf16.mxu0 %v7449_v7 }
 0x6cc   :  { %5723 = vbcast.lane.b32.xlu0 %v5713_v49, 272  ;;  %5659 = vbcast.lane.b32.xlu1 %v5653_v3, 264 }
 0x6cd   :  { %6447 = vmatpush1.bf16.msra.mxu0 %v7447_v28 }
 0x6ce   :  { %6448 = vmatprep.subr.bf16.mxu0 %v7452_v59 }
 0x6d0   :  { %5749 = vbcast.lane.b32.xlu0 %v5743_v42, 264  ;;  %5700 = vbcast.lane.b32.xlu1 %v5698_v60, 256 }
 0x6d1   :  { %6449 = vmatpush1.bf16.msra.mxu0 %v7450_v40 }
 0x6d2   :  { %6450 = vmatprep.subr.bf16.mxu0 %v7455_v29 }
 0x6d4   :  { %5760 = vbcast.lane.b32.xlu0 %v5758_v48, 256  ;;  %5693 = vbcast.lane.b32.xlu1 %v5683_v2, 272 }
 0x6d5   :  { %6451 = vmatpush1.bf16.msra.mxu0 %v7453_v37  ;;  %v9043_v37 = vunpack.c.l.bf16 %v8431_v12 }
 0x6d6   :  { %6452 = vmatprep.subr.bf16.mxu0 %v7458_v8 }
 0x6d8   :  { %5753 = vbcast.lane.b32.xlu0 %v5743_v42, 272  ;;  %5719 = vbcast.lane.b32.xlu1 %v5713_v49, 264 }
 0x6d9   :  { %6453 = vmatpush1.bf16.msra.mxu0 %v7456_v16  ;;  %v9044_v16 = vunpack.c.h.bf16 %v8431_v12  ;;  %v9049_v12 = vunpack.c.l.bf16 %v8437_v19 }
 0x6da   :  { %6454 = vmatprep.subr.bf16.mxu0 %v7461_v32  ;;  %v9045_v32 = vunpack.c.l.bf16 %v8628_v58 }
 0x6dc   :  { %5708 = vbcast.lane.b32.xlu1 %v5698_v60, 272 }
 0x6dd   :  { %6455 = vmatpush1.bf16.msra.mxu0 %v7459_v25 }
 0x6de   :  { %6456 = vmatprep.subr.bf16.mxu0 %v7464_v56 }
 0x6e0   :  { %5734 = vbcast.lane.b32.xlu1 %v5728_v22, 264 }
 0x6e1   :  { %6457 = vmatpush1.bf16.msra.mxu0 %v7462_v61  ;;  %v9046_v61 = vunpack.c.h.bf16 %v8628_v58  ;;  %v9051_v58 = vunpack.c.l.bf16 %v8439_v21 }
 0x6e2   :  { %6458 = vmatprep.subr.bf16.mxu0 %v7467_v10 }
 0x6e4   :  { %5745 = vbcast.lane.b32.xlu1 %v5743_v42, 256 }
 0x6e5   :  { %6459 = vmatpush1.bf16.msra.mxu0 %v7465_v14 }
 0x6e6   :  { %6460 = vmatprep.subr.bf16.mxu0 %v7470_v44  ;;  %v9047_v44 = vunpack.c.l.bf16 %v8489_v45 }
 0x6e8   :  { %5738 = vbcast.lane.b32.xlu1 %v5728_v22, 272 }
 0x6e9   :  { %6461 = vmatpush1.bf16.msra.mxu0 %v7468_v18 }
 0x6ea   :  { %6462 = vmatprep.subr.bf16.mxu0 %v7473_v57  ;;  %v9048_v57 = vunpack.c.h.bf16 %v8489_v45  ;;  %v9054_v45 = vunpack.c.h.bf16 %v8538_v52 }
 0x6ec   :  { %5764 = vbcast.lane.b32.xlu1 %v5758_v48, 264 }
 0x6ed   :  { %6463 = vmatpush1.bf16.msra.mxu0 %v7471_v30 }
 0x6ee   :  { %6473 = vmatprep.subr.bf16.mxu0 %v7476_v34 }
 0x6f0   :  { %5768 = vbcast.lane.b32.xlu1 %v5758_v48, 272  ;;  %v9037_v48 = vunpack.c.l.bf16 %v8450_v26 }
 0x722   :  { %v5671_v23 = vpop.permute.xlu0 %5670 }
 0x723   :  { %v5776_v15 = vmul.f32 %v5671_v23, %v9037_v48  ;;  %v5777_v39 = vmul.f32 %v5671_v23, %v9038_v63  ;;  %v9050_v23 = vunpack.c.h.bf16 %v8437_v19  ;;  %v9053_v48 = vunpack.c.l.bf16 %v8538_v52 }
 0x726   :  { %v5656_v3 = vpop.permute.xlu0 %5655 }
 0x727   :  { %v5770_v8 = vmul.f32 %v5656_v3, %v9043_v37  ;;  %v5771_v25 = vmul.f32 %v5656_v3, %v9044_v16 }
 0x72a   :  { %v5679_v60 = vpop.permute.xlu0 %5678 }
 0x72b   :  { %v5780_v53 = vmul.f32 %v5679_v60, %v9041_v27  ;;  %v5781_v7 = vmul.f32 %v5679_v60, %v9042_v35 }
 0x72e   :  { %v5705_v49 = vpop.permute.xlu0 %5704 }
 0x72f   :  { %v8760_v56 = vmul.f32 %v5705_v49, %v9045_v32  ;;  %v8764_v46 = vmul.f32 %v5705_v49, %v9046_v61  ;;  %v9052_v49 = vunpack.c.h.bf16 %v8439_v21  ;;  %v9058_v61 = vunpack.c.h.bf16 %v8536_v51 }
 0x732   :  { %v5716_v2 = vpop.permute.xlu0 %5715 }
 0x733   :  { %v8768_v18 = vmul.f32 %v5716_v2, %v9047_v44  ;;  %v8772_v30 = vmul.f32 %v5716_v2, %v9048_v57  ;;  %v9059_v44 = vunpack.c.l.bf16 %v8504_v6 }
 0x736   :  { %v5664_v55 = vpop.permute.xlu0 %5663 }
 0x737   :  { %v5774_v60 = vmul.f32 %v5664_v55, %v9051_v58 }
 0x73a   :  { %v5731_v26 = vpop.permute.xlu0 %5730 }
 0x73b   :  { %v8788_v2 = vmul.f32 %v5731_v26, %v9054_v45 }
 0x73c   :  { %v8740_v22 = vpop.xlane.xlu1 %5648 }
 0x73d   :  { %v5950_v21 = vrot.slane %v8740_v22, 4  ;;  %v5952_v52 = vrot.slane %v8740_v22, 6  ;;  %v5953_v35 = vrot.slane %v8740_v22, 7  ;;  %7588 = vrcp.f32 %v8740_v22 }
 0x73e   :  { %v5724_v63 = vpop.permute.xlu0 %5723 }
 0x73f   :  { %v5798_v57 = vmul.f32 %v5724_v63, %v9059_v44 }
 0x740   :  { %v5675_v42 = vpop.permute.xlu1 %5674 }
 0x741   :  { %v5778_v17 = vmul.f32 %v5675_v42, %v9039_v4  ;;  %v5779_v13 = vmul.f32 %v5675_v42, %v9040_v5  ;;  %v5775_v42 = vmul.f32 %v5664_v55, %v9052_v49  ;;  %v5948_v5 = vrot.slane %v8740_v22, 2 }
 0x742   :  { %v5750_v16 = vpop.permute.xlu0 %5749 }
 0x743   :  { %v5834_v20 = vadd.f32 %v5778_v17, %v5776_v15  ;;  %v5842_v62 = vadd.f32 %v5779_v13, %v5777_v39  ;;  %v8784_v15 = vmul.f32 %v5731_v26, %v9053_v48  ;;  %v5947_v39 = vrot.slane %v8740_v22, 1 }
 0x744   :  { %v5686_v41 = vpop.permute.xlu1 %5685  ;;  %v5949_v13 = vrot.slane %v8740_v22, 3 }
 0x745   :  { %v5835_v28 = vadd.f32 %v5834_v20, %v5780_v53  ;;  %v5843_v59 = vadd.f32 %v5842_v62, %v5781_v7  ;;  %v5951_v53 = vrot.slane %v8740_v22, 5  ;;  %v9055_v7 = vunpack.c.l.bf16 %v8513_v9 }
 0x746   :  { %7590 = vrcp.f32 %v5947_v39 }
 0x747   :  { %v5836_v40 = vrot.slane %v5835_v28, 4  ;;  %v5844_v33 = vrot.slane %v5843_v59, 4  ;;  %7592 = vrcp.f32 %v5948_v5 }
 0x748   :  { %v5690_v29 = vpop.permute.xlu1 %5689  ;;  %7594 = vrcp.f32 %v5949_v13  ;;  %v9064_v13 = vunpack.c.l.bf16 %v8429_v54 }
 0x749   :  { %v5837_v10 = vadd.f32 %v5836_v40, %v5835_v28  ;;  %v5845_v4 = vadd.f32 %v5844_v33, %v5843_v59  ;;  %v5784_v28 = vmul.f32 %v5690_v29, %v9055_v7  ;;  %v9056_v59 = vunpack.c.h.bf16 %v8513_v9 }
 0x74a   :  { %7596 = vrcp.f32 %v5950_v21 }
 0x74b   :  { %v5838_v55 = vrot.slane %v5837_v10, 2  ;;  %v5785_v26 = vmul.f32 %v5690_v29, %v9056_v59  ;;  %v5846_v40 = vrot.slane %v5845_v4, 2  ;;  %7598 = vrcp.f32 %v5951_v53 }
 0x74c   :  { %v5660_v14 = vpop.permute.xlu1 %5659  ;;  %7600 = vrcp.f32 %v5952_v52 }
 0x74d   :  { %v5772_v34 = vmul.f32 %v5660_v14, %v9049_v12  ;;  %v5773_v3 = vmul.f32 %v5660_v14, %v9050_v23  ;;  %v5839_v33 = vadd.f32 %v5838_v55, %v5837_v10  ;;  %v5783_v14 = vmul.f32 %v5686_v41, %v9058_v61 }
 0x74e   :  { %v9060_v23 = vunpack.c.l.bf16 %v8552_v11  ;;  %v9061_v10 = vunpack.c.h.bf16 %v8552_v11  ;;  %v9065_v11 = vunpack.c.h.bf16 %v8429_v54  ;;  %7602 = vrcp.f32 %v5953_v35 }
 0x74f   :  { %v5818_v19 = vadd.f32 %v5772_v34, %v5770_v8  ;;  %v5826_v17 = vadd.f32 %v5773_v3, %v5771_v25  ;;  %v9057_v25 = vunpack.c.l.bf16 %v8536_v51  ;;  %v5858_v34 = vadd.f32 %v5785_v26, %v5783_v14 }
 0x750   :  { %v5701_v27 = vpop.permute.xlu1 %5700 }
 0x751   :  { %v5819_v20 = vadd.f32 %v5818_v19, %v5774_v60  ;;  %v5827_v62 = vadd.f32 %v5826_v17, %v5775_v42  ;;  %v5782_v32 = vmul.f32 %v5686_v41, %v9057_v25  ;;  %v9062_v60 = vunpack.c.h.bf16 %v8504_v6 }
 0x752   :  { %v5847_v41 = vadd.f32 %v5846_v40, %v5845_v4  ;;  %v5840_v42 = vrot.slane %v5839_v33, 1  ;;  %v9063_v17 = vunpack.c.l.bf16 %v8596_v38  ;;  %v9066_v6 = vunpack.c.l.bf16 %v8574_v43  ;;  %v5761_v4 = vpop.permute.xlu0 %5760  ;;  %v7589_v40 = vpop.eup %7588 }
 0x753   :  { %v5820_v37 = vrot.slane %v5819_v20, 4  ;;  %v5828_v8 = vrot.slane %v5827_v62, 4  ;;  %v5850_v12 = vadd.f32 %v5784_v28, %v5782_v32  ;;  %v5799_v51 = vmul.f32 %v5724_v63, %v9062_v60  ;;  %v7591_v61 = vpop.eup %7590 }
 0x754   :  { %v5694_v22 = vpop.permute.xlu1 %5693  ;;  %v5788_v5 = vmul.f32 %v5701_v27, %v9063_v17  ;;  %v8822_v63 = vmul.f32 %v5750_v16, %v9066_v6  ;;  %v5848_v54 = vrot.slane %v5847_v41, 1  ;;  %v8829_v44 = vpop.eup %7592 }
 0x755   :  { %v5821_v9 = vadd.f32 %v5820_v37, %v5819_v20  ;;  %v5829_v29 = vadd.f32 %v5828_v8, %v5827_v62  ;;  %v5786_v3 = vmul.f32 %v5694_v22, %v9060_v23  ;;  %v5787_v58 = vmul.f32 %v5694_v22, %v9061_v10 }
 0x756   :  { %v9067_v20 = vunpack.c.h.bf16 %v8596_v38  ;;  %v5841_v37 = vadd.f32 %v5840_v42, %v5839_v33  ;;  %v5866_v14 = vadd.f32 %v8760_v56, %v5788_v5  ;;  %v9069_v33 = vunpack.c.h.bf16 %v8612_v36  ;;  %v5754_v10 = vpop.permute.xlu0 %5753 }
 0x757   :  { %v5822_v49 = vrot.slane %v5821_v9, 2  ;;  %v5830_v48 = vrot.slane %v5829_v29, 2  ;;  %v5851_v45 = vadd.f32 %v5850_v12, %v5786_v3  ;;  %v5859_v39 = vadd.f32 %v5858_v34, %v5787_v58 }
 0x758   :  { %v5720_v19 = vpop.permute.xlu1 %5719  ;;  %v5789_v62 = vmul.f32 %v5701_v27, %v9067_v20  ;;  %v9070_v34 = vunpack.c.h.bf16 %v8574_v43  ;;  %v5849_v3 = vadd.f32 %v5848_v54, %v5847_v41  ;;  %v5966_v42 = vmul.f32 %v7591_v61, %v5841_v37 }
 0x759   :  { %v5796_v55 = vmul.f32 %v5720_v19, %v9064_v13  ;;  %v5797_v21 = vmul.f32 %v5720_v19, %v9065_v11  ;;  %v5852_v7 = vrot.slane %v5851_v45, 4  ;;  %v5860_v28 = vrot.slane %v5859_v39, 4 }
 0x75a   :  { %v5823_v53 = vadd.f32 %v5822_v49, %v5821_v9  ;;  %v5831_v8 = vadd.f32 %v5830_v48, %v5829_v29  ;;  %v5874_v52 = vadd.f32 %v8764_v46, %v5789_v62  ;;  %v8836_v29 = vpop.eup %7594  ;;  %v5809_v56 = vmul.f32 %v5750_v16, %v9070_v34 }
 0x75b   :  { %v5882_v59 = vadd.f32 %v5796_v55, %v8768_v18  ;;  %v5890_v26 = vadd.f32 %v5797_v21, %v8772_v30  ;;  %v5853_v25 = vadd.f32 %v5852_v7, %v5851_v45  ;;  %v5861_v22 = vadd.f32 %v5860_v28, %v5859_v39  ;;  %v8840_v49 = vpop.eup %7596 }
 0x75c   :  { %v5709_v32 = vpop.permute.xlu1 %5708  ;;  %v9068_v18 = vunpack.c.l.bf16 %v8612_v36  ;;  %v5824_v23 = vrot.slane %v5823_v53, 1  ;;  %v5832_v58 = vrot.slane %v5831_v8, 1  ;;  %v9071_v36 = vunpack.c.l.bf16 %v8630_v24  ;;  %v8850_v17 = vpop.eup %7598 }
 0x75d   :  { %v5883_v38 = vadd.f32 %v5882_v59, %v5798_v57  ;;  %v5891_v27 = vadd.f32 %v5890_v26, %v5799_v51  ;;  %v5854_v9 = vrot.slane %v5853_v25, 2  ;;  %v5793_v12 = vmul.f32 %v5709_v32, %v9069_v33  ;;  %v8858_v28 = vpop.eup %7600 }
 0x75e   :  { %v5792_v30 = vmul.f32 %v5709_v32, %v9068_v18  ;;  %v8844_v48 = vmul.f32 %v5761_v4, %v9071_v36  ;;  %v5862_v45 = vrot.slane %v5861_v22, 2  ;;  %v9072_v43 = vunpack.c.h.bf16 %v8630_v24 }
 0x75f   :  { %v5884_v57 = vrot.slane %v5883_v38, 4  ;;  %v5875_v46 = vadd.f32 %v5874_v52, %v5793_v12  ;;  %v5892_v35 = vrot.slane %v5891_v27, 4  ;;  %v5855_v39 = vadd.f32 %v5854_v9, %v5853_v25 }
 0x760   :  { %v5867_v60 = vadd.f32 %v5866_v14, %v5792_v30  ;;  %v5735_v51 = vpop.permute.xlu1 %5734  ;;  %v8848_v16 = vmul.f32 %v5761_v4, %v9072_v43  ;;  %v9073_v5 = vunpack.c.l.bf16 %v8610_v1  ;;  %v9074_v55 = vunpack.c.h.bf16 %v8610_v1 }
 0x761   :  { %v5876_v19 = vrot.slane %v5875_v46, 4  ;;  %v5825_v21 = vadd.f32 %v5824_v23, %v5823_v53  ;;  %v5885_v6 = vadd.f32 %v5884_v57, %v5883_v38  ;;  %v8856_v20 = vmul.f32 %v7591_v61, %v5849_v3  ;;  %v8872_v23 = vpop.eup %7602 }
 0x762   :  { %v5868_v41 = vrot.slane %v5867_v60, 4  ;;  %v5810_v13 = vmul.f32 %v5754_v10, %v9073_v5  ;;  %v5811_v11 = vmul.f32 %v5754_v10, %v9074_v55  ;;  %v5833_v62 = vadd.f32 %v5832_v58, %v5831_v8 }
 0x763   :  { %v5877_v24 = vadd.f32 %v5876_v19, %v5875_v46  ;;  %v6002_v59 = vrot.slane %v5966_v42, 7  ;;  %v5863_v26 = vadd.f32 %v5862_v45, %v5861_v22  ;;  %v5893_v37 = vadd.f32 %v5892_v35, %v5891_v27 }
 0x764   :  { %v5869_v7 = vadd.f32 %v5868_v41, %v5867_v60  ;;  %v5746_v4 = vpop.permute.xlu1 %5745  ;;  %v9075_v54 = vunpack.c.l.bf16 %v8594_v31  ;;  %v5856_v32 = vrot.slane %v5855_v39, 1  ;;  %v9076_v53 = vunpack.c.l.bf16 %v8567_v47 }
 0x765   :  { %v5878_v1 = vrot.slane %v5877_v24, 2  ;;  %v5963_v61 = vmul.f32 %v7589_v40, %v5825_v21  ;;  %v5886_v52 = vrot.slane %v5885_v6, 2  ;;  %v9077_v8 = vunpack.c.h.bf16 %v8594_v31 }
 0x766   :  { %v5806_v25 = vmul.f32 %v5746_v4, %v9075_v54  ;;  %v5870_v14 = vrot.slane %v5869_v7, 2  ;;  %v5802_v38 = vmul.f32 %v5735_v51, %v9076_v53  ;;  %v6016_v30 = vrot.slane %v8856_v20, 7 }
 0x767   :  { %v5807_v9 = vmul.f32 %v5746_v4, %v9077_v8  ;;  %v8868_v22 = vmul.f32 %v7589_v40, %v5833_v62  ;;  %v9078_v33 = vunpack.c.h.bf16 %v8567_v47  ;;  %v5864_v57 = vrot.slane %v5863_v26, 1 }
 0x768   :  { %v5914_v18 = vadd.f32 %v8822_v63, %v5806_v25  ;;  %v5871_v27 = vadd.f32 %v5870_v14, %v5869_v7  ;;  %v5739_v34 = vpop.permute.xlu1 %5738  ;;  %v5879_v3 = vadd.f32 %v5878_v1, %v5877_v24  ;;  %v5857_v60 = vadd.f32 %v5856_v32, %v5855_v39  ;;  %v9079_v63 = vld [vmem:[#allocation39_spill] sm:$0xff] }
 0x769   :  { %v5803_v12 = vmul.f32 %v5735_v51, %v9078_v33  ;;  %v5922_v58 = vadd.f32 %v5809_v56, %v5807_v9  ;;  %v5894_v31 = vrot.slane %v5893_v37, 2  ;;  %v5898_v46 = vadd.f32 %v5802_v38, %v8784_v15 }
 0x76a   :  { %v5915_v10 = vadd.f32 %v5914_v18, %v5810_v13  ;;  %v9080_v42 = vunpack.c.l.bf16 %v9079_v63  ;;  %v6003_v40 = vsel %vm5624_vm7, %v6002_v59, %v5963_v61  ;;  %v5887_v45 = vadd.f32 %v5886_v52, %v5885_v6  ;;  %v9085_v18 = vld [vmem:[#allocation41_spill] sm:$0xff] }
 0x76b   :  { %v5923_v47 = vadd.f32 %v5922_v58, %v5811_v11  ;;  %v5872_v51 = vrot.slane %v5871_v27, 1  ;;  %v5906_v43 = vadd.f32 %v5803_v12, %v8788_v2  ;;  %v9081_v41 = vunpack.c.h.bf16 %v9079_v63  ;;  %v9082_v11 = vld [vmem:[#allocation40_spill] sm:$0xff] }
 0x76c   :  { %v5804_v36 = vmul.f32 %v5739_v34, %v9080_v42  ;;  %v5916_v35 = vrot.slane %v5915_v10, 4  ;;  %v5765_v56 = vpop.permute.xlu1 %5764  ;;  %v5865_v39 = vadd.f32 %v5864_v57, %v5863_v26  ;;  %v5880_v13 = vrot.slane %v5879_v3, 1 }
 0x76d   :  { %v5805_v19 = vmul.f32 %v5739_v34, %v9081_v41  ;;  %v5924_v15 = vrot.slane %v5923_v47, 4  ;;  %v5969_v21 = vmul.f32 %v8829_v44, %v5857_v60  ;;  %v5895_v62 = vadd.f32 %v5894_v31, %v5893_v37 }
 0x76e   :  { %v5899_v5 = vadd.f32 %v5898_v46, %v5804_v36  ;;  %v5917_v55 = vadd.f32 %v5916_v35, %v5915_v10  ;;  %v9083_v59 = vunpack.c.l.bf16 %v9082_v11  ;;  %v9084_v2 = vunpack.c.h.bf16 %v9082_v11 }
 0x76f   :  { %v5907_v24 = vadd.f32 %v5906_v43, %v5805_v19  ;;  %v5925_v4 = vadd.f32 %v5924_v15, %v5923_v47  ;;  %v5888_v32 = vrot.slane %v5887_v45, 1  ;;  %v5873_v14 = vadd.f32 %v5872_v51, %v5871_v27 }
 0x770   :  { %v5900_v7 = vrot.slane %v5899_v5, 4  ;;  %v5918_v6 = vrot.slane %v5917_v55, 2  ;;  %v5814_v54 = vmul.f32 %v5765_v56, %v9083_v59  ;;  %v5815_v25 = vmul.f32 %v5765_v56, %v9084_v2  ;;  %v5769_v53 = vpop.permute.xlu1 %5768 }
 0x771   :  { %v5908_v26 = vrot.slane %v5907_v24, 4  ;;  %v5881_v38 = vadd.f32 %v5880_v13, %v5879_v3  ;;  %v5926_v61 = vrot.slane %v5925_v4, 2  ;;  %v9086_v33 = vunpack.c.l.bf16 %v9085_v18 }
 0x772   :  { %v5901_v1 = vadd.f32 %v5900_v7, %v5899_v5  ;;  %v5930_v52 = vadd.f32 %v5814_v54, %v8844_v48  ;;  %v5938_v37 = vadd.f32 %v5815_v25, %v8848_v16  ;;  %v9087_v34 = vunpack.c.h.bf16 %v9085_v18 }
 0x773   :  { %v5909_v9 = vadd.f32 %v5908_v26, %v5907_v24  ;;  %v5816_v12 = vmul.f32 %v5769_v53, %v9086_v33  ;;  %v5970_v10 = vmul.f32 %v8829_v44, %v5865_v39  ;;  %v5896_v27 = vrot.slane %v5895_v62, 1 }
 0x774   :  { %v5902_v8 = vrot.slane %v5901_v1, 2  ;;  %v5817_v57 = vmul.f32 %v5769_v53, %v9087_v34  ;;  %v5919_v58 = vadd.f32 %v5918_v6, %v5917_v55  ;;  %v5927_v60 = vadd.f32 %v5926_v61, %v5925_v4 }
 0x775   :  { %v5910_v3 = vrot.slane %v5909_v9, 2  ;;  %v5931_v46 = vadd.f32 %v5930_v52, %v5816_v12  ;;  %v6004_v48 = vrot.slane %v5969_v21, 6  ;;  %v5889_v42 = vadd.f32 %v5888_v32, %v5887_v45 }
 0x776   :  { %v5903_v31 = vadd.f32 %v5902_v8, %v5901_v1  ;;  %v5939_v63 = vadd.f32 %v5938_v37, %v5817_v57  ;;  %v5972_v16 = vmul.f32 %v8836_v29, %v5873_v14  ;;  %v5973_v36 = vmul.f32 %v8836_v29, %v5881_v38 }
 0x777   :  { %v5911_v47 = vadd.f32 %v5910_v3, %v5909_v9  ;;  %v5932_v51 = vrot.slane %v5931_v46, 4  ;;  %v6018_v41 = vrot.slane %v5970_v10, 6  ;;  %v5897_v19 = vadd.f32 %v5896_v27, %v5895_v62 }
 0x778   :  { %v5904_v35 = vrot.slane %v5903_v31, 1  ;;  %v5940_v43 = vrot.slane %v5939_v63, 4  ;;  %v5920_v44 = vrot.slane %v5919_v58, 1  ;;  %v5928_v5 = vrot.slane %v5927_v60, 1 }
 0x779   :  { %v5912_v39 = vrot.slane %v5911_v47, 1  ;;  %v5933_v13 = vadd.f32 %v5932_v51, %v5931_v46  ;;  %v6005_v15 = vsel %vm5626_vm8, %v6004_v48, %v6003_v40  ;;  %v5975_v45 = vmul.f32 %v8840_v49, %v5889_v42  ;;  %v7474_v46 = vld [vmem:[#allocation23 + $0x100] ss:$8 sps:$4 sm:$0xff]   ;;  %v7483_v51 = vld [vmem:[#allocation23 + $0x130] ss:$8 sps:$4 sm:$0xff]  }
 0x77a   :  { %v5905_v56 = vadd.f32 %v5904_v35, %v5903_v31  ;;  %v5941_v55 = vadd.f32 %v5940_v43, %v5939_v63  ;;  %v6006_v21 = vrot.slane %v5972_v16, 5  ;;  %v6020_v7 = vrot.slane %v5973_v36, 5  ;;  %v7608_v48 = vld [vmem:[#allocation27 + $0x18] sm:$0xff] }
 0x77b   :  { %v5913_v24 = vadd.f32 %v5912_v39, %v5911_v47  ;;  %v5934_v6 = vrot.slane %v5933_v13, 2  ;;  %v5976_v11 = vmul.f32 %v8840_v49, %v5897_v19  ;;  %v5921_v62 = vadd.f32 %v5920_v44, %v5919_v58  ;;  %v7477_v16 = vld [vmem:[#allocation23 + $0x110] ss:$8 sps:$4 sm:$0xff]   ;;  %v7482_v36 = vld [vmem:[#allocation23 + $0x124] ss:$8 sps:$4 sm:$0xff]  }
 0x77c   :  { %v5978_v29 = vmul.f32 %v8850_v17, %v5905_v56  ;;  %v5942_v4 = vrot.slane %v5941_v55, 2  ;;  %v5929_v59 = vadd.f32 %v5928_v5, %v5927_v60  ;;  %v6017_v54 = vsel %vm5624_vm7, %v6016_v30, %v8868_v22  ;;  %v7480_v35 = vld [vmem:[#allocation23 + $0x120] ss:$8 sps:$4 sm:$0xff]   ;;  %v7485_v47 = vld [vmem:[#allocation23 + $0x134] ss:$8 sps:$4 sm:$0xff]  }
 0x77d   :  { %v5979_v40 = vmul.f32 %v8850_v17, %v5913_v24  ;;  %v5935_v2 = vadd.f32 %v5934_v6, %v5933_v13  ;;  %v6019_v32 = vsel %vm5626_vm8, %v6018_v41, %v6017_v54  ;;  %v6007_v1 = vsel %vm5628_vm9, %v6006_v21, %v6005_v15  ;;  %v7488_v43 = vld [vmem:[#allocation23 + $0x144] ss:$8 sps:$4 sm:$0xff]   ;;  %v7486_v41 = vld [vmem:[#allocation23 + $0x140] ss:$8 sps:$4 sm:$0xff]   ;;  %v7491_v19 = vld [vmem:[#allocation23 + $0x154] ss:$8 sps:$4 sm:$0xff]  }
 0x77e   :  { %v5943_v25 = vadd.f32 %v5942_v4, %v5941_v55  ;;  %v6021_v14 = vsel %vm5628_vm9, %v6020_v7, %v6019_v32  ;;  %v6010_v26 = vrot.slane %v5978_v29, 3  ;;  %v6008_v61 = vrot.slane %v5975_v45, 4  ;;  %v7489_v44 = vld [vmem:[#allocation23 + $0x150] ss:$8 sps:$4 sm:$0xff]   ;;  %v7494_v5 = vld [vmem:[#allocation23 + $0x164] ss:$8 sps:$4 sm:$0xff]  }
 0x77f   :  { %v6024_v53 = vrot.slane %v5979_v40, 3  ;;  %v5936_v49 = vrot.slane %v5935_v2, 1  ;;  %v6022_v52 = vrot.slane %v5976_v11, 4  ;;  %v5981_v20 = vmul.f32 %v8858_v28, %v5921_v62  ;;  %v7492_v56 = vld [vmem:[#allocation23 + $0x160] ss:$8 sps:$4 sm:$0xff]  }
 0x780   :  { %v5944_v38 = vrot.slane %v5943_v25, 1  ;;  %v5982_v30 = vmul.f32 %v8858_v28, %v5929_v59  ;;  %v6009_v8 = vsel %vm5630_vm10, %v6008_v61, %v6007_v1  ;;  %v6035_v42 = vpack.c.bf16 %v7608_v48, %v7608_v48  ;;  %v7497_v39 = vld [vmem:[#allocation23 + $0x174] ss:$8 sps:$4 sm:$0xff]   ;;  %v7495_v13 = vld [vmem:[#allocation23 + $0x170] ss:$8 sps:$4 sm:$0xff]   ;;  %v7609_v32 = vld [vmem:[#allocation27 + $0x10] sm:$0xff] }
 0x781   :  { %v5937_v22 = vadd.f32 %v5936_v49, %v5935_v2  ;;  %v6023_v37 = vsel %vm5630_vm10, %v6022_v52, %v6021_v14  ;;  %v6011_v12 = vsel %vm5632_vm11, %v6010_v26, %v6009_v8  ;;  %v6012_v34 = vrot.slane %v5981_v20, 2  ;;  %v7500_v55 = vld [vmem:[#allocation23 + $0x184] ss:$8 sps:$4 sm:$0xff]   ;;  %v7498_v15 = vld [vmem:[#allocation23 + $0x180] ss:$8 sps:$4 sm:$0xff]  }
 0x782   :  { %v5945_v17 = vadd.f32 %v5944_v38, %v5943_v25  ;;  %v6025_v33 = vsel %vm5632_vm11, %v6024_v53, %v6023_v37  ;;  %v6026_v57 = vrot.slane %v5982_v30, 2  ;;  %v7503_v45 = vld [vmem:[#allocation23 + $0x194] ss:$8 sps:$4 sm:$0xff]   ;;  %v7501_v21 = vld [vmem:[#allocation23 + $0x190] ss:$8 sps:$4 sm:$0xff]   ;;  %v6034_v14 = vpack.c.bf16 %v7609_v32, %v7609_v32 }
 0x783   :  { %v5984_v9 = vmul.f32 %v8872_v23, %v5937_v22  ;;  %v6013_v58 = vsel %vm5634_vm12, %v6012_v34, %v6011_v12  ;;  %v7506_v7 = vld [vmem:[#allocation23 + $0x1a4] ss:$8 sps:$4 sm:$0xff]   ;;  %v7504_v24 = vld [vmem:[#allocation23 + $0x1a0] ss:$8 sps:$4 sm:$0xff]   ;;  %v7509_v29 = vld [vmem:[#allocation23 + $0x1b4] ss:$8 sps:$4 sm:$0xff]  }
 0x784   :  { %v5985_v18 = vmul.f32 %v8872_v23, %v5945_v17  ;;  %v6027_v28 = vsel %vm5634_vm12, %v6026_v57, %v6025_v33  ;;  %v7479_v23 = vld [vmem:[#allocation23 + $0x114] ss:$8 sps:$4 sm:$0xff]   ;;  %v7507_v6 = vld [vmem:[#allocation23 + $0x1b0] ss:$8 sps:$4 sm:$0xff]   ;;  %v7512_v4 = vld [vmem:[#allocation23 + $0x1c4] ss:$8 sps:$4 sm:$0xff]  }
 0x785   :  { %v6014_v10 = vrot.slane %v5984_v9, 1  ;;  %v7510_v11 = vld [vmem:[#allocation23 + $0x1c0] ss:$8 sps:$4 sm:$0xff]   ;;  %v7515_v62 = vld [vmem:[#allocation23 + $0x1d4] ss:$8 sps:$4 sm:$0xff]  }
 0x786   :  { %v6028_v27 = vrot.slane %v5985_v18, 1  ;;  %v7513_v59 = vld [vmem:[#allocation23 + $0x1d0] ss:$8 sps:$4 sm:$0xff]   ;;  %v7518_v54 = vld [vmem:[#allocation23 + $0x1e4] ss:$8 sps:$4 sm:$0xff]  }
 0x787   :  { %v6015_v31 = vsel %vm5636_vm13, %v6014_v10, %v6013_v58  ;;  %v7516_v40 = vld [vmem:[#allocation23 + $0x1e0] ss:$8 sps:$4 sm:$0xff]   ;;  %v7521_v2 = vld [vmem:[#allocation23 + $0x1f4] ss:$8 sps:$4 sm:$0xff]   ;;  %v7519_v25 = vld [vmem:[#allocation23 + $0x1f0] ss:$8 sps:$4 sm:$0xff]  }
 0x788   :  { %v6029_v60 = vsel %vm5636_vm13, %v6028_v27, %v6027_v28  ;;  %v6032_v63 = vpack.c.bf16 %v6015_v31, %v6015_v31 }
 0x789   :  { %v6033_v3 = vpack.c.bf16 %v6029_v60, %v6029_v60 }
 0x78b   :  { %6464 = vmatprep.mubr.bf16.mxu0 %v6033_v3 }
 0x78c   :  { %6465 = vmatmul.mubr.bf16.vlgmr.msra.gmra.mrb[16].mxu0 %v6032_v63 }
 0x78d   :  { %6474 = vmatpush1.bf16.msra.mxu0 %v7474_v46  ;;  %6505 = vmatprep.mubr.bf16.mxu0 %v6035_v42 }
 0x78e   :  { %6475 = vmatprep.subr.bf16.mxu0 %v7479_v23 }
 0x791   :  { %6476 = vmatpush1.bf16.msra.mxu0 %v7477_v16 }
 0x792   :  { %6477 = vmatprep.subr.bf16.mxu0 %v7482_v36 }
 0x795   :  { %6478 = vmatpush1.bf16.msra.mxu0 %v7480_v35 }
 0x796   :  { %6479 = vmatprep.subr.bf16.mxu0 %v7485_v47 }
 0x799   :  { %6480 = vmatpush1.bf16.msra.mxu0 %v7483_v51 }
 0x79a   :  { %6481 = vmatprep.subr.bf16.mxu0 %v7488_v43 }
 0x79d   :  { %6482 = vmatpush1.bf16.msra.mxu0 %v7486_v41 }
 0x79e   :  { %6483 = vmatprep.subr.bf16.mxu0 %v7491_v19 }
 0x7a1   :  { %6484 = vmatpush1.bf16.msra.mxu0 %v7489_v44 }
 0x7a2   :  { %6485 = vmatprep.subr.bf16.mxu0 %v7494_v5 }
 0x7a5   :  { %6486 = vmatpush1.bf16.msra.mxu0 %v7492_v56 }
 0x7a6   :  { %6487 = vmatprep.subr.bf16.mxu0 %v7497_v39 }
 0x7a9   :  { %6488 = vmatpush1.bf16.msra.mxu0 %v7495_v13 }
 0x7aa   :  { %6489 = vmatprep.subr.bf16.mxu0 %v7500_v55 }
 0x7ad   :  { %6490 = vmatpush1.bf16.msra.mxu0 %v7498_v15 }
 0x7ae   :  { %6491 = vmatprep.subr.bf16.mxu0 %v7503_v45 }
 0x7b1   :  { %6492 = vmatpush1.bf16.msra.mxu0 %v7501_v21 }
 0x7b2   :  { %6493 = vmatprep.subr.bf16.mxu0 %v7506_v7 }
 0x7b5   :  { %6494 = vmatpush1.bf16.msra.mxu0 %v7504_v24 }
 0x7b6   :  { %6495 = vmatprep.subr.bf16.mxu0 %v7509_v29 }
 0x7b9   :  { %6496 = vmatpush1.bf16.msra.mxu0 %v7507_v6 }
 0x7ba   :  { %6497 = vmatprep.subr.bf16.mxu0 %v7512_v4 }
 0x7bd   :  { %6498 = vmatpush1.bf16.msra.mxu0 %v7510_v11 }
 0x7be   :  { %6499 = vmatprep.subr.bf16.mxu0 %v7515_v62 }
 0x7c1   :  { %6500 = vmatpush1.bf16.msra.mxu0 %v7513_v59 }
 0x7c2   :  { %6501 = vmatprep.subr.bf16.mxu0 %v7518_v54 }
 0x7c5   :  { %6502 = vmatpush1.bf16.msra.mxu0 %v7516_v40 }
 0x7c6   :  { %6503 = vmatprep.subr.bf16.mxu0 %v7521_v2 }
 0x7c9   :  { %6504 = vmatpush1.bf16.msra.mxu0 %v7519_v25 }
 0x7cc   :  { %6506 = vmatmul.mubr.bf16.vlgmr.msra.gmra.mrb[16].mxu0 %v6034_v14 }
 0x7cd   :  { %7873 = shalt.err (!%p7870_p11)
}
 0x7ce   :  { %s7874_s0 = scalar_lea.hbm %s8976_s13, 512 }
 0x7cf   :  { %p7875_p12 = scmp.ne.s32.totalorder %s8976_s13, %s7874_s0  ;;  %p7878_p13 = scmp.lt.u32.totalorder %s7874_s0, %s8976_s13 }
 0x7d1   :  { %p7880_p0 = pnand %p7878_p13, %p7875_p12 }
 0x7d3   :  { %7883 = shalt.err (!%p7880_p0)
}
 0x7d4   :  { %6539 = dma.vmem_to_hbm [thread:$0]  %s6534_s22, 512, %s8976_s13, [#allocation28], %s7950_s24, %s7950_s24, %s7951_s29  }
 0x7d5   :  { %s7966_s8 = smov [#allocation29]  }
 0x7d6   :  { %s6545_s3 = sshll.u32 %s7966_s8, 4  ;;  %s6546_s3 = int_to_ptr.vmem [resolvable:$true] %s6545_s3 }
 0x7d7   :  { %s7884_s7 = scalar_lea.vmem %s6546_s3, 512  ;;  %p7889_p2 = scmp.lt.s32.totalorder %s6546_s3, %s6546_s3 }
 0x7d8   :  { %p7885_p1 = scmp.ne.s32.totalorder %s6546_s3, %s7884_s7  ;;  %p7890_p3 = scmp.lt.s32.totalorder %s7884_s7, %s7884_s7 }
 0x7da   :  { %p7891_p4 = por %p7890_p3, %p7889_p2 }
 0x7dc   :  { %p7892_p5 = pnand %p7891_p4, %p7885_p1 }
 0x7de   :  { %7895 = shalt.err (!%p7892_p5)
}
 0x7df   :  { %s7896_s17 = scalar_lea.hbm %s8977_s14, 512 }
 0x7e0   :  { %p7897_p6 = scmp.ne.s32.totalorder %s8977_s14, %s7896_s17  ;;  %p7900_p7 = scmp.lt.u32.totalorder %s7896_s17, %s8977_s14 }
 0x7e2   :  { %p7902_p8 = pnand %p7900_p7, %p7897_p6 }
 0x7e4   :  { %7905 = shalt.err (!%p7902_p8)
}
 0x7e5   :  { %6551 = dma.vmem_to_hbm [thread:$0]  %s6546_s3, 512, %s8977_s14, [#allocation28], %s7950_s24, %s7950_s24, %s7951_s29   ;;  %v6100_v1 = vld [vmem:[#allocation25] sm:$0x3] }
 0x7e6   :  { %v6105_v26 = vrot.slane %v6100_v1, %v8281_v0  ;;  %v6109_v53 = vrot.slane %v6100_v1, %v8242_v50  ;;  %s7967_s1 = smov [#allocation26]  }
 0x7e7   :  { %s6524_s28 = sshll.u32 %s7967_s1, 4  ;;  %s6525_s28 = int_to_ptr.vmem [resolvable:$true] %s6524_s28 }
 0x7e8   :  { %s7906_s14 = scalar_lea.vmem %s6525_s28, 256  ;;  %p7911_p10 = scmp.lt.s32.totalorder %s6525_s28, %s6525_s28 }
 0x7e9   :  { %p7907_p9 = scmp.ne.s32.totalorder %s6525_s28, %s7906_s14  ;;  %p7912_p11 = scmp.lt.s32.totalorder %s7906_s14, %s7906_s14 }
 0x7eb   :  { %p7913_p12 = por %p7912_p11, %p7911_p10 }
 0x7ed   :  { %p7914_p13 = pnand %p7913_p12, %p7907_p9 }
 0x89f   :  { %v6507_v49 = vpop.f32.mrb[16].mxu0 }
 0x8a0   :  { %v7354_v38 = vadd.f32 %v6507_v49, %v6105_v26  ;;  %v6509_v61 = vpop.f32.mrb[17].mxu0 }
 0x8a1   :  { %v7355_v52 = vadd.f32 %v6509_v61, %v6109_v53  ;;  %v6511_v20 = vpop.f32.mrb[18].mxu0 }
 0x8a2   :  { %7604 = vtanh.f32 %v7354_v38  ;;  %v6512_v30 = vpop.f32.mrb[19].mxu0 }
 0x8a3   :  { %7606 = vtanh.f32 %v7355_v52 }
 0x8ac   :  { %v7605_v22 = vpop.eup %7604 }
 0x8ad   :  { %v7607_v17 = vpop.eup %7606  ;;  %6516 = vst [vmem:[#allocation26] sm:$0xff] %v7605_v22 }
 0x8ae   :  { %6517 = vst [vmem:[#allocation26 + $0x8] sm:$0xff] %v7607_v17 }
 0x8af   :  { %7917 = shalt.err (!%p7914_p13)
}
 0x8b0   :  { %s7918_s27 = scalar_lea.hbm %s8975_s12, 256 }
 0x8b1   :  { %p7919_p0 = scmp.ne.s32.totalorder %s8975_s12, %s7918_s27  ;;  %p7922_p1 = scmp.lt.u32.totalorder %s7918_s27, %s8975_s12 }
 0x8b3   :  { %p7924_p2 = pnand %p7922_p1, %p7919_p0 }
 0x8b5   :  { %7927 = shalt.err (!%p7924_p2)
}
 0x8b6   :  { %6527 = dma.vmem_to_hbm [thread:$0]  %s6525_s28, 256, %s8975_s12, [#allocation10]  }
 0x8b7   :  { %7942 = dma.done.wait [#allocation10], 256  }
 0x8b8   :  { %7943 = vsyncadd [#allocation10], 4294967040 }
 0x8b9   :  { %7944 = dma.done.wait [#allocation28], 1024  }
 0x8ba   :  { %7945 = vsyncadd [#allocation28], 4294966272 }
 0x8bb   :  { %6561 = vsyncpa [#allocation9], 1 }
 0x8bc   :  { %6562 = vsyncpa [#allocation12], 1 }
 0x8bd   :  { %6563 = vsyncpa [#allocation15], 1 }
 0x8be   :  { %6564 = vsyncpa [#allocation18], 1 }
 0x8bf   :  { %6565 = vsyncpa [#allocation21], 1 }
 0x8c0   :  { %6566 = vsyncpa [#allocation24], 1 }
 0x8c1   :  { %6567 = vsyncpa [#allocation10], 1 }
 0x8c2   :  { %6568 = vsyncpa [#allocation28], 1 }

</bundles_post_ra>
